<compile_context>
chip_gen: v7x
topology: tpu7x:2x2x1
jax: 0.10.0
libtpu: 0.0.40
codegen_flags: <defaults>
</compile_context>

<pallas_src>
import jax
import jax.numpy as jnp
from jax.experimental import pallas as pl
from jax.experimental.pallas import tpu as pltpu

# ---------------- scaled-down CLIP ViT config ----------------
BATCH = 2
IN_CH = 3
IMG = 32
PATCH = 8
GRID = IMG // PATCH
N_PATCH = GRID * GRID
SEQ = N_PATCH + 1            # +1 class token
ROWS = BATCH * SEQ           # batch folded into matmul M dimension
WIDTH = 64                   # transformer width (768 in real ViT-B/32)
HEADS = 4
HEAD_DIM = WIDTH // HEADS
LAYERS = 2                   # 12 in real ViT-B/32
MLP = 4 * WIDTH
EMBED = 512                  # CLIP image-feature dim -> classifier in_features
NUM_CLASSES = 10
CLS_PAD = 128                # lane-dense classifier output, sliced to NUM_CLASSES outside
EPS = 1e-5
SCALE = 1.0 / (HEAD_DIM ** 0.5)
PPD = IN_CH * PATCH * PATCH  # flattened patch dim


# ---------------- in-kernel helpers ----------------

def _ln(x, g, b):
    mu = jnp.mean(x, axis=-1, keepdims=True)
    var = jnp.mean(jnp.square(x - mu), axis=-1, keepdims=True)
    return (x - mu) * jax.lax.rsqrt(var + EPS) * g + b


def _mm(a_f32, w_bf16):
    """bf16 MXU matmul with f32 accumulation."""
    return jnp.dot(a_f32.astype(jnp.bfloat16), w_bf16,
                   preferred_element_type=jnp.float32)


# ---------------- the single fused kernel ----------------

def _clip_kernel(
        # stem (layer-invariant)
        xp_ref, wp_ref, posc_ref, lnpre_g_ref, lnpre_b_ref,
        # per-layer (stacked, double-buffered across the grid)
        ln1g_ref, ln1b_ref, wqkv_ref, bqkv_ref, wo_ref, bo_ref,
        ln2g_ref, ln2b_ref, wfc_ref, bfc_ref, wproj_ref, bproj_ref,
        # tail (layer-invariant)
        lnpo_g_ref, lnpo_b_ref, wvis_ref, wcls_ref, bcls_ref,
        # output + resident activation scratch
        o_ref, h_ref):
    l = pl.program_id(0)

    # ---- stem: patch-embed matmul + (pos + class) table + ln_pre ----
    @pl.when(l == 0)
    def _():
        tok = _mm(xp_ref[...], wp_ref[...])                       # [B*SEQ, W]
        h_ref[...] = _ln(tok + posc_ref[...], lnpre_g_ref[...], lnpre_b_ref[...])

    # ---- transformer block (every grid step, on resident h) ----
    h = h_ref[...]                                                # [B*SEQ, W] f32
    hn = _ln(h, ln1g_ref[...], ln1b_ref[...])
    qkv = (_mm(hn, wqkv_ref[...]) + bqkv_ref[...]).astype(jnp.bfloat16)  # [B*SEQ, 3W] bf16

    # Per-batch, per-head score / softmax / PV on static slices of the bf16
    # QKV tile; per-head outputs are lane-concatenated so the out-projection
    # is a single K=WIDTH matmul over all rows.
    hv_rows = []
    for b in range(BATCH):
        rows = qkv[b * SEQ:(b + 1) * SEQ, :]                      # [SEQ, 3W] bf16
        head_parts = []
        for hd in range(HEADS):
            lo = hd * HEAD_DIM
            qh = rows[:, lo:lo + HEAD_DIM]
            kh = rows[:, WIDTH + lo:WIDTH + lo + HEAD_DIM]
            vh = rows[:, 2 * WIDTH + lo:2 * WIDTH + lo + HEAD_DIM]
            # NT matmul (contract last dims) -> no explicit k.T transpose.
            s = jax.lax.dot_general(qh, kh, (((1,), (1,)), ((), ())),
                                    preferred_element_type=jnp.float32) * SCALE
            s = s - jnp.max(s, axis=-1, keepdims=True)
            p = jnp.exp(s)
            p = p * pl.reciprocal(jnp.sum(p, axis=-1, keepdims=True), approx=True)
            head_parts.append(jnp.dot(p.astype(jnp.bfloat16), vh,
                                      preferred_element_type=jnp.float32))
        hv_rows.append(jnp.concatenate(head_parts, axis=-1))      # [SEQ, W]
    hv_all = jnp.concatenate(hv_rows, axis=0)                     # [B*SEQ, W]

    attn = _mm(hv_all, wo_ref[...]) + bo_ref[...]                 # single out-proj
    h2 = h + attn                                                 # residual

    hn2 = _ln(h2, ln2g_ref[...], ln2b_ref[...])
    z = _mm(hn2, wfc_ref[...]) + bfc_ref[...]                     # [B*SEQ, MLP]
    z = z * jax.nn.sigmoid(1.702 * z)                             # CLIP QuickGELU
    z = _mm(z, wproj_ref[...]) + bproj_ref[...]                   # [B*SEQ, W]
    h_ref[...] = h2 + z                                           # residual

    # ---- tail: ln_post -> visual proj -> L2-normalize -> classifier ----
    @pl.when(l == pl.num_programs(0) - 1)
    def _():
        hL = h_ref[...]
        cls_rows = jnp.concatenate(
            [hL[b * SEQ:b * SEQ + 1, :] for b in range(BATCH)], axis=0)  # [B, W]
        cn = _ln(cls_rows, lnpo_g_ref[...], lnpo_b_ref[...])
        feat = _mm(cn, wvis_ref[...])                             # [B, EMBED]
        # f / f.norm(dim=-1) -- matches CLIP reference (no eps).
        fn = feat * jax.lax.rsqrt(jnp.sum(feat * feat, axis=-1, keepdims=True))
        o_ref[...] = _mm(fn, wcls_ref[...]) + bcls_ref[...]       # [B, CLS_PAD] lane-dense


# ---------------- parameters (deterministic synthetic init) ----------------

def init_params(key):
    keys = iter(jax.random.split(key, 16))

    def nrm(shape, std=0.02):
        return std * jax.random.normal(next(keys), shape, jnp.float32)

    def bf(x):
        return x.astype(jnp.bfloat16)

    class_emb = nrm((WIDTH,))
    pos_emb = nrm((SEQ, WIDTH))
    # class embedding folded into the position table (class-token patch row is
    # zero), then pre-tiled over batch so the stem adds it in one VPU pass.
    pos_cls = pos_emb.at[0].add(class_emb)
    posc = jnp.tile(pos_cls, (BATCH, 1))                          # [B*SEQ, W]

    p = {
        # Conv2d(C, W, P, stride=P, bias=False) stored pre-transposed as a
        # (C*P*P, W) patch-matmul weight, bf16 for the MXU.
        "patch_w": bf(nrm((PPD, WIDTH))),
        "posc": posc,
        "ln_pre_g": jnp.ones((1, WIDTH), jnp.float32),
        "ln_pre_b": jnp.zeros((1, WIDTH), jnp.float32),
        "ln_post_g": jnp.ones((1, WIDTH), jnp.float32),
        "ln_post_b": jnp.zeros((1, WIDTH), jnp.float32),
        "vis_proj": bf(nrm((WIDTH, EMBED))),                      # x @ proj (no bias)
        # nn.Linear(512, num_classes): pre-transposed + zero-padded to 128 lanes.
        "cls_w": bf(jnp.pad(nrm((EMBED, NUM_CLASSES)),
                            ((0, 0), (0, CLS_PAD - NUM_CLASSES)))),
        "cls_b": jnp.zeros((1, CLS_PAD), jnp.float32),
        # per-layer weights stacked on a leading LAYERS axis (double-buffered
        # across the grid), all matmul weights pre-transposed + bf16.
        "ln1_g": jnp.ones((LAYERS, 1, WIDTH), jnp.float32),
        "ln1_b": jnp.zeros((LAYERS, 1, WIDTH), jnp.float32),
        "wqkv": bf(nrm((LAYERS, WIDTH, 3 * WIDTH))),
        "bqkv": jnp.zeros((LAYERS, 1, 3 * WIDTH), jnp.float32),
        "wo": bf(nrm((LAYERS, WIDTH, WIDTH))),
        "bo": jnp.zeros((LAYERS, 1, WIDTH), jnp.float32),
        "ln2_g": jnp.ones((LAYERS, 1, WIDTH), jnp.float32),
        "ln2_b": jnp.zeros((LAYERS, 1, WIDTH), jnp.float32),
        "wfc": bf(nrm((LAYERS, WIDTH, MLP))),
        "bfc": jnp.zeros((LAYERS, 1, MLP), jnp.float32),
        "wproj": bf(nrm((LAYERS, MLP, WIDTH))),
        "bproj": jnp.zeros((LAYERS, 1, WIDTH), jnp.float32),
    }
    return p


# ---------------- forward pass ----------------

def _full_spec(shape):
    # whole-array block, same block for every grid step (DMA'd once).
    return pl.BlockSpec(shape, lambda l: tuple(0 for _ in shape))


def _stacked_spec(shape):
    # [LAYERS, ...] weight: layer dim squeezed, block index follows the grid.
    n = len(shape)
    return pl.BlockSpec((None,) + shape, lambda l: (l,) + (0,) * n)


def last_layers_clip_forward(p, x):
    B = x.shape[0]
    # Conv2d(C, W, kernel=P, stride=P, bias=False) == non-overlapping patch
    # extract + matmul.  A zero row is prepended per batch for the class-token
    # position (its embedding comes from the posc table inside the kernel),
    # then batch is folded into rows for the in-kernel matmuls.
    xp = x.reshape(B, IN_CH, GRID, PATCH, GRID, PATCH).transpose(0, 2, 4, 1, 3, 5)
    xp = xp.reshape(B, N_PATCH, PPD)
    xp = jnp.pad(xp, ((0, 0), (1, 0), (0, 0)))                    # [B, SEQ, PPD]
    xp = xp.reshape(B * SEQ, PPD)                                 # [B*SEQ, PPD]

    in_specs = [
        _full_spec((ROWS, PPD)),            # xp
        _full_spec((PPD, WIDTH)),           # patch_w
        _full_spec((ROWS, WIDTH)),          # posc
        _full_spec((1, WIDTH)),             # ln_pre_g
        _full_spec((1, WIDTH)),             # ln_pre_b
        _stacked_spec((1, WIDTH)),          # ln1_g
        _stacked_spec((1, WIDTH)),          # ln1_b
        _stacked_spec((WIDTH, 3 * WIDTH)),  # wqkv
        _stacked_spec((1, 3 * WIDTH)),      # bqkv
        _stacked_spec((WIDTH, WIDTH)),      # wo
        _stacked_spec((1, WIDTH)),          # bo
        _stacked_spec((1, WIDTH)),          # ln2_g
        _stacked_spec((1, WIDTH)),          # ln2_b
        _stacked_spec((WIDTH, MLP)),        # wfc
        _stacked_spec((1, MLP)),            # bfc
        _stacked_spec((MLP, WIDTH)),        # wproj
        _stacked_spec((1, WIDTH)),          # bproj
        _full_spec((1, WIDTH)),             # ln_post_g
        _full_spec((1, WIDTH)),             # ln_post_b
        _full_spec((WIDTH, EMBED)),         # vis_proj
        _full_spec((EMBED, CLS_PAD)),       # cls_w
        _full_spec((1, CLS_PAD)),           # cls_b
    ]

    logits_pad = pl.pallas_call(
        _clip_kernel,
        out_shape=jax.ShapeDtypeStruct((B, CLS_PAD), jnp.float32),
        grid_spec=pltpu.PrefetchScalarGridSpec(
            num_scalar_prefetch=0,
            grid=(LAYERS,),
            in_specs=in_specs,
            out_specs=pl.BlockSpec((B, CLS_PAD), lambda l: (0, 0)),
            scratch_shapes=[pltpu.VMEM((ROWS, WIDTH), jnp.float32)],
        ),
        compiler_params=pltpu.CompilerParams(
            # layer axis is a sequential carry on the resident h scratch
            dimension_semantics=("arbitrary",),
            # headroom for the 2-deep stacked-weight pipeline (sized for the
            # full ViT-B/32 working set; toy size uses a tiny fraction)
            vmem_limit_bytes=48 << 20,
        ),
    )(
        xp, p["patch_w"], p["posc"], p["ln_pre_g"], p["ln_pre_b"],
        p["ln1_g"], p["ln1_b"], p["wqkv"], p["bqkv"], p["wo"], p["bo"],
        p["ln2_g"], p["ln2_b"], p["wfc"], p["bfc"], p["wproj"], p["bproj"],
        p["ln_post_g"], p["ln_post_b"], p["vis_proj"], p["cls_w"], p["cls_b"],
    )

    return logits_pad[:, :NUM_CLASSES]


if __name__ == "__main__":
    key = jax.random.PRNGKey(0)
    pkey, xkey = jax.random.split(key)
    params = init_params(pkey)
    x = jax.random.normal(xkey, (BATCH, IN_CH, IMG, IMG), jnp.float32)     # NCHW

    logits = jax.jit(last_layers_clip_forward)(params, x)
    jax.block_until_ready(logits)
    assert logits.shape == (BATCH, NUM_CLASSES)
    assert bool(jnp.all(jnp.isfinite(logits)))
    print("KERNEL_OK")
</pallas_src>

<mosaic_0001>
module attributes {stable_mosaic.version = 11 : i64} {
  func.func @_clip_kernel(%arg0: i32, %arg1: memref<34x192xf32, #tpu.memory_space<vmem>>, %arg2: memref<192x64xbf16, #tpu.memory_space<vmem>>, %arg3: memref<34x64xf32, #tpu.memory_space<vmem>>, %arg4: memref<1x64xf32, #tpu.memory_space<vmem>>, %arg5: memref<1x64xf32, #tpu.memory_space<vmem>>, %arg6: memref<1x1x64xf32, #tpu.memory_space<vmem>>, %arg7: memref<1x1x64xf32, #tpu.memory_space<vmem>>, %arg8: memref<1x64x192xbf16, #tpu.memory_space<vmem>>, %arg9: memref<1x1x192xf32, #tpu.memory_space<vmem>>, %arg10: memref<1x64x64xbf16, #tpu.memory_space<vmem>>, %arg11: memref<1x1x64xf32, #tpu.memory_space<vmem>>, %arg12: memref<1x1x64xf32, #tpu.memory_space<vmem>>, %arg13: memref<1x1x64xf32, #tpu.memory_space<vmem>>, %arg14: memref<1x64x256xbf16, #tpu.memory_space<vmem>>, %arg15: memref<1x1x256xf32, #tpu.memory_space<vmem>>, %arg16: memref<1x256x64xbf16, #tpu.memory_space<vmem>>, %arg17: memref<1x1x64xf32, #tpu.memory_space<vmem>>, %arg18: memref<1x64xf32, #tpu.memory_space<vmem>>, %arg19: memref<1x64xf32, #tpu.memory_space<vmem>>, %arg20: memref<64x512xbf16, #tpu.memory_space<vmem>>, %arg21: memref<512x128xbf16, #tpu.memory_space<vmem>>, %arg22: memref<1x128xf32, #tpu.memory_space<vmem>>, %arg23: memref<2x128xf32, #tpu.memory_space<vmem>>, %arg24: memref<34x64xf32, #tpu.memory_space<vmem>>) attributes {dimension_semantics = [#tpu.dimension_semantics<arbitrary>], iteration_bounds = array<i64: 2>, scalar_prefetch = 0 : i64, scratch_operands = 1 : i64, tpu.core_type = #tpu.core_type<tc>, window_params = [{pipeline_mode = #tpu.pipeline_mode<synchronous>, transform_indices = @transform_0, window_bounds = array<i64: 34, 192>}, {pipeline_mode = #tpu.pipeline_mode<synchronous>, transform_indices = @transform_1, window_bounds = array<i64: 192, 64>}, {pipeline_mode = #tpu.pipeline_mode<synchronous>, transform_indices = @transform_2, window_bounds = array<i64: 34, 64>}, {pipeline_mode = #tpu.pipeline_mode<synchronous>, transform_indices = @transform_3, window_bounds = array<i64: 1, 64>}, {pipeline_mode = #tpu.pipeline_mode<synchronous>, transform_indices = @transform_4, window_bounds = array<i64: 1, 64>}, {transform_indices = @transform_5, window_bounds = array<i64: 1, 1, 64>}, {transform_indices = @transform_6, window_bounds = array<i64: 1, 1, 64>}, {transform_indices = @transform_7, window_bounds = array<i64: 1, 64, 192>}, {transform_indices = @transform_8, window_bounds = array<i64: 1, 1, 192>}, {transform_indices = @transform_9, window_bounds = array<i64: 1, 64, 64>}, {transform_indices = @transform_10, window_bounds = array<i64: 1, 1, 64>}, {transform_indices = @transform_11, window_bounds = array<i64: 1, 1, 64>}, {transform_indices = @transform_12, window_bounds = array<i64: 1, 1, 64>}, {transform_indices = @transform_13, window_bounds = array<i64: 1, 64, 256>}, {transform_indices = @transform_14, window_bounds = array<i64: 1, 1, 256>}, {transform_indices = @transform_15, window_bounds = array<i64: 1, 256, 64>}, {transform_indices = @transform_16, window_bounds = array<i64: 1, 1, 64>}, {pipeline_mode = #tpu.pipeline_mode<synchronous>, transform_indices = @transform_17, window_bounds = array<i64: 1, 64>}, {pipeline_mode = #tpu.pipeline_mode<synchronous>, transform_indices = @transform_18, window_bounds = array<i64: 1, 64>}, {pipeline_mode = #tpu.pipeline_mode<synchronous>, transform_indices = @transform_19, window_bounds = array<i64: 64, 512>}, {pipeline_mode = #tpu.pipeline_mode<synchronous>, transform_indices = @transform_20, window_bounds = array<i64: 512, 128>}, {pipeline_mode = #tpu.pipeline_mode<synchronous>, transform_indices = @transform_21, window_bounds = array<i64: 1, 128>}, {pipeline_mode = #tpu.pipeline_mode<synchronous>, transform_indices = @transform_22, window_bounds = array<i64: 2, 128>}]} {
    %c0_i32 = arith.constant 0 : i32
    %0 = arith.cmpi eq, %arg0, %c0_i32 : i32
    %1 = arith.extui %0 : i1 to i32
    %c0_i32_0 = arith.constant 0 : i32
    %2 = arith.cmpi ne, %1, %c0_i32_0 : i32
    scf.if %2 {
      %c0_96 = arith.constant 0 : index
      %c0_97 = arith.constant 0 : index
      %252 = vector.load %arg1[%c0_96, %c0_97] : memref<34x192xf32, #tpu.memory_space<vmem>>, vector<34x192xf32>
      %c0_98 = arith.constant 0 : index
      %c0_99 = arith.constant 0 : index
      %253 = vector.load %arg2[%c0_98, %c0_99] : memref<192x64xbf16, #tpu.memory_space<vmem>>, vector<192x64xbf16>
      %254 = arith.truncf %252 : vector<34x192xf32> to vector<34x192xbf16>
      %cst_100 = arith.constant dense<0.000000e+00> : vector<34x64xf32>
      %255 = tpu.matmul %254, %253, %cst_100 {dimension_numbers = #tpu.dot_dimension_numbers<[1], [0], [0], [1], [0, 0, 1, 1], [], []>} : vector<34x192xbf16>, vector<192x64xbf16>, vector<34x64xf32> -> vector<34x64xf32>
      %c0_101 = arith.constant 0 : index
      %c0_102 = arith.constant 0 : index
      %256 = vector.load %arg3[%c0_101, %c0_102] : memref<34x64xf32, #tpu.memory_space<vmem>>, vector<34x64xf32>
      %257 = arith.addf %255, %256 : vector<34x64xf32>
      %c0_103 = arith.constant 0 : index
      %c0_104 = arith.constant 0 : index
      %258 = vector.load %arg4[%c0_103, %c0_104] : memref<1x64xf32, #tpu.memory_space<vmem>>, vector<1x64xf32>
      %c0_105 = arith.constant 0 : index
      %c0_106 = arith.constant 0 : index
      %259 = vector.load %arg5[%c0_105, %c0_106] : memref<1x64xf32, #tpu.memory_space<vmem>>, vector<1x64xf32>
      %cst_107 = arith.constant dense<0.000000e+00> : vector<34xf32>
      %260 = vector.multi_reduction <add>, %257, %cst_107 [1] : vector<34x64xf32> to vector<34xf32>
      %261 = vector.shape_cast %260 : vector<34xf32> to vector<34x1xf32>
      %cst_108 = arith.constant 6.400000e+01 : f32
      %262 = vector.broadcast %cst_108 : f32 to vector<34x1xf32>
      %263 = arith.divf %261, %262 : vector<34x1xf32>
      %264 = vector.broadcast %263 : vector<34x1xf32> to vector<34x64xf32>
      %265 = arith.subf %257, %264 : vector<34x64xf32>
      %266 = arith.mulf %265, %265 : vector<34x64xf32>
      %cst_109 = arith.constant dense<0.000000e+00> : vector<34xf32>
      %267 = vector.multi_reduction <add>, %266, %cst_109 [1] : vector<34x64xf32> to vector<34xf32>
      %268 = vector.shape_cast %267 : vector<34xf32> to vector<34x1xf32>
      %cst_110 = arith.constant 6.400000e+01 : f32
      %269 = vector.broadcast %cst_110 : f32 to vector<34x1xf32>
      %270 = arith.divf %268, %269 : vector<34x1xf32>
      %271 = vector.broadcast %263 : vector<34x1xf32> to vector<34x64xf32>
      %272 = arith.subf %257, %271 : vector<34x64xf32>
      %cst_111 = arith.constant 9.99999974E-6 : f32
      %273 = vector.broadcast %cst_111 : f32 to vector<34x1xf32>
      %274 = arith.addf %270, %273 : vector<34x1xf32>
      %275 = math.rsqrt %274 : vector<34x1xf32>
      %276 = vector.broadcast %275 : vector<34x1xf32> to vector<34x64xf32>
      %277 = arith.mulf %272, %276 : vector<34x64xf32>
      %278 = vector.broadcast %258 : vector<1x64xf32> to vector<34x64xf32>
      %279 = arith.mulf %277, %278 : vector<34x64xf32>
      %280 = vector.broadcast %259 : vector<1x64xf32> to vector<34x64xf32>
      %281 = arith.addf %279, %280 : vector<34x64xf32>
      %c0_112 = arith.constant 0 : index
      %c0_113 = arith.constant 0 : index
      %282 = vector.load %arg24[%c0_112, %c0_113] : memref<34x64xf32, #tpu.memory_space<vmem>>, vector<34x64xf32>
      tpu.vector_store %arg24[%c0_112, %c0_113], %281 {strides = array<i32>} : memref<34x64xf32, #tpu.memory_space<vmem>>, vector<34x64xf32>,
    } else {
    }
    %c0 = arith.constant 0 : index
    %c0_1 = arith.constant 0 : index
    %3 = vector.load %arg24[%c0, %c0_1] : memref<34x64xf32, #tpu.memory_space<vmem>>, vector<34x64xf32>
    %c0_2 = arith.constant 0 : index
    %c0_3 = arith.constant 0 : index
    %c0_4 = arith.constant 0 : index
    %4 = vector.load %arg6[%c0_2, %c0_3, %c0_4] : memref<1x1x64xf32, #tpu.memory_space<vmem>>, vector<1x1x64xf32>
    %5 = vector.shape_cast %4 : vector<1x1x64xf32> to vector<1x64xf32>
    %c0_5 = arith.constant 0 : index
    %c0_6 = arith.constant 0 : index
    %c0_7 = arith.constant 0 : index
    %6 = vector.load %arg7[%c0_5, %c0_6, %c0_7] : memref<1x1x64xf32, #tpu.memory_space<vmem>>, vector<1x1x64xf32>
    %7 = vector.shape_cast %6 : vector<1x1x64xf32> to vector<1x64xf32>
    %cst = arith.constant dense<0.000000e+00> : vector<34xf32>
    %8 = vector.multi_reduction <add>, %3, %cst [1] : vector<34x64xf32> to vector<34xf32>
    %9 = vector.shape_cast %8 : vector<34xf32> to vector<34x1xf32>
    %cst_8 = arith.constant 6.400000e+01 : f32
    %10 = vector.broadcast %cst_8 : f32 to vector<34x1xf32>
    %11 = arith.divf %9, %10 : vector<34x1xf32>
    %12 = vector.broadcast %11 : vector<34x1xf32> to vector<34x64xf32>
    %13 = arith.subf %3, %12 : vector<34x64xf32>
    %14 = arith.mulf %13, %13 : vector<34x64xf32>
    %cst_9 = arith.constant dense<0.000000e+00> : vector<34xf32>
    %15 = vector.multi_reduction <add>, %14, %cst_9 [1] : vector<34x64xf32> to vector<34xf32>
    %16 = vector.shape_cast %15 : vector<34xf32> to vector<34x1xf32>
    %cst_10 = arith.constant 6.400000e+01 : f32
    %17 = vector.broadcast %cst_10 : f32 to vector<34x1xf32>
    %18 = arith.divf %16, %17 : vector<34x1xf32>
    %19 = vector.broadcast %11 : vector<34x1xf32> to vector<34x64xf32>
    %20 = arith.subf %3, %19 : vector<34x64xf32>
    %cst_11 = arith.constant 9.99999974E-6 : f32
    %21 = vector.broadcast %cst_11 : f32 to vector<34x1xf32>
    %22 = arith.addf %18, %21 : vector<34x1xf32>
    %23 = math.rsqrt %22 : vector<34x1xf32>
    %24 = vector.broadcast %23 : vector<34x1xf32> to vector<34x64xf32>
    %25 = arith.mulf %20, %24 : vector<34x64xf32>
    %26 = vector.broadcast %5 : vector<1x64xf32> to vector<34x64xf32>
    %27 = arith.mulf %25, %26 : vector<34x64xf32>
    %28 = vector.broadcast %7 : vector<1x64xf32> to vector<34x64xf32>
    %29 = arith.addf %27, %28 : vector<34x64xf32>
    %c0_12 = arith.constant 0 : index
    %c0_13 = arith.constant 0 : index
    %c0_14 = arith.constant 0 : index
    %30 = vector.load %arg8[%c0_12, %c0_13, %c0_14] : memref<1x64x192xbf16, #tpu.memory_space<vmem>>, vector<1x64x192xbf16>
    %31 = vector.shape_cast %30 : vector<1x64x192xbf16> to vector<64x192xbf16>
    %32 = arith.truncf %29 : vector<34x64xf32> to vector<34x64xbf16>
    %cst_15 = arith.constant dense<0.000000e+00> : vector<34x192xf32>
    %33 = tpu.matmul %32, %31, %cst_15 {dimension_numbers = #tpu.dot_dimension_numbers<[1], [0], [0], [1], [0, 0, 1, 1], [], []>} : vector<34x64xbf16>, vector<64x192xbf16>, vector<34x192xf32> -> vector<34x192xf32>
    %c0_16 = arith.constant 0 : index
    %c0_17 = arith.constant 0 : index
    %c0_18 = arith.constant 0 : index
    %34 = vector.load %arg9[%c0_16, %c0_17, %c0_18] : memref<1x1x192xf32, #tpu.memory_space<vmem>>, vector<1x1x192xf32>
    %35 = vector.shape_cast %34 : vector<1x1x192xf32> to vector<1x192xf32>
    %36 = vector.broadcast %35 : vector<1x192xf32> to vector<34x192xf32>
    %37 = arith.addf %33, %36 : vector<34x192xf32>
    %38 = arith.truncf %37 : vector<34x192xf32> to vector<34x192xbf16>
    %39 = vector.extract_strided_slice %38 {offsets = [0, 0], sizes = [17, 192], strides = [1, 1]} : vector<34x192xbf16> to vector<17x192xbf16>
    %40 = vector.extract_strided_slice %39 {offsets = [0, 0], sizes = [17, 16], strides = [1, 1]} : vector<17x192xbf16> to vector<17x16xbf16>
    %41 = vector.extract_strided_slice %39 {offsets = [0, 64], sizes = [17, 16], strides = [1, 1]} : vector<17x192xbf16> to vector<17x16xbf16>
    %42 = vector.extract_strided_slice %39 {offsets = [0, 128], sizes = [17, 16], strides = [1, 1]} : vector<17x192xbf16> to vector<17x16xbf16>
    %cst_19 = arith.constant dense<0.000000e+00> : vector<17x17xf32>
    %43 = tpu.matmul %40, %41, %cst_19 {dimension_numbers = #tpu.dot_dimension_numbers<[1], [1], [0], [0], [0, 0, 1, 0], [], []>} : vector<17x16xbf16>, vector<17x16xbf16>, vector<17x17xf32> -> vector<17x17xf32>
    %cst_20 = arith.constant 2.500000e-01 : f32
    %44 = vector.broadcast %cst_20 : f32 to vector<17x17xf32>
    %45 = arith.mulf %43, %44 : vector<17x17xf32>
    %cst_21 = arith.constant dense<0xFF800000> : vector<17xf32>
    %46 = vector.multi_reduction <maximumf>, %45, %cst_21 [1] : vector<17x17xf32> to vector<17xf32>
    %47 = vector.shape_cast %46 : vector<17xf32> to vector<17x1xf32>
    %48 = vector.broadcast %47 : vector<17x1xf32> to vector<17x17xf32>
    %49 = arith.subf %45, %48 : vector<17x17xf32>
    %50 = math.exp %49 : vector<17x17xf32>
    %cst_22 = arith.constant dense<0.000000e+00> : vector<17xf32>
    %51 = vector.multi_reduction <add>, %50, %cst_22 [1] : vector<17x17xf32> to vector<17xf32>
    %52 = vector.shape_cast %51 : vector<17xf32> to vector<17x1xf32>
    %53 = tpu.reciprocal %52 {approx = true} : vector<17x1xf32> -> vector<17x1xf32>
    %54 = vector.broadcast %53 : vector<17x1xf32> to vector<17x17xf32>
    %55 = arith.mulf %50, %54 : vector<17x17xf32>
    %56 = arith.truncf %55 : vector<17x17xf32> to vector<17x17xbf16>
    %cst_23 = arith.constant dense<0.000000e+00> : vector<17x16xf32>
    %57 = tpu.matmul %56, %42, %cst_23 {dimension_numbers = #tpu.dot_dimension_numbers<[1], [0], [0], [1], [0, 0, 1, 1], [], []>} : vector<17x17xbf16>, vector<17x16xbf16>, vector<17x16xf32> -> vector<17x16xf32>
    %58 = vector.extract_strided_slice %39 {offsets = [0, 16], sizes = [17, 16], strides = [1, 1]} : vector<17x192xbf16> to vector<17x16xbf16>
    %59 = vector.extract_strided_slice %39 {offsets = [0, 80], sizes = [17, 16], strides = [1, 1]} : vector<17x192xbf16> to vector<17x16xbf16>
    %60 = vector.extract_strided_slice %39 {offsets = [0, 144], sizes = [17, 16], strides = [1, 1]} : vector<17x192xbf16> to vector<17x16xbf16>
    %cst_24 = arith.constant dense<0.000000e+00> : vector<17x17xf32>
    %61 = tpu.matmul %58, %59, %cst_24 {dimension_numbers = #tpu.dot_dimension_numbers<[1], [1], [0], [0], [0, 0, 1, 0], [], []>} : vector<17x16xbf16>, vector<17x16xbf16>, vector<17x17xf32> -> vector<17x17xf32>
    %cst_25 = arith.constant 2.500000e-01 : f32
    %62 = vector.broadcast %cst_25 : f32 to vector<17x17xf32>
    %63 = arith.mulf %61, %62 : vector<17x17xf32>
    %cst_26 = arith.constant dense<0xFF800000> : vector<17xf32>
    %64 = vector.multi_reduction <maximumf>, %63, %cst_26 [1] : vector<17x17xf32> to vector<17xf32>
    %65 = vector.shape_cast %64 : vector<17xf32> to vector<17x1xf32>
    %66 = vector.broadcast %65 : vector<17x1xf32> to vector<17x17xf32>
    %67 = arith.subf %63, %66 : vector<17x17xf32>
    %68 = math.exp %67 : vector<17x17xf32>
    %cst_27 = arith.constant dense<0.000000e+00> : vector<17xf32>
    %69 = vector.multi_reduction <add>, %68, %cst_27 [1] : vector<17x17xf32> to vector<17xf32>
    %70 = vector.shape_cast %69 : vector<17xf32> to vector<17x1xf32>
    %71 = tpu.reciprocal %70 {approx = true} : vector<17x1xf32> -> vector<17x1xf32>
    %72 = vector.broadcast %71 : vector<17x1xf32> to vector<17x17xf32>
    %73 = arith.mulf %68, %72 : vector<17x17xf32>
    %74 = arith.truncf %73 : vector<17x17xf32> to vector<17x17xbf16>
    %cst_28 = arith.constant dense<0.000000e+00> : vector<17x16xf32>
    %75 = tpu.matmul %74, %60, %cst_28 {dimension_numbers = #tpu.dot_dimension_numbers<[1], [0], [0], [1], [0, 0, 1, 1], [], []>} : vector<17x17xbf16>, vector<17x16xbf16>, vector<17x16xf32> -> vector<17x16xf32>
    %76 = vector.extract_strided_slice %39 {offsets = [0, 32], sizes = [17, 16], strides = [1, 1]} : vector<17x192xbf16> to vector<17x16xbf16>
    %77 = vector.extract_strided_slice %39 {offsets = [0, 96], sizes = [17, 16], strides = [1, 1]} : vector<17x192xbf16> to vector<17x16xbf16>
    %78 = vector.extract_strided_slice %39 {offsets = [0, 160], sizes = [17, 16], strides = [1, 1]} : vector<17x192xbf16> to vector<17x16xbf16>
    %cst_29 = arith.constant dense<0.000000e+00> : vector<17x17xf32>
    %79 = tpu.matmul %76, %77, %cst_29 {dimension_numbers = #tpu.dot_dimension_numbers<[1], [1], [0], [0], [0, 0, 1, 0], [], []>} : vector<17x16xbf16>, vector<17x16xbf16>, vector<17x17xf32> -> vector<17x17xf32>
    %cst_30 = arith.constant 2.500000e-01 : f32
    %80 = vector.broadcast %cst_30 : f32 to vector<17x17xf32>
    %81 = arith.mulf %79, %80 : vector<17x17xf32>
    %cst_31 = arith.constant dense<0xFF800000> : vector<17xf32>
    %82 = vector.multi_reduction <maximumf>, %81, %cst_31 [1] : vector<17x17xf32> to vector<17xf32>
    %83 = vector.shape_cast %82 : vector<17xf32> to vector<17x1xf32>
    %84 = vector.broadcast %83 : vector<17x1xf32> to vector<17x17xf32>
    %85 = arith.subf %81, %84 : vector<17x17xf32>
    %86 = math.exp %85 : vector<17x17xf32>
    %cst_32 = arith.constant dense<0.000000e+00> : vector<17xf32>
    %87 = vector.multi_reduction <add>, %86, %cst_32 [1] : vector<17x17xf32> to vector<17xf32>
    %88 = vector.shape_cast %87 : vector<17xf32> to vector<17x1xf32>
    %89 = tpu.reciprocal %88 {approx = true} : vector<17x1xf32> -> vector<17x1xf32>
    %90 = vector.broadcast %89 : vector<17x1xf32> to vector<17x17xf32>
    %91 = arith.mulf %86, %90 : vector<17x17xf32>
    %92 = arith.truncf %91 : vector<17x17xf32> to vector<17x17xbf16>
    %cst_33 = arith.constant dense<0.000000e+00> : vector<17x16xf32>
    %93 = tpu.matmul %92, %78, %cst_33 {dimension_numbers = #tpu.dot_dimension_numbers<[1], [0], [0], [1], [0, 0, 1, 1], [], []>} : vector<17x17xbf16>, vector<17x16xbf16>, vector<17x16xf32> -> vector<17x16xf32>
    %94 = vector.extract_strided_slice %39 {offsets = [0, 48], sizes = [17, 16], strides = [1, 1]} : vector<17x192xbf16> to vector<17x16xbf16>
    %95 = vector.extract_strided_slice %39 {offsets = [0, 112], sizes = [17, 16], strides = [1, 1]} : vector<17x192xbf16> to vector<17x16xbf16>
    %96 = vector.extract_strided_slice %39 {offsets = [0, 176], sizes = [17, 16], strides = [1, 1]} : vector<17x192xbf16> to vector<17x16xbf16>
    %cst_34 = arith.constant dense<0.000000e+00> : vector<17x17xf32>
    %97 = tpu.matmul %94, %95, %cst_34 {dimension_numbers = #tpu.dot_dimension_numbers<[1], [1], [0], [0], [0, 0, 1, 0], [], []>} : vector<17x16xbf16>, vector<17x16xbf16>, vector<17x17xf32> -> vector<17x17xf32>
    %cst_35 = arith.constant 2.500000e-01 : f32
    %98 = vector.broadcast %cst_35 : f32 to vector<17x17xf32>
    %99 = arith.mulf %97, %98 : vector<17x17xf32>
    %cst_36 = arith.constant dense<0xFF800000> : vector<17xf32>
    %100 = vector.multi_reduction <maximumf>, %99, %cst_36 [1] : vector<17x17xf32> to vector<17xf32>
    %101 = vector.shape_cast %100 : vector<17xf32> to vector<17x1xf32>
    %102 = vector.broadcast %101 : vector<17x1xf32> to vector<17x17xf32>
    %103 = arith.subf %99, %102 : vector<17x17xf32>
    %104 = math.exp %103 : vector<17x17xf32>
    %cst_37 = arith.constant dense<0.000000e+00> : vector<17xf32>
    %105 = vector.multi_reduction <add>, %104, %cst_37 [1] : vector<17x17xf32> to vector<17xf32>
    %106 = vector.shape_cast %105 : vector<17xf32> to vector<17x1xf32>
    %107 = tpu.reciprocal %106 {approx = true} : vector<17x1xf32> -> vector<17x1xf32>
    %108 = vector.broadcast %107 : vector<17x1xf32> to vector<17x17xf32>
    %109 = arith.mulf %104, %108 : vector<17x17xf32>
    %110 = arith.truncf %109 : vector<17x17xf32> to vector<17x17xbf16>
    %cst_38 = arith.constant dense<0.000000e+00> : vector<17x16xf32>
    %111 = tpu.matmul %110, %96, %cst_38 {dimension_numbers = #tpu.dot_dimension_numbers<[1], [0], [0], [1], [0, 0, 1, 1], [], []>} : vector<17x17xbf16>, vector<17x16xbf16>, vector<17x16xf32> -> vector<17x16xf32>
    %112 = tpu.concatenate %57, %75, %93, %111 in 1 : vector<17x16xf32>, vector<17x16xf32>, vector<17x16xf32>, vector<17x16xf32> -> vector<17x64xf32>
    %113 = vector.extract_strided_slice %38 {offsets = [17, 0], sizes = [17, 192], strides = [1, 1]} : vector<34x192xbf16> to vector<17x192xbf16>
    %114 = vector.extract_strided_slice %113 {offsets = [0, 0], sizes = [17, 16], strides = [1, 1]} : vector<17x192xbf16> to vector<17x16xbf16>
    %115 = vector.extract_strided_slice %113 {offsets = [0, 64], sizes = [17, 16], strides = [1, 1]} : vector<17x192xbf16> to vector<17x16xbf16>
    %116 = vector.extract_strided_slice %113 {offsets = [0, 128], sizes = [17, 16], strides = [1, 1]} : vector<17x192xbf16> to vector<17x16xbf16>
    %cst_39 = arith.constant dense<0.000000e+00> : vector<17x17xf32>
    %117 = tpu.matmul %114, %115, %cst_39 {dimension_numbers = #tpu.dot_dimension_numbers<[1], [1], [0], [0], [0, 0, 1, 0], [], []>} : vector<17x16xbf16>, vector<17x16xbf16>, vector<17x17xf32> -> vector<17x17xf32>
    %cst_40 = arith.constant 2.500000e-01 : f32
    %118 = vector.broadcast %cst_40 : f32 to vector<17x17xf32>
    %119 = arith.mulf %117, %118 : vector<17x17xf32>
    %cst_41 = arith.constant dense<0xFF800000> : vector<17xf32>
    %120 = vector.multi_reduction <maximumf>, %119, %cst_41 [1] : vector<17x17xf32> to vector<17xf32>
    %121 = vector.shape_cast %120 : vector<17xf32> to vector<17x1xf32>
    %122 = vector.broadcast %121 : vector<17x1xf32> to vector<17x17xf32>
    %123 = arith.subf %119, %122 : vector<17x17xf32>
    %124 = math.exp %123 : vector<17x17xf32>
    %cst_42 = arith.constant dense<0.000000e+00> : vector<17xf32>
    %125 = vector.multi_reduction <add>, %124, %cst_42 [1] : vector<17x17xf32> to vector<17xf32>
    %126 = vector.shape_cast %125 : vector<17xf32> to vector<17x1xf32>
    %127 = tpu.reciprocal %126 {approx = true} : vector<17x1xf32> -> vector<17x1xf32>
    %128 = vector.broadcast %127 : vector<17x1xf32> to vector<17x17xf32>
    %129 = arith.mulf %124, %128 : vector<17x17xf32>
    %130 = arith.truncf %129 : vector<17x17xf32> to vector<17x17xbf16>
    %cst_43 = arith.constant dense<0.000000e+00> : vector<17x16xf32>
    %131 = tpu.matmul %130, %116, %cst_43 {dimension_numbers = #tpu.dot_dimension_numbers<[1], [0], [0], [1], [0, 0, 1, 1], [], []>} : vector<17x17xbf16>, vector<17x16xbf16>, vector<17x16xf32> -> vector<17x16xf32>
    %132 = vector.extract_strided_slice %113 {offsets = [0, 16], sizes = [17, 16], strides = [1, 1]} : vector<17x192xbf16> to vector<17x16xbf16>
    %133 = vector.extract_strided_slice %113 {offsets = [0, 80], sizes = [17, 16], strides = [1, 1]} : vector<17x192xbf16> to vector<17x16xbf16>
    %134 = vector.extract_strided_slice %113 {offsets = [0, 144], sizes = [17, 16], strides = [1, 1]} : vector<17x192xbf16> to vector<17x16xbf16>
    %cst_44 = arith.constant dense<0.000000e+00> : vector<17x17xf32>
    %135 = tpu.matmul %132, %133, %cst_44 {dimension_numbers = #tpu.dot_dimension_numbers<[1], [1], [0], [0], [0, 0, 1, 0], [], []>} : vector<17x16xbf16>, vector<17x16xbf16>, vector<17x17xf32> -> vector<17x17xf32>
    %cst_45 = arith.constant 2.500000e-01 : f32
    %136 = vector.broadcast %cst_45 : f32 to vector<17x17xf32>
    %137 = arith.mulf %135, %136 : vector<17x17xf32>
    %cst_46 = arith.constant dense<0xFF800000> : vector<17xf32>
    %138 = vector.multi_reduction <maximumf>, %137, %cst_46 [1] : vector<17x17xf32> to vector<17xf32>
    %139 = vector.shape_cast %138 : vector<17xf32> to vector<17x1xf32>
    %140 = vector.broadcast %139 : vector<17x1xf32> to vector<17x17xf32>
    %141 = arith.subf %137, %140 : vector<17x17xf32>
    %142 = math.exp %141 : vector<17x17xf32>
    %cst_47 = arith.constant dense<0.000000e+00> : vector<17xf32>
    %143 = vector.multi_reduction <add>, %142, %cst_47 [1] : vector<17x17xf32> to vector<17xf32>
    %144 = vector.shape_cast %143 : vector<17xf32> to vector<17x1xf32>
    %145 = tpu.reciprocal %144 {approx = true} : vector<17x1xf32> -> vector<17x1xf32>
    %146 = vector.broadcast %145 : vector<17x1xf32> to vector<17x17xf32>
    %147 = arith.mulf %142, %146 : vector<17x17xf32>
    %148 = arith.truncf %147 : vector<17x17xf32> to vector<17x17xbf16>
    %cst_48 = arith.constant dense<0.000000e+00> : vector<17x16xf32>
    %149 = tpu.matmul %148, %134, %cst_48 {dimension_numbers = #tpu.dot_dimension_numbers<[1], [0], [0], [1], [0, 0, 1, 1], [], []>} : vector<17x17xbf16>, vector<17x16xbf16>, vector<17x16xf32> -> vector<17x16xf32>
    %150 = vector.extract_strided_slice %113 {offsets = [0, 32], sizes = [17, 16], strides = [1, 1]} : vector<17x192xbf16> to vector<17x16xbf16>
    %151 = vector.extract_strided_slice %113 {offsets = [0, 96], sizes = [17, 16], strides = [1, 1]} : vector<17x192xbf16> to vector<17x16xbf16>
    %152 = vector.extract_strided_slice %113 {offsets = [0, 160], sizes = [17, 16], strides = [1, 1]} : vector<17x192xbf16> to vector<17x16xbf16>
    %cst_49 = arith.constant dense<0.000000e+00> : vector<17x17xf32>
    %153 = tpu.matmul %150, %151, %cst_49 {dimension_numbers = #tpu.dot_dimension_numbers<[1], [1], [0], [0], [0, 0, 1, 0], [], []>} : vector<17x16xbf16>, vector<17x16xbf16>, vector<17x17xf32> -> vector<17x17xf32>
    %cst_50 = arith.constant 2.500000e-01 : f32
    %154 = vector.broadcast %cst_50 : f32 to vector<17x17xf32>
    %155 = arith.mulf %153, %154 : vector<17x17xf32>
    %cst_51 = arith.constant dense<0xFF800000> : vector<17xf32>
    %156 = vector.multi_reduction <maximumf>, %155, %cst_51 [1] : vector<17x17xf32> to vector<17xf32>
    %157 = vector.shape_cast %156 : vector<17xf32> to vector<17x1xf32>
    %158 = vector.broadcast %157 : vector<17x1xf32> to vector<17x17xf32>
    %159 = arith.subf %155, %158 : vector<17x17xf32>
    %160 = math.exp %159 : vector<17x17xf32>
    %cst_52 = arith.constant dense<0.000000e+00> : vector<17xf32>
    %161 = vector.multi_reduction <add>, %160, %cst_52 [1] : vector<17x17xf32> to vector<17xf32>
    %162 = vector.shape_cast %161 : vector<17xf32> to vector<17x1xf32>
    %163 = tpu.reciprocal %162 {approx = true} : vector<17x1xf32> -> vector<17x1xf32>
    %164 = vector.broadcast %163 : vector<17x1xf32> to vector<17x17xf32>
    %165 = arith.mulf %160, %164 : vector<17x17xf32>
    %166 = arith.truncf %165 : vector<17x17xf32> to vector<17x17xbf16>
    %cst_53 = arith.constant dense<0.000000e+00> : vector<17x16xf32>
    %167 = tpu.matmul %166, %152, %cst_53 {dimension_numbers = #tpu.dot_dimension_numbers<[1], [0], [0], [1], [0, 0, 1, 1], [], []>} : vector<17x17xbf16>, vector<17x16xbf16>, vector<17x16xf32> -> vector<17x16xf32>
    %168 = vector.extract_strided_slice %113 {offsets = [0, 48], sizes = [17, 16], strides = [1, 1]} : vector<17x192xbf16> to vector<17x16xbf16>
    %169 = vector.extract_strided_slice %113 {offsets = [0, 112], sizes = [17, 16], strides = [1, 1]} : vector<17x192xbf16> to vector<17x16xbf16>
    %170 = vector.extract_strided_slice %113 {offsets = [0, 176], sizes = [17, 16], strides = [1, 1]} : vector<17x192xbf16> to vector<17x16xbf16>
    %cst_54 = arith.constant dense<0.000000e+00> : vector<17x17xf32>
    %171 = tpu.matmul %168, %169, %cst_54 {dimension_numbers = #tpu.dot_dimension_numbers<[1], [1], [0], [0], [0, 0, 1, 0], [], []>} : vector<17x16xbf16>, vector<17x16xbf16>, vector<17x17xf32> -> vector<17x17xf32>
    %cst_55 = arith.constant 2.500000e-01 : f32
    %172 = vector.broadcast %cst_55 : f32 to vector<17x17xf32>
    %173 = arith.mulf %171, %172 : vector<17x17xf32>
    %cst_56 = arith.constant dense<0xFF800000> : vector<17xf32>
    %174 = vector.multi_reduction <maximumf>, %173, %cst_56 [1] : vector<17x17xf32> to vector<17xf32>
    %175 = vector.shape_cast %174 : vector<17xf32> to vector<17x1xf32>
    %176 = vector.broadcast %175 : vector<17x1xf32> to vector<17x17xf32>
    %177 = arith.subf %173, %176 : vector<17x17xf32>
    %178 = math.exp %177 : vector<17x17xf32>
    %cst_57 = arith.constant dense<0.000000e+00> : vector<17xf32>
    %179 = vector.multi_reduction <add>, %178, %cst_57 [1] : vector<17x17xf32> to vector<17xf32>
    %180 = vector.shape_cast %179 : vector<17xf32> to vector<17x1xf32>
    %181 = tpu.reciprocal %180 {approx = true} : vector<17x1xf32> -> vector<17x1xf32>
    %182 = vector.broadcast %181 : vector<17x1xf32> to vector<17x17xf32>
    %183 = arith.mulf %178, %182 : vector<17x17xf32>
    %184 = arith.truncf %183 : vector<17x17xf32> to vector<17x17xbf16>
    %cst_58 = arith.constant dense<0.000000e+00> : vector<17x16xf32>
    %185 = tpu.matmul %184, %170, %cst_58 {dimension_numbers = #tpu.dot_dimension_numbers<[1], [0], [0], [1], [0, 0, 1, 1], [], []>} : vector<17x17xbf16>, vector<17x16xbf16>, vector<17x16xf32> -> vector<17x16xf32>
    %186 = tpu.concatenate %131, %149, %167, %185 in 1 : vector<17x16xf32>, vector<17x16xf32>, vector<17x16xf32>, vector<17x16xf32> -> vector<17x64xf32>
    %187 = tpu.concatenate %112, %186 in 0 : vector<17x64xf32>, vector<17x64xf32> -> vector<34x64xf32>
    %c0_59 = arith.constant 0 : index
    %c0_60 = arith.constant 0 : index
    %c0_61 = arith.constant 0 : index
    %188 = vector.load %arg10[%c0_59, %c0_60, %c0_61] : memref<1x64x64xbf16, #tpu.memory_space<vmem>>, vector<1x64x64xbf16>
    %189 = vector.shape_cast %188 : vector<1x64x64xbf16> to vector<64x64xbf16>
    %190 = arith.truncf %187 : vector<34x64xf32> to vector<34x64xbf16>
    %cst_62 = arith.constant dense<0.000000e+00> : vector<34x64xf32>
    %191 = tpu.matmul %190, %189, %cst_62 {dimension_numbers = #tpu.dot_dimension_numbers<[1], [0], [0], [1], [0, 0, 1, 1], [], []>} : vector<34x64xbf16>, vector<64x64xbf16>, vector<34x64xf32> -> vector<34x64xf32>
    %c0_63 = arith.constant 0 : index
    %c0_64 = arith.constant 0 : index
    %c0_65 = arith.constant 0 : index
    %192 = vector.load %arg11[%c0_63, %c0_64, %c0_65] : memref<1x1x64xf32, #tpu.memory_space<vmem>>, vector<1x1x64xf32>
    %193 = vector.shape_cast %192 : vector<1x1x64xf32> to vector<1x64xf32>
    %194 = vector.broadcast %193 : vector<1x64xf32> to vector<34x64xf32>
    %195 = arith.addf %191, %194 : vector<34x64xf32>
    %196 = arith.addf %3, %195 : vector<34x64xf32>
    %c0_66 = arith.constant 0 : index
    %c0_67 = arith.constant 0 : index
    %c0_68 = arith.constant 0 : index
    %197 = vector.load %arg12[%c0_66, %c0_67, %c0_68] : memref<1x1x64xf32, #tpu.memory_space<vmem>>, vector<1x1x64xf32>
    %198 = vector.shape_cast %197 : vector<1x1x64xf32> to vector<1x64xf32>
    %c0_69 = arith.constant 0 : index
    %c0_70 = arith.constant 0 : index
    %c0_71 = arith.constant 0 : index
    %199 = vector.load %arg13[%c0_69, %c0_70, %c0_71] : memref<1x1x64xf32, #tpu.memory_space<vmem>>, vector<1x1x64xf32>
    %200 = vector.shape_cast %199 : vector<1x1x64xf32> to vector<1x64xf32>
    %cst_72 = arith.constant dense<0.000000e+00> : vector<34xf32>
    %201 = vector.multi_reduction <add>, %196, %cst_72 [1] : vector<34x64xf32> to vector<34xf32>
    %202 = vector.shape_cast %201 : vector<34xf32> to vector<34x1xf32>
    %cst_73 = arith.constant 6.400000e+01 : f32
    %203 = vector.broadcast %cst_73 : f32 to vector<34x1xf32>
    %204 = arith.divf %202, %203 : vector<34x1xf32>
    %205 = vector.broadcast %204 : vector<34x1xf32> to vector<34x64xf32>
    %206 = arith.subf %196, %205 : vector<34x64xf32>
    %207 = arith.mulf %206, %206 : vector<34x64xf32>
    %cst_74 = arith.constant dense<0.000000e+00> : vector<34xf32>
    %208 = vector.multi_reduction <add>, %207, %cst_74 [1] : vector<34x64xf32> to vector<34xf32>
    %209 = vector.shape_cast %208 : vector<34xf32> to vector<34x1xf32>
    %cst_75 = arith.constant 6.400000e+01 : f32
    %210 = vector.broadcast %cst_75 : f32 to vector<34x1xf32>
    %211 = arith.divf %209, %210 : vector<34x1xf32>
    %212 = vector.broadcast %204 : vector<34x1xf32> to vector<34x64xf32>
    %213 = arith.subf %196, %212 : vector<34x64xf32>
    %cst_76 = arith.constant 9.99999974E-6 : f32
    %214 = vector.broadcast %cst_76 : f32 to vector<34x1xf32>
    %215 = arith.addf %211, %214 : vector<34x1xf32>
    %216 = math.rsqrt %215 : vector<34x1xf32>
    %217 = vector.broadcast %216 : vector<34x1xf32> to vector<34x64xf32>
    %218 = arith.mulf %213, %217 : vector<34x64xf32>
    %219 = vector.broadcast %198 : vector<1x64xf32> to vector<34x64xf32>
    %220 = arith.mulf %218, %219 : vector<34x64xf32>
    %221 = vector.broadcast %200 : vector<1x64xf32> to vector<34x64xf32>
    %222 = arith.addf %220, %221 : vector<34x64xf32>
    %c0_77 = arith.constant 0 : index
    %c0_78 = arith.constant 0 : index
    %c0_79 = arith.constant 0 : index
    %223 = vector.load %arg14[%c0_77, %c0_78, %c0_79] : memref<1x64x256xbf16, #tpu.memory_space<vmem>>, vector<1x64x256xbf16>
    %224 = vector.shape_cast %223 : vector<1x64x256xbf16> to vector<64x256xbf16>
    %225 = arith.truncf %222 : vector<34x64xf32> to vector<34x64xbf16>
    %cst_80 = arith.constant dense<0.000000e+00> : vector<34x256xf32>
    %226 = tpu.matmul %225, %224, %cst_80 {dimension_numbers = #tpu.dot_dimension_numbers<[1], [0], [0], [1], [0, 0, 1, 1], [], []>} : vector<34x64xbf16>, vector<64x256xbf16>, vector<34x256xf32> -> vector<34x256xf32>
    %c0_81 = arith.constant 0 : index
    %c0_82 = arith.constant 0 : index
    %c0_83 = arith.constant 0 : index
    %227 = vector.load %arg15[%c0_81, %c0_82, %c0_83] : memref<1x1x256xf32, #tpu.memory_space<vmem>>, vector<1x1x256xf32>
    %228 = vector.shape_cast %227 : vector<1x1x256xf32> to vector<1x256xf32>
    %229 = vector.broadcast %228 : vector<1x256xf32> to vector<34x256xf32>
    %230 = arith.addf %226, %229 : vector<34x256xf32>
    %cst_84 = arith.constant 1.702000e+00 : f32
    %231 = vector.broadcast %cst_84 : f32 to vector<34x256xf32>
    %232 = arith.mulf %231, %230 : vector<34x256xf32>
    %233 = arith.negf %232 : vector<34x256xf32>
    %234 = math.exp %233 : vector<34x256xf32>
    %cst_85 = arith.constant 1.000000e+00 : f32
    %235 = vector.broadcast %cst_85 : f32 to vector<34x256xf32>
    %236 = arith.addf %235, %234 : vector<34x256xf32>
    %237 = arith.divf %235, %236 : vector<34x256xf32>
    %238 = arith.mulf %230, %237 : vector<34x256xf32>
    %c0_86 = arith.constant 0 : index
    %c0_87 = arith.constant 0 : index
    %c0_88 = arith.constant 0 : index
    %239 = vector.load %arg16[%c0_86, %c0_87, %c0_88] : memref<1x256x64xbf16, #tpu.memory_space<vmem>>, vector<1x256x64xbf16>
    %240 = vector.shape_cast %239 : vector<1x256x64xbf16> to vector<256x64xbf16>
    %241 = arith.truncf %238 : vector<34x256xf32> to vector<34x256xbf16>
    %cst_89 = arith.constant dense<0.000000e+00> : vector<34x64xf32>
    %242 = tpu.matmul %241, %240, %cst_89 {dimension_numbers = #tpu.dot_dimension_numbers<[1], [0], [0], [1], [0, 0, 1, 1], [], []>} : vector<34x256xbf16>, vector<256x64xbf16>, vector<34x64xf32> -> vector<34x64xf32>
    %c0_90 = arith.constant 0 : index
    %c0_91 = arith.constant 0 : index
    %c0_92 = arith.constant 0 : index
    %243 = vector.load %arg17[%c0_90, %c0_91, %c0_92] : memref<1x1x64xf32, #tpu.memory_space<vmem>>, vector<1x1x64xf32>
    %244 = vector.shape_cast %243 : vector<1x1x64xf32> to vector<1x64xf32>
    %245 = vector.broadcast %244 : vector<1x64xf32> to vector<34x64xf32>
    %246 = arith.addf %242, %245 : vector<34x64xf32>
    %247 = arith.addf %196, %246 : vector<34x64xf32>
    %c0_93 = arith.constant 0 : index
    %c0_94 = arith.constant 0 : index
    %248 = vector.load %arg24[%c0_93, %c0_94] : memref<34x64xf32, #tpu.memory_space<vmem>>, vector<34x64xf32>
    tpu.vector_store %arg24[%c0_93, %c0_94], %247 {strides = array<i32>} : memref<34x64xf32, #tpu.memory_space<vmem>>, vector<34x64xf32>,
    %c1_i32 = arith.constant 1 : i32
    %249 = arith.cmpi eq, %arg0, %c1_i32 : i32
    %250 = arith.extui %249 : i1 to i32
    %c0_i32_95 = arith.constant 0 : i32
    %251 = arith.cmpi ne, %250, %c0_i32_95 : i32
    scf.if %251 {
      %c0_96 = arith.constant 0 : index
      %c0_97 = arith.constant 0 : index
      %252 = vector.load %arg24[%c0_96, %c0_97] : memref<34x64xf32, #tpu.memory_space<vmem>>, vector<34x64xf32>
      %253 = vector.extract_strided_slice %252 {offsets = [0, 0], sizes = [1, 64], strides = [1, 1]} : vector<34x64xf32> to vector<1x64xf32>
      %254 = vector.extract_strided_slice %252 {offsets = [17, 0], sizes = [1, 64], strides = [1, 1]} : vector<34x64xf32> to vector<1x64xf32>
      %255 = tpu.concatenate %253, %254 in 0 : vector<1x64xf32>, vector<1x64xf32> -> vector<2x64xf32>
      %c0_98 = arith.constant 0 : index
      %c0_99 = arith.constant 0 : index
      %256 = vector.load %arg18[%c0_98, %c0_99] : memref<1x64xf32, #tpu.memory_space<vmem>>, vector<1x64xf32>
      %c0_100 = arith.constant 0 : index
      %c0_101 = arith.constant 0 : index
      %257 = vector.load %arg19[%c0_100, %c0_101] : memref<1x64xf32, #tpu.memory_space<vmem>>, vector<1x64xf32>
      %cst_102 = arith.constant dense<0.000000e+00> : vector<2xf32>
      %258 = vector.multi_reduction <add>, %255, %cst_102 [1] : vector<2x64xf32> to vector<2xf32>
      %259 = vector.shape_cast %258 : vector<2xf32> to vector<2x1xf32>
      %cst_103 = arith.constant 6.400000e+01 : f32
      %260 = vector.broadcast %cst_103 : f32 to vector<2x1xf32>
      %261 = arith.divf %259, %260 : vector<2x1xf32>
      %262 = vector.broadcast %261 : vector<2x1xf32> to vector<2x64xf32>
      %263 = arith.subf %255, %262 : vector<2x64xf32>
      %264 = arith.mulf %263, %263 : vector<2x64xf32>
      %cst_104 = arith.constant dense<0.000000e+00> : vector<2xf32>
      %265 = vector.multi_reduction <add>, %264, %cst_104 [1] : vector<2x64xf32> to vector<2xf32>
      %266 = vector.shape_cast %265 : vector<2xf32> to vector<2x1xf32>
      %cst_105 = arith.constant 6.400000e+01 : f32
      %267 = vector.broadcast %cst_105 : f32 to vector<2x1xf32>
      %268 = arith.divf %266, %267 : vector<2x1xf32>
      %269 = vector.broadcast %261 : vector<2x1xf32> to vector<2x64xf32>
      %270 = arith.subf %255, %269 : vector<2x64xf32>
      %cst_106 = arith.constant 9.99999974E-6 : f32
      %271 = vector.broadcast %cst_106 : f32 to vector<2x1xf32>
      %272 = arith.addf %268, %271 : vector<2x1xf32>
      %273 = math.rsqrt %272 : vector<2x1xf32>
      %274 = vector.broadcast %273 : vector<2x1xf32> to vector<2x64xf32>
      %275 = arith.mulf %270, %274 : vector<2x64xf32>
      %276 = vector.broadcast %256 : vector<1x64xf32> to vector<2x64xf32>
      %277 = arith.mulf %275, %276 : vector<2x64xf32>
      %278 = vector.broadcast %257 : vector<1x64xf32> to vector<2x64xf32>
      %279 = arith.addf %277, %278 : vector<2x64xf32>
      %c0_107 = arith.constant 0 : index
      %c0_108 = arith.constant 0 : index
      %280 = vector.load %arg20[%c0_107, %c0_108] : memref<64x512xbf16, #tpu.memory_space<vmem>>, vector<64x512xbf16>
      %281 = arith.truncf %279 : vector<2x64xf32> to vector<2x64xbf16>
      %cst_109 = arith.constant dense<0.000000e+00> : vector<2x512xf32>
      %282 = tpu.matmul %281, %280, %cst_109 {dimension_numbers = #tpu.dot_dimension_numbers<[1], [0], [0], [1], [0, 0, 1, 1], [], []>} : vector<2x64xbf16>, vector<64x512xbf16>, vector<2x512xf32> -> vector<2x512xf32>
      %283 = arith.mulf %282, %282 : vector<2x512xf32>
      %cst_110 = arith.constant dense<0.000000e+00> : vector<2xf32>
      %284 = vector.multi_reduction <add>, %283, %cst_110 [1] : vector<2x512xf32> to vector<2xf32>
      %285 = vector.shape_cast %284 : vector<2xf32> to vector<2x1xf32>
      %286 = math.rsqrt %285 : vector<2x1xf32>
      %287 = vector.broadcast %286 : vector<2x1xf32> to vector<2x512xf32>
      %288 = arith.mulf %282, %287 : vector<2x512xf32>
      %c0_111 = arith.constant 0 : index
      %c0_112 = arith.constant 0 : index
      %289 = vector.load %arg21[%c0_111, %c0_112] : memref<512x128xbf16, #tpu.memory_space<vmem>>, vector<512x128xbf16>
      %290 = arith.truncf %288 : vector<2x512xf32> to vector<2x512xbf16>
      %cst_113 = arith.constant dense<0.000000e+00> : vector<2x128xf32>
      %291 = tpu.matmul %290, %289, %cst_113 {dimension_numbers = #tpu.dot_dimension_numbers<[1], [0], [0], [1], [0, 0, 1, 1], [], []>} : vector<2x512xbf16>, vector<512x128xbf16>, vector<2x128xf32> -> vector<2x128xf32>
      %c0_114 = arith.constant 0 : index
      %c0_115 = arith.constant 0 : index
      %292 = vector.load %arg22[%c0_114, %c0_115] : memref<1x128xf32, #tpu.memory_space<vmem>>, vector<1x128xf32>
      %293 = vector.broadcast %292 : vector<1x128xf32> to vector<2x128xf32>
      %294 = arith.addf %291, %293 : vector<2x128xf32>
      %c0_116 = arith.constant 0 : index
      %c0_117 = arith.constant 0 : index
      %295 = vector.load %arg23[%c0_116, %c0_117] : memref<2x128xf32, #tpu.memory_space<vmem>>, vector<2x128xf32>
      tpu.vector_store %arg23[%c0_116, %c0_117], %294 {strides = array<i32>} : memref<2x128xf32, #tpu.memory_space<vmem>>, vector<2x128xf32>,
    } else {
    }
    return
  }
  func.func @transform_0(%arg0: i32) -> (i32, i32) {
    %c0_i32 = arith.constant 0 : i32
    %c0_i32_0 = arith.constant 0 : i32
    %c0_i32_1 = arith.constant 0 : i32
    return %c0_i32, %c0_i32_0 : i32, i32
  }
  func.func @transform_1(%arg0: i32) -> (i32, i32) {
    %c0_i32 = arith.constant 0 : i32
    %c0_i32_0 = arith.constant 0 : i32
    %c0_i32_1 = arith.constant 0 : i32
    return %c0_i32, %c0_i32_0 : i32, i32
  }
  func.func @transform_2(%arg0: i32) -> (i32, i32) {
    %c0_i32 = arith.constant 0 : i32
    %c0_i32_0 = arith.constant 0 : i32
    %c0_i32_1 = arith.constant 0 : i32
    return %c0_i32, %c0_i32_0 : i32, i32
  }
  func.func @transform_3(%arg0: i32) -> (i32, i32) {
    %c0_i32 = arith.constant 0 : i32
    %c0_i32_0 = arith.constant 0 : i32
    %c0_i32_1 = arith.constant 0 : i32
    return %c0_i32, %c0_i32_0 : i32, i32
  }
  func.func @transform_4(%arg0: i32) -> (i32, i32) {
    %c0_i32 = arith.constant 0 : i32
    %c0_i32_0 = arith.constant 0 : i32
    %c0_i32_1 = arith.constant 0 : i32
    return %c0_i32, %c0_i32_0 : i32, i32
  }
  func.func @transform_5(%arg0: i32) -> (i32, i32, i32) {
    %c0_i32 = arith.constant 0 : i32
    %c0_i32_0 = arith.constant 0 : i32
    %c0_i32_1 = arith.constant 0 : i32
    return %arg0, %c0_i32, %c0_i32_0 : i32, i32, i32
  }
  func.func @transform_6(%arg0: i32) -> (i32, i32, i32) {
    %c0_i32 = arith.constant 0 : i32
    %c0_i32_0 = arith.constant 0 : i32
    %c0_i32_1 = arith.constant 0 : i32
    return %arg0, %c0_i32, %c0_i32_0 : i32, i32, i32
  }
  func.func @transform_7(%arg0: i32) -> (i32, i32, i32) {
    %c0_i32 = arith.constant 0 : i32
    %c0_i32_0 = arith.constant 0 : i32
    %c0_i32_1 = arith.constant 0 : i32
    return %arg0, %c0_i32, %c0_i32_0 : i32, i32, i32
  }
  func.func @transform_8(%arg0: i32) -> (i32, i32, i32) {
    %c0_i32 = arith.constant 0 : i32
    %c0_i32_0 = arith.constant 0 : i32
    %c0_i32_1 = arith.constant 0 : i32
    return %arg0, %c0_i32, %c0_i32_0 : i32, i32, i32
  }
  func.func @transform_9(%arg0: i32) -> (i32, i32, i32) {
    %c0_i32 = arith.constant 0 : i32
    %c0_i32_0 = arith.constant 0 : i32
    %c0_i32_1 = arith.constant 0 : i32
    return %arg0, %c0_i32, %c0_i32_0 : i32, i32, i32
  }
  func.func @transform_10(%arg0: i32) -> (i32, i32, i32) {
    %c0_i32 = arith.constant 0 : i32
    %c0_i32_0 = arith.constant 0 : i32
    %c0_i32_1 = arith.constant 0 : i32
    return %arg0, %c0_i32, %c0_i32_0 : i32, i32, i32
  }
  func.func @transform_11(%arg0: i32) -> (i32, i32, i32) {
    %c0_i32 = arith.constant 0 : i32
    %c0_i32_0 = arith.constant 0 : i32
    %c0_i32_1 = arith.constant 0 : i32
    return %arg0, %c0_i32, %c0_i32_0 : i32, i32, i32
  }
  func.func @transform_12(%arg0: i32) -> (i32, i32, i32) {
    %c0_i32 = arith.constant 0 : i32
    %c0_i32_0 = arith.constant 0 : i32
    %c0_i32_1 = arith.constant 0 : i32
    return %arg0, %c0_i32, %c0_i32_0 : i32, i32, i32
  }
  func.func @transform_13(%arg0: i32) -> (i32, i32, i32) {
    %c0_i32 = arith.constant 0 : i32
    %c0_i32_0 = arith.constant 0 : i32
    %c0_i32_1 = arith.constant 0 : i32
    return %arg0, %c0_i32, %c0_i32_0 : i32, i32, i32
  }
  func.func @transform_14(%arg0: i32) -> (i32, i32, i32) {
    %c0_i32 = arith.constant 0 : i32
    %c0_i32_0 = arith.constant 0 : i32
    %c0_i32_1 = arith.constant 0 : i32
    return %arg0, %c0_i32, %c0_i32_0 : i32, i32, i32
  }
  func.func @transform_15(%arg0: i32) -> (i32, i32, i32) {
    %c0_i32 = arith.constant 0 : i32
    %c0_i32_0 = arith.constant 0 : i32
    %c0_i32_1 = arith.constant 0 : i32
    return %arg0, %c0_i32, %c0_i32_0 : i32, i32, i32
  }
  func.func @transform_16(%arg0: i32) -> (i32, i32, i32) {
    %c0_i32 = arith.constant 0 : i32
    %c0_i32_0 = arith.constant 0 : i32
    %c0_i32_1 = arith.constant 0 : i32
    return %arg0, %c0_i32, %c0_i32_0 : i32, i32, i32
  }
  func.func @transform_17(%arg0: i32) -> (i32, i32) {
    %c0_i32 = arith.constant 0 : i32
    %c0_i32_0 = arith.constant 0 : i32
    %c0_i32_1 = arith.constant 0 : i32
    return %c0_i32, %c0_i32_0 : i32, i32
  }
  func.func @transform_18(%arg0: i32) -> (i32, i32) {
    %c0_i32 = arith.constant 0 : i32
    %c0_i32_0 = arith.constant 0 : i32
    %c0_i32_1 = arith.constant 0 : i32
    return %c0_i32, %c0_i32_0 : i32, i32
  }
  func.func @transform_19(%arg0: i32) -> (i32, i32) {
    %c0_i32 = arith.constant 0 : i32
    %c0_i32_0 = arith.constant 0 : i32
    %c0_i32_1 = arith.constant 0 : i32
    return %c0_i32, %c0_i32_0 : i32, i32
  }
  func.func @transform_20(%arg0: i32) -> (i32, i32) {
    %c0_i32 = arith.constant 0 : i32
    %c0_i32_0 = arith.constant 0 : i32
    %c0_i32_1 = arith.constant 0 : i32
    return %c0_i32, %c0_i32_0 : i32, i32
  }
  func.func @transform_21(%arg0: i32) -> (i32, i32) {
    %c0_i32 = arith.constant 0 : i32
    %c0_i32_0 = arith.constant 0 : i32
    %c0_i32_1 = arith.constant 0 : i32
    return %c0_i32, %c0_i32_0 : i32, i32
  }
  func.func @transform_22(%arg0: i32) -> (i32, i32) {
    %c0_i32 = arith.constant 0 : i32
    %c0_i32_0 = arith.constant 0 : i32
    %c0_i32_1 = arith.constant 0 : i32
    return %c0_i32, %c0_i32_0 : i32, i32
  }
}

</mosaic_0001>

<bundles_post_ra>
// kernel: last_layers_clip_forward.1
= control target key start
LH: loop header
LB: loop body
LE: loop exit
PB: predicated region body
PF: predicated region fallthrough
CT: control target
= control target key end

     0   :  { %s6204_s0 = inlined_call_operand.vmem [shape: f32[34,192], index: 0, kind: input, shape index: {}]   ;;  %s6205_s1 = inlined_call_operand.vmem [shape: bf16[192,64], index: 1, kind: input, shape index: {}]   ;;  %s6206_s2 = inlined_call_operand.vmem [shape: f32[34,64], index: 2, kind: input, shape index: {}]   ;;  %s6207_s3 = inlined_call_operand.vmem [shape: f32[1,64], index: 3, kind: input, shape index: {}]   ;;  %s6208_s4 = inlined_call_operand.vmem [shape: f32[1,64], index: 4, kind: input, shape index: {}]   ;;  %s6209_s5 = inlined_call_operand.vmem [shape: f32[2,1,64], index: 5, kind: input, shape index: {}]   ;;  %s6210_s6 = inlined_call_operand.vmem [shape: f32[2,1,64], index: 6, kind: input, shape index: {}]   ;;  %s6211_s7 = inlined_call_operand.vmem [shape: bf16[2,64,192], index: 7, kind: input, shape index: {}]   ;;  %s6212_s8 = inlined_call_operand.vmem [shape: f32[2,1,192], index: 8, kind: input, shape index: {}]   ;;  %s6213_s9 = inlined_call_operand.vmem [shape: bf16[2,64,64], index: 9, kind: input, shape index: {}]   ;;  %s6214_s10 = inlined_call_operand.vmem [shape: f32[2,1,64], index: 10, kind: input, shape index: {}]   ;;  %s6215_s11 = inlined_call_operand.vmem [shape: f32[2,1,64], index: 11, kind: input, shape index: {}]   ;;  %s6216_s12 = inlined_call_operand.vmem [shape: f32[2,1,64], index: 12, kind: input, shape index: {}]   ;;  %s6217_s13 = inlined_call_operand.vmem [shape: bf16[2,64,256], index: 13, kind: input, shape index: {}]   ;;  %s6218_s14 = inlined_call_operand.vmem [shape: f32[2,1,256], index: 14, kind: input, shape index: {}]   ;;  %s6219_s15 = inlined_call_operand.vmem [shape: bf16[2,256,64], index: 15, kind: input, shape index: {}]   ;;  %s6220_s16 = inlined_call_operand.vmem [shape: f32[2,1,64], index: 16, kind: input, shape index: {}]   ;;  %s6221_s17 = inlined_call_operand.vmem [shape: f32[1,64], index: 17, kind: input, shape index: {}]   ;;  %s6222_s18 = inlined_call_operand.vmem [shape: f32[1,64], index: 18, kind: input, shape index: {}]   ;;  %s6223_s19 = inlined_call_operand.vmem [shape: bf16[64,512], index: 19, kind: input, shape index: {}]   ;;  %s6224_s20 = inlined_call_operand.vmem [shape: bf16[512,128], index: 20, kind: input, shape index: {}]   ;;  %s6225_s21 = inlined_call_operand.vmem [shape: f32[1,128], index: 21, kind: input, shape index: {}]   ;;  %s6226_s22 = inlined_call_operand.hbm [shape: f32[2,128], index: 22, kind: output, shape index: {}]  }
   0x1   :  { %6233 = sst [smem:[#allocation7_spill]] %s6204_s0 }
   0x2   :  { %6234 = sst [smem:[#allocation8_spill]] %s6205_s1 }
   0x3   :  { %6235 = sst [smem:[#allocation9_spill]] %s6206_s2 }
   0x4   :  { %6236 = sst [smem:[#allocation10_spill]] %s6207_s3 }
   0x5   :  { %6237 = sst [smem:[#allocation11_spill]] %s6208_s4 }
   0x6   :  { %6238 = sst [smem:[#allocation12_spill]] %s6209_s5 }
   0x7   :  { %6239 = sst [smem:[#allocation13_spill]] %s6210_s6 }
   0x8   :  { %6240 = sst [smem:[#allocation14_spill]] %s6211_s7 }
   0x9   :  { %6241 = sst [smem:[#allocation15_spill]] %s6212_s8 }
   0xa   :  { %6242 = sst [smem:[#allocation16_spill]] %s6221_s17 }
   0xb   :  { %6243 = sst [smem:[#allocation17_spill]] %s6222_s18 }
   0xc   :  { %6244 = sst [smem:[#allocation18_spill]] %s6224_s20 }
   0xd   :  { %6245 = sst [smem:[#allocation19_spill]] %s6225_s21 }
   0xe   :  { %6246 = sst [smem:[#allocation20_spill]] %s6226_s22 }
   0xf   :  { %27 = vsyncpa [#allocation4], 0  ;;  %s5236_s3 = smov 0  }
  0x10 LB: > { %6247 = sst [smem:[#allocation6_spill]] %s5106_s3  ;;  %s5242_s28 = sadd.s32 4294967295, %s5106_s3   ;;  %s5106_s3 = sphi %s5236_s3, %s33_s3  }
  0x11   : > { %p4205_p0 = scmp.ge.s32.totalorder %s5106_s3, 1  ;;  %p704_p1 = scmp.lt.s32.totalorder %s5106_s3, 3 }
  0x13   : > { %p705_p2 = pnand %p4205_p0, %p704_p1 }
  0x14   : > { %p802_p3 = scmp.lt.s32.totalorder (!%p705_p2), %s5242_s28, 1  ;;  %s6250_s7 = sld [smem:[#allocation14_spill]] (!%p705_p2) }
  0x15   : > { %708 = sbr.rel (%p705_p2) target bundleno = 7457 (0x1d21), region = 108  ;;  %s6251_s8 = sld [smem:[#allocation15_spill]] (!%p705_p2) }
  0x16   : > { %p4216_p4 = scmp.ne.s32.totalorder (!%p705_p2), %s5242_s28, 0 }
  0x1c   : > { %s5248_s29 = scalar_select %p802_p3, %s5242_s28, 1 }
  0x1d   : > { %852 = sbr.rel (%p4216_p4) target bundleno = 620 (0x26c), region = 112  ;;  %s6252_s27 = sld [smem:[#allocation8_spill]] (!%p4216_p4)  ;;  %v5108_v1 = vmov (!%p4216_p4), 0   ;;  %vm970_vm0 = vcmask (!%p4216_p4), 523264   ;;  %vm1050_vm1 = vcmask (!%p4216_p4), 517120  }
  0x1e   : > { %s4385_s25 = sshll.u32 %s5248_s29, 6  ;;  %s4208_s26 = sshll.u32 %s5248_s29, 1  ;;  %980 = vmatprep.subr.bf16.mxu0 (!%p4216_p4), %v5108_v1  ;;  %4686 = vmatprep.subr.bf16.mxu1 (!%p4216_p4), %v5108_v1 }
  0x1f   : > { %s5263_s30 = scalar_lea.vmem %s6250_s7, %s4385_s25  ;;  %s5268_s22 = scalar_lea.vmem %s6251_s8, %s4208_s26 }
  0x20   : > { %s4386_s21 = sshll.u32 %s5248_s29, 5  ;;  %s830_s3 = scalar_lea.vmem %s6216_s12, %s5248_s29 }
  0x21   : > { %s5278_s5 = scalar_lea.vmem %s6213_s9, %s4386_s21  ;;  %s5291_s17 = scalar_lea.vmem %s6217_s13, %s4385_s25 }
  0x22   : > { %s5296_s0 = scalar_lea.vmem %s6218_s14, %s4208_s26  ;;  %s4388_s21 = sshll.u32 %s5248_s29, 7 }
  0x23   : > { %s5302_s6 = scalar_lea.vmem %s6219_s15, %s4388_s21  ;;  %v4753_v0 = vld [vmem:[%s6252_s27] sm:$0xff] (!%p4216_p4)   ;;  %v4754_v2 = vld [vmem:[%s6252_s27 + $0x8] sm:$0xff] (!%p4216_p4)   ;;  %v4755_v3 = vld [vmem:[%s6252_s27 + $0x10] sm:$0xff] (!%p4216_p4)   ;;  %s6253_s24 = sld [smem:[#allocation7_spill]] (!%p4216_p4) }
  0x24   : > { %981 = vmatpush1.bf16.msra.mxu0 %v4753_v0  ;;  %4698 = vmatpush1.bf16.msra.mxu1 %v4753_v0  ;;  %v4756_v4 = vld [vmem:[%s6252_s27 + $0x18] sm:$0xff]   ;;  %v4757_v10 = vld [vmem:[%s6252_s27 + $0x20] sm:$0xff]   ;;  %v4758_v12 = vld [vmem:[%s6252_s27 + $0x28] sm:$0xff]   ;;  %s6254_s20 = sld [smem:[#allocation9_spill]]  ;;  %s6255_s18 = sld [smem:[#allocation10_spill]] }
  0x25   : > { %982 = vmatprep.subr.bf16.mxu0 %v5108_v1  ;;  %4687 = vmatprep.subr.bf16.mxu1 %v5108_v1  ;;  %v4759_v13 = vld [vmem:[%s6252_s27 + $0x30] sm:$0xff]   ;;  %v4760_v14 = vld [vmem:[%s6252_s27 + $0x38] sm:$0xff]   ;;  %v4761_v15 = vld [vmem:[%s6252_s27 + $0x40] sm:$0xff]   ;;  %s6256_s1 = sld [smem:[#allocation11_spill]] }
  0x26   : > { %v4762_v16 = vld [vmem:[%s6252_s27 + $0x48] sm:$0xff]   ;;  %v4763_v17 = vld [vmem:[%s6252_s27 + $0x50] sm:$0xff]   ;;  %v4764_v18 = vld [vmem:[%s6252_s27 + $0x58] sm:$0xff]  }
  0x28   : > { %983 = vmatpush1.bf16.msra.mxu0 %v4754_v2  ;;  %4699 = vmatpush1.bf16.msra.mxu1 %v4754_v2 }
  0x29   : > { %984 = vmatprep.subr.bf16.mxu0 %v5108_v1  ;;  %4688 = vmatprep.subr.bf16.mxu1 %v5108_v1  ;;  %v854_v5 = vld [vmem:[%s6253_s24 + $0x8] sm:$0xff]  ;;  %v856_v6 = vld [vmem:[%s6253_s24 + $0x18] sm:$0xff]  ;;  %v853_v19 = vld [vmem:[%s6253_s24] sm:$0xff] }
  0x2a   : > { %v858_v7 = vld [vmem:[%s6253_s24 + $0x28] sm:$0xff]  ;;  %v888_v8 = vpack.c.bf16 %v856_v6, %v854_v5  ;;  %v860_v9 = vld [vmem:[%s6253_s24 + $0x38] sm:$0xff]  ;;  %v855_v20 = vld [vmem:[%s6253_s24 + $0x10] sm:$0xff] }
  0x2b   : > { %v890_v11 = vpack.c.bf16 %v860_v9, %v858_v7  ;;  %v857_v21 = vld [vmem:[%s6253_s24 + $0x20] sm:$0xff]  ;;  %v859_v22 = vld [vmem:[%s6253_s24 + $0x30] sm:$0xff]  ;;  %v862_v23 = vld [vmem:[%s6253_s24 + $0x48] sm:$0x3]  ;;  %v887_v24 = vpack.c.bf16 %v855_v20, %v853_v19 }
  0x2c   : > { %985 = vmatpush1.bf16.msra.mxu0 %v4755_v3  ;;  %4700 = vmatpush1.bf16.msra.mxu1 %v4755_v3  ;;  %v889_v25 = vpack.c.bf16 %v859_v22, %v857_v21  ;;  %v892_v26 = vpack.c.bf16 %v862_v23, %v862_v23  ;;  %v861_v27 = vld [vmem:[%s6253_s24 + $0x40] sm:$0x3]  ;;  %v895_v30 = vld [vmem:[%s6254_s20 + $0x10] sm:$0xff]  ;;  %v894_v33 = vld [vmem:[%s6254_s20 + $0x8] sm:$0xff] }
  0x2d   : > { %986 = vmatprep.subr.bf16.mxu0 %v5108_v1  ;;  %4689 = vmatprep.subr.bf16.mxu1 %v5108_v1  ;;  %v891_v28 = vpack.c.bf16 %v861_v27, %v861_v27  ;;  %v893_v29 = vld [vmem:[%s6254_s20] sm:$0xff]  ;;  %v896_v34 = vld [vmem:[%s6254_s20 + $0x18] sm:$0xff] }
  0x2e   : > { %4229 = vmatprep.mubr.msk.bf16.mxu0 %vm970_vm0, %v888_v8  ;;  %4230 = vmatprep.mubr.msk.bf16.mxu1 %vm970_vm0, %v890_v11  ;;  %v897_v47 = vld [vmem:[%s6254_s20 + $0x20] sm:$0x3] }
  0x30   : > { %987 = vmatpush1.bf16.msra.mxu0 %v4756_v4  ;;  %4701 = vmatpush1.bf16.msra.mxu1 %v4756_v4 }
  0x31   : > { %988 = vmatprep.subr.bf16.mxu0 %v5108_v1  ;;  %4690 = vmatprep.subr.bf16.mxu1 %v5108_v1 }
  0x34   : > { %989 = vmatpush1.bf16.msra.mxu0 %v4757_v10  ;;  %4702 = vmatpush1.bf16.msra.mxu1 %v4757_v10 }
  0x35   : > { %990 = vmatprep.subr.bf16.mxu0 %v5108_v1  ;;  %4691 = vmatprep.subr.bf16.mxu1 %v5108_v1 }
  0x38   : > { %991 = vmatpush1.bf16.msra.mxu0 %v4758_v12  ;;  %4703 = vmatpush1.bf16.msra.mxu1 %v4758_v12 }
  0x39   : > { %992 = vmatprep.subr.bf16.mxu0 %v5108_v1  ;;  %4692 = vmatprep.subr.bf16.mxu1 %v5108_v1 }
  0x3c   : > { %993 = vmatpush1.bf16.msra.mxu0 %v4759_v13  ;;  %4704 = vmatpush1.bf16.msra.mxu1 %v4759_v13 }
  0x3d   : > { %994 = vmatprep.subr.bf16.mxu0 %v5108_v1  ;;  %4693 = vmatprep.subr.bf16.mxu1 %v5108_v1 }
  0x40   : > { %995 = vmatpush1.bf16.msra.mxu0 %v4760_v14  ;;  %4705 = vmatpush1.bf16.msra.mxu1 %v4760_v14 }
  0x41   : > { %996 = vmatprep.subr.bf16.mxu0 %v5108_v1  ;;  %4694 = vmatprep.subr.bf16.mxu1 %v5108_v1 }
  0x44   : > { %997 = vmatpush1.bf16.msra.mxu0 %v4761_v15  ;;  %4706 = vmatpush1.bf16.msra.mxu1 %v4761_v15 }
  0x45   : > { %998 = vmatprep.subr.bf16.mxu0 %v5108_v1  ;;  %4695 = vmatprep.subr.bf16.mxu1 %v5108_v1 }
  0x48   : > { %999 = vmatpush1.bf16.msra.mxu0 %v4762_v16  ;;  %4707 = vmatpush1.bf16.msra.mxu1 %v4762_v16 }
  0x49   : > { %1000 = vmatprep.subr.bf16.mxu0 %v5108_v1  ;;  %4696 = vmatprep.subr.bf16.mxu1 %v5108_v1 }
  0x4c   : > { %1001 = vmatpush1.bf16.msra.mxu0 %v4763_v17  ;;  %4708 = vmatpush1.bf16.msra.mxu1 %v4763_v17 }
  0x4d   : > { %1002 = vmatprep.subr.bf16.mxu0 %v5108_v1  ;;  %4697 = vmatprep.subr.bf16.mxu1 %v5108_v1 }
  0x50   : > { %1003 = vmatpush1.bf16.msra.mxu0 %v4764_v18  ;;  %4709 = vmatpush1.bf16.msra.mxu1 %v4764_v18 }
  0x53   : > { %1013 = vmatmul.mubr.bf16.vlgmr.msra.gmra.mrb[0].mxu0 %v887_v24  ;;  %1021 = vmatmul.mubr.bf16.vlgmr.msra.gmra.mrb[0].mxu1 %v889_v25 }
  0x54   : > { %4231 = vmatprep.mubr.msk.bf16.mxu1 %vm970_vm0, %v892_v26 }
  0x5b   : > { %1029 = vmatmul.mubr.bf16.gmra.mrb[4].mxu1 %v891_v28 }
 0x126   : > { %v1014_v31 = vpop.f32.mrb[0].mxu0  ;;  %v1022_v32 = vpop.f32.mrb[0].mxu1 }
 0x127   : > { %v1015_v35 = vadd.f32 %v1014_v31, %v893_v29  ;;  %v1023_v36 = vadd.f32 %v1022_v32, %v895_v30  ;;  %v1016_v37 = vpop.f32.mrb[1].mxu0  ;;  %v1024_v38 = vpop.f32.mrb[1].mxu1 }
 0x128   : > { %v1017_v39 = vpop.f32.mrb[2].mxu0  ;;  %v1025_v40 = vpop.f32.mrb[2].mxu1 }
 0x129   : > { %v1018_v41 = vadd.f32 %v1017_v39, %v894_v33  ;;  %v1026_v42 = vadd.f32 %v1025_v40, %v896_v34  ;;  %v1019_v43 = vpop.f32.mrb[3].mxu0  ;;  %v1027_v44 = vpop.f32.mrb[3].mxu1  ;;  %v1044_v45 = vsel %vm970_vm0, %v1023_v36, 0.0  ;;  %v1038_v46 = vsel %vm970_vm0, %v1015_v35, 0.0  ;;  %v4232_v33 = vld [vmem:[%s6255_s18] ss:$0 sm:$0xff] }
 0x12a   : > { %1045 = vadd.xlane.f32.xlu1 %v1044_v45  ;;  %1039 = vadd.xlane.f32.xlu0 %v1038_v46 }
 0x12b   : > { %v1047_v48 = vsel %vm970_vm0, %v1026_v42, 0.0  ;;  %v1041_v49 = vsel %vm970_vm0, %v1018_v41, 0.0 }
 0x12e   : > { %v1030_v50 = vpop.f32.mrb[4].mxu1  ;;  %1048 = vadd.xlane.f32.xlu1 %v1047_v48  ;;  %1042 = vadd.xlane.f32.xlu0 %v1041_v49 }
 0x12f   : > { %v1031_v51 = vadd.f32 %v1030_v50, %v897_v47  ;;  %v1032_v52 = vpop.f32.mrb[5].mxu1 }
 0x130   : > { %v1033_v53 = vpop.f32.mrb[6].mxu1 }
 0x131   : > { %v1034_v54 = vpop.f32.mrb[7].mxu1  ;;  %v1051_v55 = vsel %vm1050_vm1, %v1031_v51, 0.0 }
 0x132   : > { %1052 = vadd.xlane.f32.xlu0 %v1051_v55 }
 0x1b7   : > { %v1046_v56 = vpop.xlane.xlu1 %1045  ;;  %v1040_v57 = vpop.xlane.xlu0 %1039 }
 0x1b8   : > { %v1057_v58 = vmul.f32 0.015625, %v1046_v56  ;;  %v1055_v59 = vmul.f32 0.015625, %v1040_v57 }
 0x1ba   : > { %v1062_v60 = vsub.f32 %v1023_v36, %v1057_v58  ;;  %v1060_v61 = vsub.f32 %v1015_v35, %v1055_v59  ;;  %v4233_v35 = vld [vmem:[%s6256_s1] ss:$0 sm:$0xff] }
 0x1bb   : > { %v1049_v62 = vpop.xlane.xlu1 %1048  ;;  %v1043_v63 = vpop.xlane.xlu0 %1042 }
 0x1bc   : > { %v1058_v0 = vmul.f32 0.015625, %v1049_v62  ;;  %v1056_v1 = vmul.f32 0.015625, %v1043_v63  ;;  %v1065_v2 = vmul.f32 %v1060_v61, %v1060_v61  ;;  %v1067_v6 = vmul.f32 %v1062_v60, %v1062_v60 }
 0x1be   : > { %v1063_v3 = vsub.f32 %v1026_v42, %v1058_v0  ;;  %v1061_v4 = vsub.f32 %v1018_v41, %v1056_v1  ;;  %v1070_v5 = vsel %vm970_vm0, %v1065_v2, 0.0  ;;  %v1076_v11 = vsel %vm970_vm0, %v1067_v6, 0.0 }
 0x1bf   : > { %1071 = vadd.xlane.f32.xlu1 %v1070_v5  ;;  %v1053_v7 = vpop.xlane.xlu0 %1052 }
 0x1c0   : > { %v1059_v8 = vmul.f32 0.015625, %v1053_v7  ;;  %v1066_v9 = vmul.f32 %v1061_v4, %v1061_v4  ;;  %v1068_v13 = vmul.f32 %v1063_v3, %v1063_v3 }
 0x1c2   : > { %v1064_v10 = vsub.f32 %v1031_v51, %v1059_v8  ;;  %v1073_v12 = vsel %vm970_vm0, %v1066_v9, 0.0  ;;  %v1079_v15 = vsel %vm970_vm0, %v1068_v13, 0.0 }
 0x1c3   : > { %1077 = vadd.xlane.f32.xlu1 %v1076_v11  ;;  %1074 = vadd.xlane.f32.xlu0 %v1073_v12 }
 0x1c4   : > { %v1069_v14 = vmul.f32 %v1064_v10, %v1064_v10 }
 0x1c6   : > { %v1082_v16 = vsel %vm1050_vm1, %v1069_v14, 0.0 }
 0x1c7   : > { %1080 = vadd.xlane.f32.xlu0 %v1079_v15  ;;  %1083 = vadd.xlane.f32.xlu1 %v1082_v16 }
 0x24c   : > { %v1072_v17 = vpop.xlane.xlu1 %1071 }
 0x24d   : > { %v1085_v18 = vmul.f32 0.015625, %v1072_v17 }
 0x24f   : > { %v1090_v19 = vadd.f32 1e-05, %v1085_v18 }
 0x250   : > { %v1078_v20 = vpop.xlane.xlu1 %1077  ;;  %v1075_v21 = vpop.xlane.xlu0 %1074 }
 0x251   : > { %4765 = vrsqrt.f32 %v1090_v19  ;;  %v1087_v22 = vmul.f32 0.015625, %v1078_v20  ;;  %v1086_v23 = vmul.f32 0.015625, %v1075_v21 }
 0x253   : > { %v1092_v24 = vadd.f32 1e-05, %v1087_v22  ;;  %v1091_v25 = vadd.f32 1e-05, %v1086_v23 }
 0x254   : > { %v1084_v26 = vpop.xlane.xlu1 %1083  ;;  %v1081_v27 = vpop.xlane.xlu0 %1080 }
 0x255   : > { %4767 = vrsqrt.f32 %v1092_v24  ;;  %v1089_v28 = vmul.f32 0.015625, %v1084_v26  ;;  %v1088_v29 = vmul.f32 0.015625, %v1081_v27 }
 0x256   : > { %4769 = vrsqrt.f32 %v1091_v25 }
 0x257   : > { %v1094_v30 = vadd.f32 1e-05, %v1089_v28  ;;  %v1093_v31 = vadd.f32 1e-05, %v1088_v29 }
 0x259   : > { %4771 = vrsqrt.f32 %v1094_v30 }
 0x25a   : > { %4773 = vrsqrt.f32 %v1093_v31 }
 0x25b   : > { %v4766_v32 = vpop.eup %4765 }
 0x25c   : > { %v1100_v34 = vmul.f32 %v4766_v32, %v1060_v61 }
 0x25e   : > { %v1111_v36 = vmul.f32 %v4232_v33, %v1100_v34 }
 0x25f   : > { %v4768_v37 = vpop.eup %4767 }
 0x260   : > { %v4770_v38 = vpop.eup %4769  ;;  %v1122_v39 = vadd.f32 %v4233_v35, %v1111_v36  ;;  %v1102_v40 = vmul.f32 %v4768_v37, %v1062_v60 }
 0x261   : > { %v1101_v41 = vmul.f32 %v4770_v38, %v1061_v4 }
 0x262   : > { %1127 = vst.msk [vmem:[#allocation2] sm:$0xff] %vm970_vm0, %v1122_v39  ;;  %v1113_v42 = vmul.f32 %v4232_v33, %v1102_v40 }
 0x263   : > { %v4772_v43 = vpop.eup %4771  ;;  %v1112_v44 = vmul.f32 %v4232_v33, %v1101_v41 }
 0x264   : > { %v4774_v45 = vpop.eup %4773  ;;  %v1124_v46 = vadd.f32 %v4233_v35, %v1113_v42  ;;  %v1104_v47 = vmul.f32 %v4772_v43, %v1064_v10 }
 0x265   : > { %v1123_v48 = vadd.f32 %v4233_v35, %v1112_v44  ;;  %v1103_v49 = vmul.f32 %v4774_v45, %v1063_v3 }
 0x266   : > { %1129 = vst.msk [vmem:[#allocation2 + $0x10] sm:$0xff] %vm970_vm0, %v1124_v46  ;;  %v1115_v50 = vmul.f32 %v4232_v33, %v1104_v47 }
 0x267   : > { %1128 = vst.msk [vmem:[#allocation2 + $0x8] sm:$0xff] %vm970_vm0, %v1123_v48  ;;  %v1114_v51 = vmul.f32 %v4232_v33, %v1103_v49 }
 0x268   : > { %v1126_v52 = vadd.f32 %v4233_v35, %v1115_v50 }
 0x269   : > { %v1125_v53 = vadd.f32 %v4233_v35, %v1114_v51 }
 0x26a   : > { %1131 = vst.msk [vmem:[#allocation2 + $0x20] sm:$0x3] %vm1050_vm1, %v1126_v52 }
 0x26b   : > { %1130 = vst.msk [vmem:[#allocation2 + $0x18] sm:$0xff] %vm970_vm0, %v1125_v53 }
 0x26c PF: > { %v1132_v54 = vld [vmem:[#allocation2] sm:$0xff]  ;;  %vm1139_vm2 = vcmask 523264   ;;  %vm1152_vm3 = vcmask 517120   ;;  %v4808_v22 = vld [vmem:[%s5263_s30 + $0x14] ss:$8 sps:$4 sm:$0xff]   ;;  %v5109_v26 = vmov 0   ;;  %s6261_s4 = scalar_lea.vmem %s6214_s10, %s5248_s29 }
 0x26d   : > { %v1134_v55 = vld [vmem:[#allocation2 + $0x10] sm:$0xff]  ;;  %v1140_v57 = vsel %vm1139_vm2, %v1132_v54, 0.0  ;;  %v4805_v20 = vld [vmem:[%s5263_s30 + $0x4] ss:$8 sps:$4 sm:$0xff]   ;;  %v4807_v21 = vld [vmem:[%s5263_s30] ss:$8 sps:$4 sm:$0xff]   ;;  %1333 = vmatprep.mubr.bf16.mxu0 %v5109_v26 }
 0x26e   : > { %v1133_v56 = vld [vmem:[#allocation2 + $0x8] sm:$0xff]  ;;  %v1146_v58 = vsel %vm1139_vm2, %v1134_v55, 0.0  ;;  %1141 = vadd.xlane.f32.xlu0 %v1140_v57  ;;  %1301 = vmatprep.subr.bf16.mxu0 %v4805_v20  ;;  %v4810_v23 = vld [vmem:[%s5263_s30 + $0x10] ss:$8 sps:$4 sm:$0xff]   ;;  %v4814_v27 = vld [vmem:[%s5263_s30 + $0x34] ss:$8 sps:$4 sm:$0xff]  }
 0x26f   : > { %1147 = vadd.xlane.f32.xlu1 %v1146_v58  ;;  %v1143_v60 = vsel %vm1139_vm2, %v1133_v56, 0.0  ;;  %1302 = vmatpush1.bf16.msra.mxu0 %v4807_v21  ;;  %v4811_v24 = vld [vmem:[%s5263_s30 + $0x24] ss:$8 sps:$4 sm:$0xff]   ;;  %v4813_v25 = vld [vmem:[%s5263_s30 + $0x20] ss:$8 sps:$4 sm:$0xff]   ;;  %s6257_s25 = sld [smem:[#allocation12_spill]] }
 0x270   : > { %1303 = vmatprep.subr.bf16.mxu0 %v4808_v22  ;;  %v4816_v28 = vld [vmem:[%s5263_s30 + $0x30] ss:$8 sps:$4 sm:$0xff]   ;;  %s6259_s2 = sld [smem:[#allocation13_spill]]  ;;  %vm1374_vm4 = vcmask 130048   ;;  %vm1481_vm5 = vcmask 1040384   ;;  %s5111_s21 = smov 112  }
 0x271   : > { %v1136_v16 = vld [vmem:[#allocation2 + $0x20] sm:$0x3]  ;;  %s5112_s23 = smov 48   ;;  %vm2088_vm6 = vsmask.f32 7424  ;;  %vm1438_vm7 = vcmask 138240  }
 0x272   : > { %v1135_v59 = vld [vmem:[#allocation2 + $0x18] sm:$0xff]  ;;  %1144 = vadd.xlane.f32.xlu0 %v1143_v60  ;;  %v1153_v18 = vsel %vm1152_vm3, %v1136_v16, 0.0  ;;  %vm1445_vm8 = vcmask 131072   ;;  %s5113_s1 = smov 32   ;;  %s5114_s30 = smov 96   ;;  %vm2080_vm9 = vcmask 261120  }
 0x273   : > { %v1149_v61 = vsel %vm1139_vm2, %v1135_v59, 0.0  ;;  %1304 = vmatpush1.bf16.msra.mxu0 %v4810_v23  ;;  %s5115_s8 = smov 16   ;;  %vm2084_vm10 = vcmask 392192   ;;  %vm5118_vm11 = vmmov 0   ;;  %p4327_p5 = scmp.ne.s32.totalorder %s5242_s28, 1 }
 0x274   : > { %1150 = vadd.xlane.f32.xlu1 %v1149_v61  ;;  %1305 = vmatprep.subr.bf16.mxu0 %v4811_v24  ;;  %vm3679_vm12 = vcmask (!%p4327_p5), 1041408  }
 0x275   : > { %s6258_s26 = scalar_lea.vmem %s6257_s25, %s5248_s29  ;;  %s5116_s25 = smov 80  }
 0x276   : > { %v4234_v48 = vld [vmem:[%s6258_s26] ss:$0 sm:$0xff]  ;;  %s6260_s18 = scalar_lea.vmem %s6259_s2, %s5248_s29  ;;  %s6262_s2 = scalar_lea.vmem %s6215_s11, %s5248_s29 }
 0x277   : > { %1306 = vmatpush1.bf16.msra.mxu0 %v4813_v25  ;;  %v4235_v53 = vld [vmem:[%s6260_s18] ss:$0 sm:$0xff] }
 0x278   : > { %1307 = vmatprep.subr.bf16.mxu0 %v4814_v27 }
 0x27b   : > { %1308 = vmatpush1.bf16.msra.mxu0 %v4816_v28 }
 0x2fb   : > { %v1142_v62 = vpop.xlane.xlu0 %1141 }
 0x2fc   : > { %v1148_v63 = vpop.xlane.xlu1 %1147  ;;  %v1157_v0 = vmul.f32 0.015625, %v1142_v62 }
 0x2fd   : > { %v1159_v1 = vmul.f32 0.015625, %v1148_v63 }
 0x2fe   : > { %v5442_v2 = vsub.f32 %v1132_v54, %v1157_v0 }
 0x2ff   : > { %v5444_v3 = vsub.f32 %v1134_v55, %v1159_v1  ;;  %v1145_v4 = vpop.xlane.xlu0 %1144 }
 0x300   : > { %v1158_v6 = vmul.f32 0.015625, %v1145_v4  ;;  %v1167_v8 = vmul.f32 %v5442_v2, %v5442_v2 }
 0x301   : > { %v1151_v5 = vpop.xlane.xlu1 %1150  ;;  %v1169_v9 = vmul.f32 %v5444_v3, %v5444_v3 }
 0x302   : > { %v1160_v7 = vmul.f32 0.015625, %v1151_v5  ;;  %v1163_v10 = vsub.f32 %v1133_v56, %v1158_v6  ;;  %v1172_v12 = vsel %vm1139_vm2, %v1167_v8, 0.0 }
 0x303   : > { %1173 = vadd.xlane.f32.xlu0 %v1172_v12  ;;  %v1178_v13 = vsel %vm1139_vm2, %v1169_v9, 0.0 }
 0x304   : > { %v5450_v11 = vsub.f32 %v1135_v59, %v1160_v7  ;;  %v1168_v14 = vmul.f32 %v1163_v10, %v1163_v10 }
 0x306   : > { %v1170_v15 = vmul.f32 %v5450_v11, %v5450_v11  ;;  %v1175_v17 = vsel %vm1139_vm2, %v1168_v14, 0.0 }
 0x307   : > { %1179 = vadd.xlane.f32.xlu0 %v1178_v13  ;;  %1176 = vadd.xlane.f32.xlu1 %v1175_v17  ;;  %v1240_v13 = vld [vmem:[%s5268_s22] sm:$0x3]  ;;  %s5110_s22 = smov 64  }
 0x308   : > { %v1181_v19 = vsel %vm1139_vm2, %v1170_v15, 0.0 }
 0x30b   : > { %1154 = vadd.xlane.f32.xlu0 %v1153_v18  ;;  %1182 = vadd.xlane.f32.xlu1 %v1181_v19 }
 0x390   : > { %v1174_v29 = vpop.xlane.xlu0 %1173 }
 0x391   : > { %v1187_v30 = vmul.f32 0.015625, %v1174_v29 }
 0x393   : > { %v1192_v31 = vadd.f32 1e-05, %v1187_v30 }
 0x394   : > { %v1177_v32 = vpop.xlane.xlu1 %1176  ;;  %v1180_v33 = vpop.xlane.xlu0 %1179 }
 0x395   : > { %4849 = vrsqrt.f32 %v1192_v31  ;;  %v1188_v34 = vmul.f32 0.015625, %v1177_v32  ;;  %v1189_v35 = vmul.f32 0.015625, %v1180_v33 }
 0x397   : > { %v1193_v36 = vadd.f32 1e-05, %v1188_v34  ;;  %v1194_v37 = vadd.f32 1e-05, %v1189_v35 }
 0x398   : > { %v1183_v38 = vpop.xlane.xlu1 %1182  ;;  %v1155_v39 = vpop.xlane.xlu0 %1154 }
 0x399   : > { %4851 = vrsqrt.f32 %v1193_v36  ;;  %v1190_v40 = vmul.f32 0.015625, %v1183_v38  ;;  %v1161_v41 = vmul.f32 0.015625, %v1155_v39 }
 0x39a   : > { %4853 = vrsqrt.f32 %v1194_v37  ;;  %v5518_v37 = vsel %vm1481_vm5, 65535, %v5109_v26 }
 0x39b   : > { %v1195_v42 = vadd.f32 1e-05, %v1190_v40  ;;  %v1166_v43 = vsub.f32 %v1136_v16, %v1161_v41 }
 0x39d   : > { %4855 = vrsqrt.f32 %v1195_v42  ;;  %v1171_v44 = vmul.f32 %v1166_v43, %v1166_v43 }
 0x39f   : > { %v4850_v45 = vpop.eup %4849  ;;  %v1184_v46 = vsel %vm1152_vm3, %v1171_v44, 0.0 }
 0x3a0   : > { %1185 = vadd.xlane.f32.xlu1 %v1184_v46  ;;  %v1202_v47 = vmul.f32 %v4850_v45, %v5442_v2 }
 0x3a2   : > { %v1213_v51 = vmul.f32 %v4234_v48, %v1202_v47 }
 0x3a3   : > { %v4852_v49 = vpop.eup %4851 }
 0x3a4   : > { %v1203_v50 = vmul.f32 %v4852_v49, %v1163_v10  ;;  %v4854_v52 = vpop.eup %4853  ;;  %v1224_v56 = vadd.f32 %v4235_v53, %v1213_v51  ;;  %v1242_v10 = vlaneseq }
 0x3a5   : > { %v1204_v58 = vmul.f32 %v4854_v52, %v5444_v3 }
 0x3a6   : > { %v1214_v54 = vmul.f32 %v4234_v48, %v1203_v50 }
 0x3a7   : > { %v4856_v55 = vpop.eup %4855  ;;  %v1215_v62 = vmul.f32 %v4234_v48, %v1204_v58 }
 0x3a8   : > { %v1225_v57 = vadd.f32 %v4235_v53, %v1214_v54  ;;  %v1205_v59 = vmul.f32 %v4856_v55, %v5450_v11  ;;  %v5487_v11 = vshrl.u32 %v1242_v10, 7 }
 0x3a9   : > { %v1226_v0 = vadd.f32 %v4235_v53, %v1215_v62 }
 0x3aa   : > { %v1237_v60 = vpack.c.bf16 %v1225_v57, %v1224_v56  ;;  %v1216_v61 = vmul.f32 %v4234_v48, %v1205_v59  ;;  %v1244_v12 = vsub.s32 0, %v5487_v11  ;;  %v1248_v14 = vsub.s32 1, %v5487_v11 }
 0x3ac   : > { %4244 = vmatmul.mubr.msk.bf16.vlgmr.msra.gmra.mrb[0].mxu0 %vm1139_vm2, %v1237_v60  ;;  %v1227_v63 = vadd.f32 %v4235_v53, %v1216_v61  ;;  %v1245_v15 = vrot.slane %v1240_v13, %v1244_v12  ;;  %v5496_v17 = vrot.slane %v1240_v13, %v1248_v14 }
 0x3ad   : > { %1343 = vmatprep.mubr.bf16.mxu0 %v5109_v26 }
 0x3ae   : > { %v1238_v1 = vpack.c.bf16 %v1227_v63, %v1226_v0 }
 0x3b4   : > { %4245 = vmatmul.mubr.msk.bf16.gmra.mrb[4].mxu0 %vm1139_vm2, %v1238_v1 }
 0x3b5   : > { %1353 = vmatprep.mubr.bf16.mxu0 %v5109_v26 }
 0x42d   : > { %v1186_v2 = vpop.xlane.xlu1 %1185 }
 0x42e   : > { %v1191_v4 = vmul.f32 0.015625, %v1186_v2 }
 0x430   : > { %v1196_v3 = vadd.f32 1e-05, %v1191_v4 }
 0x432   : > { %4857 = vrsqrt.f32 %v1196_v3 }
 0x43c   : > { %v4858_v5 = vpop.eup %4857 }
 0x43d   : > { %v1206_v6 = vmul.f32 %v4858_v5, %v1166_v43 }
 0x43f   : > { %v1217_v7 = vmul.f32 %v4234_v48, %v1206_v6 }
 0x441   : > { %v1228_v8 = vadd.f32 %v4235_v53, %v1217_v7 }
 0x443   : > { %v1239_v9 = vpack.c.bf16 %v1228_v8, %v1228_v8 }
 0x445   : > { %4246 = vmatmul.mubr.msk.bf16.gmra.mrb[8].mxu0 %vm1139_vm2, %v1239_v9 }
 0x47f   : > { %v1335_v16 = vpop.f32.mrb[0].mxu0 }
 0x480   : > { %v1337_v18 = vpop.f32.mrb[1].mxu0  ;;  %v1336_v20 = vadd.f32 %v1335_v16, %v1245_v15 }
 0x481   : > { %v1339_v19 = vpop.f32.mrb[2].mxu0  ;;  %v1338_v23 = vadd.f32 %v1337_v18, %v5496_v17 }
 0x482   : > { %v1340_v21 = vadd.f32 %v1339_v19, %v1245_v15  ;;  %v1341_v22 = vpop.f32.mrb[3].mxu0 }
 0x483   : > { %v1342_v24 = vadd.f32 %v1341_v22, %v5496_v17 }
 0x484   : > { %v5500_v25 = vpack.c.bf16 %v1340_v21, %v1336_v20 }
 0x485   : > { %v5502_v27 = vpack.c.bf16 %v1342_v24, %v1338_v23 }
 0x486   : > { %1370 = vrot.lane.b32.xlu0 %v5500_v25, %s5110_s22  ;;  %4542 = vmatprep.mubr.msk.bf16.mxu0 %vm1374_vm4, %v5500_v25 }
 0x487   : > { %v1345_v28 = vpop.f32.mrb[4].mxu0  ;;  %4546 = vmatprep.subr.bf16.mxu1 %v5502_v27 }
 0x488   : > { %v1347_v29 = vpop.f32.mrb[5].mxu0  ;;  %4547 = vmatpush3.bf16.msra.mxu1 %v5502_v27  ;;  %v1346_v31 = vadd.f32 %v1345_v28, %v1245_v15 }
 0x489   : > { %v1349_v30 = vpop.f32.mrb[6].mxu0  ;;  %v1348_v34 = vadd.f32 %v1347_v29, %v5496_v17 }
 0x48a   : > { %v1350_v32 = vadd.f32 %v1349_v30, %v1245_v15  ;;  %1535 = vrot.lane.b32.xlu0 %v5500_v25, %s5111_s21  ;;  %v1351_v33 = vpop.f32.mrb[7].mxu0 }
 0x48b   : > { %v1352_v35 = vadd.f32 %v1351_v33, %v5496_v17 }
 0x48c   : > { %v5514_v36 = vpack.c.bf16 %v1350_v32, %v1346_v31 }
 0x48d   : > { %v5520_v38 = vpack.c.bf16 %v1352_v35, %v1348_v34 }
 0x48e   : > { %1372 = vrot.lane.b32.xlu1 %v5514_v36, %s5110_s22  ;;  %v2091_v49 = vshll.u32 %v5514_v36, 16  ;;  %v2089_v58 = vshrl.u32 %v5514_v36, 16 }
 0x48f   : > { %v1485_v39 = vand.u32 %v5518_v37, %v5520_v38 }
 0x490   : > { %v2093_v56 = vrot.slane %v2091_v49, 1 }
 0x491   : > { %4548 = vmatprep.subr.bf16.mxu1 %v1485_v39 }
 0x492   : > { %4549 = vmatpush3.bf16.msra.mxu1 %v1485_v39  ;;  %1539 = vrot.lane.b32.xlu1 %v5500_v25, %s5112_s23  ;;  %v2094_v60 = vor.u32 %v2093_v56, %v2089_v58 }
 0x496   : > { %1541 = vrot.lane.b32.xlu1 %v5514_v36, %s5112_s23 }
 0x49a   : > { %1537 = vrot.lane.b32.xlu1 %v5514_v36, %s5111_s21 }
 0x4f8   : > { %v1371_v40 = vpop.permute.xlu0 %1370 }
 0x4f9   : > { %4710 = vmatprep.subr.msk.bf16.mxu0 %vm1374_vm4, %v1371_v40  ;;  %v1382_v41 = vsel %vm1374_vm4, %v1371_v40, 0 }
 0x4fa   : > { %4539 = vmatpush3.bf16.xpose.msra.mxu0 %v1382_v41 }
 0x4fc   : > { %v1536_v45 = vpop.permute.xlu0 %1535 }
 0x500   : > { %v1373_v42 = vpop.permute.xlu1 %1372 }
 0x501   : > { %4711 = vmatprep.subr.msk.bf16.mxu0 %vm1374_vm4, %v1373_v42  ;;  %v1385_v43 = vsel %vm1374_vm4, %v1373_v42, 0 }
 0x502   : > { %4541 = vmatpush3.bf16.xpose.msra.mxu0 %v1385_v43 }
 0x504   : > { %v1540_v44 = vpop.permute.xlu1 %1539 }
 0x505   : > { %4712 = vmatprep.subr.msk.bf16.mxu0 %vm1374_vm4, %v1540_v44  ;;  %v1550_v46 = vsel %vm1374_vm4, %v1540_v44, 0 }
 0x508   : > { %v1542_v47 = vpop.permute.xlu1 %1541 }
 0x509   : > { %4543 = vmatmul.mubr.msk.bf16.vlgmr.msra.gmra.mrb[12].mxu0 %vm1374_vm4, %v5514_v36  ;;  %v1553_v48 = vsel %vm1374_vm4, %v1542_v47, 0 }
 0x50a   : > { %4555 = vmatpush3.bf16.xpose.msra.mxu0 %v1550_v46  ;;  %4558 = vmatprep.mubr.msk.bf16.mxu0 %vm1374_vm4, %v1536_v45 }
 0x50b   : > { %4713 = vmatprep.subr.msk.bf16.mxu0 %vm1374_vm4, %v1542_v47 }
 0x50c   : > { %v1538_v50 = vpop.permute.xlu1 %1537 }
 0x512   : > { %4557 = vmatpush3.bf16.xpose.msra.mxu0 %v1553_v48 }
 0x518   : > { %v1355_v51 = vpop.f32.mrb[8].mxu0 }
 0x519   : > { %v1356_v52 = vadd.f32 %v1355_v51, %v1245_v15  ;;  %v5544_v53 = vpop.f32.mrb[9].mxu0  ;;  %4559 = vmatmul.mubr.msk.bf16.vlgmr.msra.gmra.mrb[16].mxu0 %vm1374_vm4, %v1538_v50 }
 0x51a   : > { %v1359_v54 = vpop.f32.mrb[10].mxu0 }
 0x51b   : > { %v5547_v55 = vpack.c.bf16 %v1356_v52, %v1356_v52  ;;  %v1360_v57 = vpop.f32.mrb[11].mxu0 }
 0x51d   : > { %v2096_v59 = vshll.u32 %v5547_v55, 16 }
 0x51f   : > { %v2098_v61 = vrot.slane %v2096_v59, 1 }
 0x521   : > { %v5552_v62 = vsel %vm2088_vm6, %v2094_v60, %v2098_v61 }
 0x5dc   : > { %v4544_v63 = vpop.f32.mrb[12].mxu0 }
 0x5dd   : > { %v1421_v0 = vpop.f32.mrb[13].mxu0  ;;  %v1437_v3 = vmul.f32 0.25, %v4544_v63 }
 0x5de   : > { %v1435_v1 = vmul.f32 0.25, %v1421_v0  ;;  %v4545_v2 = vpop.f32.mrb[14].mxu0 }
 0x5df   : > { %v1424_v4 = vpop.f32.mrb[15].mxu0  ;;  %v1446_v8 = vsel %vm1445_vm8, %v1437_v3, -inf }
 0x5e0   : > { %v1436_v5 = vmul.f32 0.25, %v1424_v4  ;;  %v1439_v6 = vsel %vm1438_vm7, %v1435_v1, -inf }
 0x5e1   : > { %1440 = vmax.xlane.f32.xlu0 %v1439_v6 }
 0x5e2   : > { %v1442_v7 = vsel %vm1438_vm7, %v1436_v5, -inf }
 0x5e3   : > { %1443 = vmax.xlane.f32.xlu1 %v1442_v7 }
 0x5e5   : > { %1447 = vmax.xlane.f32.xlu0 %v1446_v8 }
 0x5ec   : > { %v4560_v9 = vpop.f32.mrb[16].mxu0 }
 0x5ed   : > { %v1605_v10 = vmul.f32 0.25, %v4560_v9  ;;  %v1589_v13 = vpop.f32.mrb[17].mxu0 }
 0x5ee   : > { %v1603_v15 = vmul.f32 0.25, %v1589_v13  ;;  %v4561_v16 = vpop.f32.mrb[18].mxu0 }
 0x5ef   : > { %v1592_v18 = vpop.f32.mrb[19].mxu0  ;;  %v1612_v19 = vsel %vm1445_vm8, %v1605_v10, -inf }
 0x5f0   : > { %v1604_v20 = vmul.f32 0.25, %v1592_v18  ;;  %1613 = vmax.xlane.f32.xlu1 %v1612_v19  ;;  %v1606_v21 = vsel %vm1438_vm7, %v1603_v15, -inf }
 0x5f1   : > { %1607 = vmax.xlane.f32.xlu0 %v1606_v21 }
 0x5f2   : > { %v1609_v22 = vsel %vm1438_vm7, %v1604_v20, -inf }
 0x5f5   : > { %1610 = vmax.xlane.f32.xlu0 %v1609_v22 }
 0x66e   : > { %v1441_v23 = vpop.xlane.xlu0 %1440 }
 0x66f   : > { %v1449_v28 = vsub.f32 %v1435_v1, %v1441_v23 }
 0x670   : > { %v1444_v24 = vpop.xlane.xlu1 %1443 }
 0x671   : > { %v1450_v29 = vsub.f32 %v1436_v5, %v1444_v24  ;;  %v1452_v33 = vmul.f32 1.442695, %v1449_v28 }
 0x672   : > { %v1448_v30 = vpop.xlane.xlu0 %1447 }
 0x673   : > { %v1454_v31 = vmul.f32 1.442695, %v1450_v29  ;;  %v1451_v32 = vsub.f32 %v1437_v3, %v1448_v30 }
 0x675   : > { %4859 = vpow2.f32 %v1454_v31  ;;  %v1456_v34 = vmul.f32 1.442695, %v1451_v32 }
 0x677   : > { %4861 = vpow2.f32 %v1456_v34 }
 0x678   : > { %4863 = vpow2.f32 %v1452_v33 }
 0x67d   : > { %v1614_v35 = vpop.xlane.xlu1 %1613 }
 0x67e   : > { %v1617_v39 = vsub.f32 %v1605_v10, %v1614_v35  ;;  %v1608_v40 = vpop.xlane.xlu0 %1607 }
 0x67f   : > { %v4860_v41 = vpop.eup %4859  ;;  %v1615_v42 = vsub.f32 %v1603_v15, %v1608_v40 }
 0x680   : > { %v1622_v43 = vmul.f32 1.442695, %v1617_v39  ;;  %v1461_v44 = vsel %vm1438_vm7, %v4860_v41, 0.0 }
 0x681   : > { %v4862_v45 = vpop.eup %4861  ;;  %v1618_v46 = vmul.f32 1.442695, %v1615_v42  ;;  %1462 = vadd.xlane.f32.xlu1 %v1461_v44 }
 0x682   : > { %4865 = vpow2.f32 %v1622_v43  ;;  %v1611_v47 = vpop.xlane.xlu0 %1610  ;;  %v1464_v48 = vsel %vm1445_vm8, %v4862_v45, 0.0  ;;  %v4864_v49 = vpop.eup %4863 }
 0x683   : > { %v1616_v50 = vsub.f32 %v1604_v20, %v1611_v47  ;;  %1465 = vadd.xlane.f32.xlu0 %v1464_v48  ;;  %4867 = vpow2.f32 %v1618_v46  ;;  %v1458_v52 = vsel %vm1438_vm7, %v4864_v49, 0.0 }
 0x685   : > { %v1620_v51 = vmul.f32 1.442695, %v1616_v50 }
 0x687   : > { %4869 = vpow2.f32 %v1620_v51  ;;  %1459 = vadd.xlane.f32.xlu0 %v1458_v52 }
 0x68c   : > { %v4866_v54 = vpop.eup %4865 }
 0x68d   : > { %v1630_v56 = vsel %vm1445_vm8, %v4866_v54, 0.0  ;;  %v4868_v57 = vpop.eup %4867 }
 0x68e   : > { %1631 = vadd.xlane.f32.xlu1 %v1630_v56  ;;  %v1624_v59 = vsel %vm1438_vm7, %v4868_v57, 0.0 }
 0x691   : > { %v4870_v58 = vpop.eup %4869 }
 0x692   : > { %1625 = vadd.xlane.f32.xlu1 %v1624_v59  ;;  %v1627_v60 = vsel %vm1438_vm7, %v4870_v58, 0.0 }
 0x693   : > { %1628 = vadd.xlane.f32.xlu0 %v1627_v60 }
 0x6a3   : > { %1645 = vrot.lane.b32.xlu1 %v5520_v38, %s5111_s21 }
 0x6a7   : > { %1709 = vrot.lane.b32.xlu1 %v5500_v25, %s5113_s1 }
 0x6a9   : > { %1643 = vrot.lane.b32.xlu0 %v5502_v27, %s5111_s21 }
 0x6ab   : > { %1711 = vrot.lane.b32.xlu1 %v5514_v36, %s5113_s1 }
 0x6ad   : > { %1705 = vrot.lane.b32.xlu0 %v5500_v25, %s5114_s30 }
 0x6af   : > { %1707 = vrot.lane.b32.xlu1 %v5514_v36, %s5114_s30 }
 0x70e   : > { %v1463_v61 = vpop.xlane.xlu1 %1462 }
 0x710   : > { %v1466_v63 = vpop.xlane.xlu0 %1465 }
 0x711   : > { %4871 = vrcp.f32 %v1466_v63 }
 0x712   : > { %4873 = vrcp.f32 %v1463_v61 }
 0x714   : > { %v1460_v0 = vpop.xlane.xlu0 %1459 }
 0x715   : > { %4875 = vrcp.f32 %v1460_v0 }
 0x71b   : > { %v1632_v1 = vpop.xlane.xlu1 %1631  ;;  %v4872_v2 = vpop.eup %4871 }
 0x71c   : > { %v4874_v4 = vpop.eup %4873  ;;  %4877 = vrcp.f32 %v1632_v1  ;;  %v1472_v6 = vmul.f32 %v4872_v2, %v4862_v45 }
 0x71d   : > { %v1471_v9 = vmul.f32 %v4874_v4, %v4860_v41 }
 0x71e   : > { %v1474_v15 = vpack.c.bf16 %v1472_v6, %v1472_v6 }
 0x71f   : > { %v4876_v3 = vpop.eup %4875  ;;  %v1626_v5 = vpop.xlane.xlu1 %1625 }
 0x720   : > { %4879 = vrcp.f32 %v1626_v5  ;;  %v1629_v7 = vpop.xlane.xlu0 %1628  ;;  %v1470_v8 = vmul.f32 %v4876_v3, %v4864_v49 }
 0x721   : > { %4881 = vrcp.f32 %v1629_v7 }
 0x722   : > { %v1473_v10 = vpack.c.bf16 %v1471_v9, %v1470_v8 }
 0x723   : > { %v1646_v13 = vpop.permute.xlu1 %1645 }
 0x724   : > { %v1655_v16 = vand.u32 %v1646_v13, %v5518_v37  ;;  %4550 = vmatprep.mubr.msk.bf16.mxu1 %vm1438_vm7, %v1473_v10  ;;  %v1644_v18 = vpop.permute.xlu0 %1643 }
 0x725   : > { %4551 = vmatmul.mubr.msk.bf16.vlgmr.msra.gmra.mrb[0].mxu1 %vm1438_vm7, %v1474_v15  ;;  %4562 = vmatprep.subr.bf16.mxu1 %v1644_v18 }
 0x726   : > { %4563 = vmatpush3.bf16.msra.mxu1 %v1644_v18  ;;  %v4878_v19 = vpop.eup %4877 }
 0x727   : > { %4564 = vmatprep.subr.bf16.mxu1 %v1655_v16  ;;  %v1710_v21 = vpop.permute.xlu1 %1709  ;;  %v1638_v23 = vmul.f32 %v4878_v19, %v4866_v54 }
 0x728   : > { %v1706_v31 = vpop.permute.xlu0 %1705  ;;  %v1720_v32 = vsel %vm1374_vm4, %v1710_v21, 0 }
 0x729   : > { %v1640_v30 = vpack.c.bf16 %v1638_v23, %v1638_v23 }
 0x72a   : > { %v4880_v20 = vpop.eup %4879  ;;  %4565 = vmatpush3.bf16.msra.mxu1 %v1655_v16 }
 0x72b   : > { %v4882_v22 = vpop.eup %4881  ;;  %4714 = vmatprep.subr.msk.bf16.mxu1 %vm1374_vm4, %v1710_v21  ;;  %v1636_v24 = vmul.f32 %v4880_v20, %v4868_v57  ;;  %v1712_v33 = vpop.permute.xlu1 %1711 }
 0x72c   : > { %v1637_v28 = vmul.f32 %v4882_v22, %v4870_v58  ;;  %v1723_v34 = vsel %vm1374_vm4, %v1712_v33, 0 }
 0x72e   : > { %v1639_v29 = vpack.c.bf16 %v1637_v28, %v1636_v24 }
 0x72f   : > { %v1708_v35 = vpop.permute.xlu1 %1707 }
 0x730   : > { %4566 = vmatprep.mubr.msk.bf16.mxu1 %vm1438_vm7, %v1639_v29 }
 0x731   : > { %4567 = vmatmul.mubr.msk.bf16.vlgmr.msra.gmra.mrb[4].mxu1 %vm1438_vm7, %v1640_v30 }
 0x732   : > { %4574 = vmatprep.mubr.msk.bf16.mxu1 %vm1374_vm4, %v1706_v31 }
 0x733   : > { %4571 = vmatpush3.bf16.xpose.msra.mxu1 %v1720_v32 }
 0x734   : > { %4715 = vmatprep.subr.msk.bf16.mxu1 %vm1374_vm4, %v1712_v33 }
 0x73b   : > { %4573 = vmatpush3.bf16.xpose.msra.mxu1 %v1723_v34 }
 0x742   : > { %4575 = vmatmul.mubr.msk.bf16.vlgmr.msra.gmra.mrb[8].mxu1 %vm1374_vm4, %v1708_v35  ;;  %v2206_v35 = vshll.u32 %v5520_v38, 16 }
 0x7f8   : > { %v5589_v39 = vpop.f32.mrb[0].mxu1 }
 0x7f9   : > { %v5591_v40 = vpop.f32.mrb[1].mxu1 }
 0x7fa   : > { %v4553_v41 = vpop.f32.mrb[2].mxu1 }
 0x7fb   : > { %v5593_v42 = vpop.f32.mrb[3].mxu1 }
 0x804   : > { %v5595_v43 = vpop.f32.mrb[4].mxu1 }
 0x805   : > { %v5597_v44 = vpop.f32.mrb[5].mxu1 }
 0x806   : > { %v4569_v45 = vpop.f32.mrb[6].mxu1 }
 0x807   : > { %v5599_v46 = vpop.f32.mrb[7].mxu1  ;;  %v2208_v45 = vrot.slane %v2206_v35, 1 }
 0x808   : > { %v4775_v47 = vpack.i.bf16 %v5599_v46, %v5597_v44 }
 0x815   : > { %v4576_v48 = vpop.f32.mrb[8].mxu1 }
 0x816   : > { %v1759_v49 = vpop.f32.mrb[9].mxu1  ;;  %v1775_v54 = vmul.f32 0.25, %v4576_v48 }
 0x817   : > { %v1773_v50 = vmul.f32 0.25, %v1759_v49  ;;  %v4577_v51 = vpop.f32.mrb[10].mxu1  ;;  %v2204_v49 = vshrl.u32 %v5520_v38, 16 }
 0x818   : > { %v1762_v52 = vpop.f32.mrb[11].mxu1  ;;  %v1782_v59 = vsel %vm1445_vm8, %v1775_v54, -inf }
 0x819   : > { %v1774_v56 = vmul.f32 0.25, %v1762_v52  ;;  %v1776_v57 = vsel %vm1438_vm7, %v1773_v50, -inf }
 0x81a   : > { %1777 = vmax.xlane.f32.xlu0 %v1776_v57 }
 0x81b   : > { %v1779_v58 = vsel %vm1438_vm7, %v1774_v56, -inf }
 0x81c   : > { %1780 = vmax.xlane.f32.xlu1 %v1779_v58 }
 0x81e   : > { %1783 = vmax.xlane.f32.xlu0 %v1782_v59 }
 0x8a7   : > { %v1778_v60 = vpop.xlane.xlu0 %1777 }
 0x8a8   : > { %v1785_v61 = vsub.f32 %v1773_v50, %v1778_v60  ;;  %v2209_v50 = vor.u32 %v2208_v45, %v2204_v49 }
 0x8a9   : > { %v1781_v63 = vpop.xlane.xlu1 %1780 }
 0x8aa   : > { %v1788_v0 = vmul.f32 1.442695, %v1785_v61  ;;  %v1786_v1 = vsub.f32 %v1774_v56, %v1781_v63 }
 0x8ab   : > { %v1784_v2 = vpop.xlane.xlu0 %1783 }
 0x8ac   : > { %4883 = vpow2.f32 %v1788_v0  ;;  %v1790_v4 = vmul.f32 1.442695, %v1786_v1  ;;  %v1787_v3 = vsub.f32 %v1775_v54, %v1784_v2 }
 0x8ae   : > { %4885 = vpow2.f32 %v1790_v4  ;;  %v1792_v5 = vmul.f32 1.442695, %v1787_v3 }
 0x8b0   : > { %4887 = vpow2.f32 %v1792_v5 }
 0x8b6   : > { %v4884_v6 = vpop.eup %4883 }
 0x8b7   : > { %v1794_v7 = vsel %vm1438_vm7, %v4884_v6, 0.0 }
 0x8b8   : > { %v4886_v8 = vpop.eup %4885  ;;  %1795 = vadd.xlane.f32.xlu0 %v1794_v7 }
 0x8b9   : > { %v1797_v13 = vsel %vm1438_vm7, %v4886_v8, 0.0 }
 0x8ba   : > { %v4888_v9 = vpop.eup %4887 }
 0x8bb   : > { %v1800_v10 = vsel %vm1445_vm8, %v4888_v9, 0.0 }
 0x8bc   : > { %1801 = vadd.xlane.f32.xlu1 %v1800_v10  ;;  %1798 = vadd.xlane.f32.xlu0 %v1797_v13 }
 0x8cd   : > { %1813 = vrot.lane.b32.xlu1 %v5520_v38, %s5114_s30 }
 0x8d1   : > { %1877 = vrot.lane.b32.xlu1 %v5500_v25, %s5115_s8 }
 0x8d2   : > { %1811 = vrot.lane.b32.xlu0 %v5502_v27, %s5114_s30 }
 0x8d5   : > { %1879 = vrot.lane.b32.xlu1 %v5514_v36, %s5115_s8 }
 0x8d6   : > { %1873 = vrot.lane.b32.xlu0 %v5500_v25, %s5116_s25 }
 0x8d9   : > { %1875 = vrot.lane.b32.xlu1 %v5514_v36, %s5116_s25  ;;  %v1358_v36 = vadd.f32 %v5544_v53, %v5496_v17 }
 0x8db   : > { %v1367_v32 = vpack.c.bf16 %v1358_v36, %v1358_v36 }
 0x8dd   : > { %v2211_v17 = vshll.u32 %v1367_v32, 16  ;;  %v5637_v54 = vshrl.u32 %v1367_v32, 16 }
 0x8df   : > { %v2213_v48 = vrot.slane %v2211_v17, 1  ;;  %v2225_v57 = vand.u32 %v5637_v54, %v5518_v37 }
 0x8e1   : > { %v5634_v52 = vsel %vm2088_vm6, %v2209_v50, %v2213_v48 }
 0x945   : > { %v1796_v15 = vpop.xlane.xlu0 %1795 }
 0x946   : > { %4889 = vrcp.f32 %v1796_v15 }
 0x949   : > { %v1799_v16 = vpop.xlane.xlu0 %1798  ;;  %v1802_v18 = vpop.xlane.xlu1 %1801 }
 0x94a   : > { %4891 = vrcp.f32 %v1799_v16 }
 0x94b   : > { %4893 = vrcp.f32 %v1802_v18 }
 0x94d   : > { %v1812_v19 = vpop.permute.xlu0 %1811  ;;  %v1814_v20 = vpop.permute.xlu1 %1813 }
 0x94e   : > { %v1823_v21 = vand.u32 %v1814_v20, %v5518_v37  ;;  %4578 = vmatprep.subr.bf16.mxu0 %v1812_v19 }
 0x94f   : > { %4579 = vmatpush3.bf16.msra.mxu0 %v1812_v19 }
 0x950   : > { %4580 = vmatprep.subr.bf16.mxu0 %v1823_v21  ;;  %v4890_v22 = vpop.eup %4889 }
 0x951   : > { %v1878_v23 = vpop.permute.xlu1 %1877  ;;  %v1806_v28 = vmul.f32 %v4890_v22, %v4884_v6  ;;  %v1874_v34 = vpop.permute.xlu0 %1873 }
 0x952   : > { %v1888_v41 = vsel %vm1374_vm4, %v1878_v23, 0 }
 0x953   : > { %4581 = vmatpush3.bf16.msra.mxu0 %v1823_v21 }
 0x954   : > { %v4892_v25 = vpop.eup %4891  ;;  %4716 = vmatprep.subr.msk.bf16.mxu0 %vm1374_vm4, %v1878_v23 }
 0x955   : > { %v4894_v24 = vpop.eup %4893  ;;  %v1807_v29 = vmul.f32 %v4892_v25, %v4886_v8  ;;  %v1880_v53 = vpop.permute.xlu1 %1879 }
 0x956   : > { %v1808_v30 = vmul.f32 %v4894_v24, %v4888_v9  ;;  %v1891_v51 = vsel %vm1374_vm4, %v1880_v53, 0 }
 0x957   : > { %v1809_v31 = vpack.c.bf16 %v1807_v29, %v1806_v28 }
 0x958   : > { %v1810_v33 = vpack.c.bf16 %v1808_v30, %v1808_v30  ;;  %v5664_v30 = vshrl.u32 %v5547_v55, 16 }
 0x959   : > { %4582 = vmatprep.mubr.msk.bf16.mxu0 %vm1438_vm7, %v1809_v31  ;;  %v1876_v56 = vpop.permute.xlu1 %1875 }
 0x95a   : > { %4583 = vmatmul.mubr.msk.bf16.vlgmr.msra.gmra.mrb[20].mxu0 %vm1438_vm7, %v1810_v33 }
 0x95b   : > { %4590 = vmatprep.mubr.msk.bf16.mxu0 %vm1374_vm4, %v1874_v34 }
 0x95c   : > { %4587 = vmatpush3.bf16.xpose.msra.mxu0 %v1888_v41 }
 0x95d   : > { %4717 = vmatprep.subr.msk.bf16.mxu0 %vm1374_vm4, %v1880_v53 }
 0x964   : > { %4589 = vmatpush3.bf16.xpose.msra.mxu0 %v1891_v51 }
 0x965   : > { %4610 = vmatprep.subr.bf16.mxu0 %v5634_v52 }
 0x96b   : > { %4591 = vmatmul.mubr.msk.bf16.vlgmr.msra.gmra.mrb[24].mxu0 %vm1374_vm4, %v1876_v56 }
 0x96c   : > { %4611 = vmatpush3.bf16.msra.mxu0 %v5634_v52 }
 0x96d   : > { %4612 = vmatprep.subr.bf16.mxu0 %v2225_v57 }
 0x970   : > { %4613 = vmatpush3.bf16.msra.mxu0 %v2225_v57 }
 0xa2d   : > { %v5643_v58 = vpop.f32.mrb[20].mxu0 }
 0xa2e   : > { %v5645_v59 = vpop.f32.mrb[21].mxu0 }
 0xa2f   : > { %v4585_v60 = vpop.f32.mrb[22].mxu0 }
 0xa30   : > { %v5647_v61 = vpop.f32.mrb[23].mxu0 }
 0xa31   : > { %v4780_v63 = vpack.i.bf16 %v5647_v61, %v5645_v59 }
 0xa3e   : > { %v4592_v0 = vpop.f32.mrb[24].mxu0 }
 0xa3f   : > { %v1927_v1 = vpop.f32.mrb[25].mxu0  ;;  %v1943_v5 = vmul.f32 0.25, %v4592_v0 }
 0xa40   : > { %v1941_v2 = vmul.f32 0.25, %v1927_v1  ;;  %v4593_v4 = vpop.f32.mrb[26].mxu0 }
 0xa41   : > { %v1930_v3 = vpop.f32.mrb[27].mxu0  ;;  %v1950_v9 = vsel %vm1445_vm8, %v1943_v5, -inf }
 0xa42   : > { %v1942_v6 = vmul.f32 0.25, %v1930_v3  ;;  %v1944_v7 = vsel %vm1438_vm7, %v1941_v2, -inf }
 0xa43   : > { %1945 = vmax.xlane.f32.xlu0 %v1944_v7 }
 0xa44   : > { %v1947_v8 = vsel %vm1438_vm7, %v1942_v6, -inf }
 0xa45   : > { %1948 = vmax.xlane.f32.xlu1 %v1947_v8 }
 0xa47   : > { %1951 = vmax.xlane.f32.xlu0 %v1950_v9 }
 0xad0   : > { %v1946_v10 = vpop.xlane.xlu0 %1945 }
 0xad1   : > { %v1953_v13 = vsub.f32 %v1941_v2, %v1946_v10 }
 0xad2   : > { %v1949_v15 = vpop.xlane.xlu1 %1948 }
 0xad3   : > { %v1956_v16 = vmul.f32 1.442695, %v1953_v13  ;;  %v1954_v18 = vsub.f32 %v1942_v6, %v1949_v15 }
 0xad4   : > { %v1952_v19 = vpop.xlane.xlu0 %1951 }
 0xad5   : > { %4895 = vpow2.f32 %v1956_v16  ;;  %v1958_v20 = vmul.f32 1.442695, %v1954_v18  ;;  %v1955_v21 = vsub.f32 %v1943_v5, %v1952_v19 }
 0xad7   : > { %4897 = vpow2.f32 %v1958_v20  ;;  %v1960_v22 = vmul.f32 1.442695, %v1955_v21 }
 0xad9   : > { %4899 = vpow2.f32 %v1960_v22 }
 0xadf   : > { %v4896_v23 = vpop.eup %4895 }
 0xae0   : > { %v1962_v25 = vsel %vm1438_vm7, %v4896_v23, 0.0 }
 0xae1   : > { %v4898_v36 = vpop.eup %4897  ;;  %1963 = vadd.xlane.f32.xlu0 %v1962_v25 }
 0xae2   : > { %v1965_v29 = vsel %vm1438_vm7, %v4898_v36, 0.0 }
 0xae3   : > { %v4900_v24 = vpop.eup %4899 }
 0xae4   : > { %v1968_v28 = vsel %vm1445_vm8, %v4900_v24, 0.0 }
 0xae5   : > { %1969 = vadd.xlane.f32.xlu1 %v1968_v28  ;;  %1966 = vadd.xlane.f32.xlu0 %v1965_v29 }
 0xaf6   : > { %1981 = vrot.lane.b32.xlu1 %v5520_v38, %s5116_s25 }
 0xafa   : > { %2102 = vrot.lane.b32.xlu1 %v5552_v62, %s5110_s22 }
 0xafb   : > { %1979 = vrot.lane.b32.xlu0 %v5502_v27, %s5116_s25 }
 0xafe   : > { %2104 = vrot.lane.b32.xlu1 %v5664_v30, %s5110_s22 }
 0xb6e   : > { %v1964_v31 = vpop.xlane.xlu0 %1963 }
 0xb6f   : > { %4901 = vrcp.f32 %v1964_v31 }
 0xb72   : > { %v1967_v32 = vpop.xlane.xlu0 %1966  ;;  %v1970_v33 = vpop.xlane.xlu1 %1969 }
 0xb73   : > { %4903 = vrcp.f32 %v1967_v32 }
 0xb74   : > { %4905 = vrcp.f32 %v1970_v33 }
 0xb76   : > { %v1980_v34 = vpop.permute.xlu0 %1979  ;;  %v1982_v38 = vpop.permute.xlu1 %1981 }
 0xb77   : > { %v1991_v35 = vand.u32 %v1982_v38, %v5518_v37  ;;  %4594 = vmatprep.subr.bf16.mxu1 %v1980_v34 }
 0xb78   : > { %4595 = vmatpush3.bf16.msra.mxu1 %v1980_v34 }
 0xb79   : > { %4596 = vmatprep.subr.bf16.mxu1 %v1991_v35  ;;  %v4902_v27 = vpop.eup %4901 }
 0xb7a   : > { %v2103_v41 = vpop.permute.xlu1 %2102  ;;  %v1974_v53 = vmul.f32 %v4902_v27, %v4896_v23 }
 0xb7b   : > { %v2113_v51 = vsel %vm1374_vm4, %v2103_v41, 0 }
 0xb7c   : > { %4597 = vmatpush3.bf16.msra.mxu1 %v1991_v35 }
 0xb7d   : > { %v4904_v55 = vpop.eup %4903  ;;  %4718 = vmatprep.subr.msk.bf16.mxu1 %vm1374_vm4, %v2103_v41 }
 0xb7e   : > { %v4906_v17 = vpop.eup %4905  ;;  %v1975_v45 = vmul.f32 %v4904_v55, %v4898_v36  ;;  %v2105_v56 = vpop.permute.xlu1 %2104 }
 0xb7f   : > { %v1976_v48 = vmul.f32 %v4906_v17, %v4900_v24  ;;  %v2116_v57 = vsel %vm1374_vm4, %v2105_v56, 0 }
 0xb80   : > { %v1977_v49 = vpack.c.bf16 %v1975_v45, %v1974_v53 }
 0xb81   : > { %v1978_v50 = vpack.c.bf16 %v1976_v48, %v1976_v48 }
 0xb82   : > { %4598 = vmatprep.mubr.msk.bf16.mxu1 %vm1438_vm7, %v1977_v49 }
 0xb83   : > { %4599 = vmatmul.mubr.msk.bf16.vlgmr.msra.gmra.mrb[12].mxu1 %vm1438_vm7, %v1978_v50 }
 0xb84   : > { %4606 = vmatprep.mubr.msk.bf16.mxu1 %vm1374_vm4, %v5552_v62 }
 0xb85   : > { %4603 = vmatpush3.bf16.xpose.msra.mxu1 %v2113_v51 }
 0xb86   : > { %4719 = vmatprep.subr.msk.bf16.mxu1 %vm1374_vm4, %v2105_v56 }
 0xb8d   : > { %4605 = vmatpush3.bf16.xpose.msra.mxu1 %v2116_v57 }
 0xb94   : > { %4607 = vmatmul.mubr.msk.bf16.vlgmr.msra.gmra.mrb[16].mxu1 %vm1374_vm4, %v5664_v30 }
 0xc56   : > { %v5679_v60 = vpop.f32.mrb[12].mxu1 }
 0xc57   : > { %v5681_v0 = vpop.f32.mrb[13].mxu1 }
 0xc58   : > { %v4601_v1 = vpop.f32.mrb[14].mxu1 }
 0xc59   : > { %v5683_v2 = vpop.f32.mrb[15].mxu1 }
 0xc5a   : > { %v4785_v4 = vpack.i.bf16 %v5683_v2, %v5681_v0 }
 0xc67   : > { %v4608_v3 = vpop.f32.mrb[16].mxu1 }
 0xc68   : > { %v2152_v5 = vpop.f32.mrb[17].mxu1  ;;  %v2168_v9 = vmul.f32 0.25, %v4608_v3 }
 0xc69   : > { %v2166_v6 = vmul.f32 0.25, %v2152_v5  ;;  %v4609_v7 = vpop.f32.mrb[18].mxu1 }
 0xc6a   : > { %v2155_v8 = vpop.f32.mrb[19].mxu1  ;;  %v2175_v16 = vsel %vm1445_vm8, %v2168_v9, -inf }
 0xc6b   : > { %v2167_v10 = vmul.f32 0.25, %v2155_v8  ;;  %v2169_v13 = vsel %vm1438_vm7, %v2166_v6, -inf }
 0xc6c   : > { %2170 = vmax.xlane.f32.xlu0 %v2169_v13 }
 0xc6d   : > { %v2172_v15 = vsel %vm1438_vm7, %v2167_v10, -inf }
 0xc6e   : > { %2173 = vmax.xlane.f32.xlu1 %v2172_v15 }
 0xc70   : > { %2176 = vmax.xlane.f32.xlu0 %v2175_v16 }
 0xcf9   : > { %v2171_v18 = vpop.xlane.xlu0 %2170 }
 0xcfa   : > { %v2178_v19 = vsub.f32 %v2166_v6, %v2171_v18 }
 0xcfb   : > { %v2174_v20 = vpop.xlane.xlu1 %2173 }
 0xcfc   : > { %v2181_v21 = vmul.f32 1.442695, %v2178_v19  ;;  %v2179_v22 = vsub.f32 %v2167_v10, %v2174_v20 }
 0xcfd   : > { %v2177_v23 = vpop.xlane.xlu0 %2176 }
 0xcfe   : > { %4907 = vpow2.f32 %v2181_v21  ;;  %v2183_v25 = vmul.f32 1.442695, %v2179_v22  ;;  %v2180_v36 = vsub.f32 %v2168_v9, %v2177_v23 }
 0xd00   : > { %4909 = vpow2.f32 %v2183_v25  ;;  %v2185_v24 = vmul.f32 1.442695, %v2180_v36 }
 0xd02   : > { %4911 = vpow2.f32 %v2185_v24 }
 0xd08   : > { %v4908_v28 = vpop.eup %4907 }
 0xd09   : > { %v2187_v29 = vsel %vm1438_vm7, %v4908_v28, 0.0 }
 0xd0a   : > { %v4910_v31 = vpop.eup %4909  ;;  %2188 = vadd.xlane.f32.xlu0 %v2187_v29 }
 0xd0b   : > { %v2190_v34 = vsel %vm1438_vm7, %v4910_v31, 0.0 }
 0xd0c   : > { %v4912_v32 = vpop.eup %4911 }
 0xd0d   : > { %v2193_v33 = vsel %vm1445_vm8, %v4912_v32, 0.0 }
 0xd0e   : > { %2194 = vadd.xlane.f32.xlu1 %v2193_v33  ;;  %2191 = vadd.xlane.f32.xlu0 %v2190_v34 }
 0xd1f   : > { %2281 = vrot.lane.b32.xlu1 %v5664_v30, %s5112_s23 }
 0xd23   : > { %2275 = vrot.lane.b32.xlu1 %v5552_v62, %s5111_s21 }
 0xd24   : > { %2279 = vrot.lane.b32.xlu0 %v5552_v62, %s5112_s23 }
 0xd27   : > { %2277 = vrot.lane.b32.xlu1 %v5664_v30, %s5111_s21 }
 0xd97   : > { %v2189_v38 = vpop.xlane.xlu0 %2188 }
 0xd98   : > { %4913 = vrcp.f32 %v2189_v38 }
 0xd9b   : > { %v2192_v35 = vpop.xlane.xlu0 %2191  ;;  %v2195_v27 = vpop.xlane.xlu1 %2194 }
 0xd9c   : > { %4915 = vrcp.f32 %v2192_v35 }
 0xd9d   : > { %4917 = vrcp.f32 %v2195_v27 }
 0xd9f   : > { %v2280_v41 = vpop.permute.xlu0 %2279  ;;  %v2282_v53 = vpop.permute.xlu1 %2281 }
 0xda0   : > { %4720 = vmatprep.subr.msk.bf16.mxu0 %vm1374_vm4, %v2280_v41  ;;  %v2290_v57 = vsel %vm1374_vm4, %v2280_v41, 0  ;;  %v2293_v3 = vsel %vm1374_vm4, %v2282_v53, 0 }
 0xda2   : > { %v4914_v55 = vpop.eup %4913 }
 0xda3   : > { %v2199_v48 = vmul.f32 %v4914_v55, %v4908_v28  ;;  %v2276_v1 = vpop.permute.xlu1 %2275 }
 0xda6   : > { %v4916_v17 = vpop.eup %4915 }
 0xda7   : > { %v4918_v45 = vpop.eup %4917  ;;  %v2200_v49 = vmul.f32 %v4916_v17, %v4910_v31  ;;  %v2278_v5 = vpop.permute.xlu1 %2277 }
 0xda8   : > { %v2201_v50 = vmul.f32 %v4918_v45, %v4912_v32 }
 0xda9   : > { %v2202_v51 = vpack.c.bf16 %v2200_v49, %v2199_v48 }
 0xdaa   : > { %v2203_v56 = vpack.c.bf16 %v2201_v50, %v2201_v50 }
 0xdab   : > { %4614 = vmatprep.mubr.msk.bf16.mxu0 %vm1438_vm7, %v2202_v51 }
 0xdac   : > { %4615 = vmatmul.mubr.msk.bf16.vlgmr.msra.gmra.mrb[28].mxu0 %vm1438_vm7, %v2203_v56 }
 0xdad   : > { %4619 = vmatpush3.bf16.xpose.msra.mxu0 %v2290_v57  ;;  %4622 = vmatprep.mubr.msk.bf16.mxu0 %vm1374_vm4, %v2276_v1 }
 0xdae   : > { %4721 = vmatprep.subr.msk.bf16.mxu0 %vm1374_vm4, %v2282_v53 }
 0xdb5   : > { %4621 = vmatpush3.bf16.xpose.msra.mxu0 %v2293_v3 }
 0xdbc   : > { %4623 = vmatmul.mubr.msk.bf16.vlgmr.msra.gmra.mrb[32].mxu0 %vm1374_vm4, %v2278_v5 }
 0xe7f   : > { %v5709_v6 = vpop.f32.mrb[28].mxu0 }
 0xe80   : > { %v5711_v7 = vpop.f32.mrb[29].mxu0 }
 0xe81   : > { %v4617_v8 = vpop.f32.mrb[30].mxu0 }
 0xe82   : > { %v5713_v9 = vpop.f32.mrb[31].mxu0 }
 0xe8f   : > { %v4624_v10 = vpop.f32.mrb[32].mxu0 }
 0xe90   : > { %v2329_v13 = vpop.f32.mrb[33].mxu0  ;;  %v2345_v19 = vmul.f32 0.25, %v4624_v10 }
 0xe91   : > { %v2343_v15 = vmul.f32 0.25, %v2329_v13  ;;  %v4625_v16 = vpop.f32.mrb[34].mxu0 }
 0xe92   : > { %v2332_v18 = vpop.f32.mrb[35].mxu0  ;;  %v2352_v23 = vsel %vm1445_vm8, %v2345_v19, -inf }
 0xe93   : > { %v2344_v20 = vmul.f32 0.25, %v2332_v18  ;;  %v2346_v21 = vsel %vm1438_vm7, %v2343_v15, -inf }
 0xe94   : > { %2347 = vmax.xlane.f32.xlu0 %v2346_v21 }
 0xe95   : > { %v2349_v22 = vsel %vm1438_vm7, %v2344_v20, -inf }
 0xe96   : > { %2350 = vmax.xlane.f32.xlu1 %v2349_v22 }
 0xe98   : > { %2353 = vmax.xlane.f32.xlu0 %v2352_v23 }
 0xf21   : > { %v2348_v25 = vpop.xlane.xlu0 %2347 }
 0xf22   : > { %v2355_v36 = vsub.f32 %v2343_v15, %v2348_v25 }
 0xf23   : > { %v2351_v24 = vpop.xlane.xlu1 %2350 }
 0xf24   : > { %v2358_v28 = vmul.f32 1.442695, %v2355_v36  ;;  %v2356_v29 = vsub.f32 %v2344_v20, %v2351_v24 }
 0xf25   : > { %v2354_v31 = vpop.xlane.xlu0 %2353 }
 0xf26   : > { %4919 = vpow2.f32 %v2358_v28  ;;  %v2360_v32 = vmul.f32 1.442695, %v2356_v29  ;;  %v2357_v33 = vsub.f32 %v2345_v19, %v2354_v31 }
 0xf28   : > { %4921 = vpow2.f32 %v2360_v32  ;;  %v2362_v34 = vmul.f32 1.442695, %v2357_v33 }
 0xf2a   : > { %4923 = vpow2.f32 %v2362_v34 }
 0xf30   : > { %v4920_v38 = vpop.eup %4919 }
 0xf31   : > { %v2364_v35 = vsel %vm1438_vm7, %v4920_v38, 0.0 }
 0xf32   : > { %v4922_v27 = vpop.eup %4921  ;;  %2365 = vadd.xlane.f32.xlu0 %v2364_v35 }
 0xf33   : > { %v2367_v17 = vsel %vm1438_vm7, %v4922_v27, 0.0 }
 0xf34   : > { %v4924_v41 = vpop.eup %4923 }
 0xf35   : > { %v2370_v55 = vsel %vm1445_vm8, %v4924_v41, 0.0 }
 0xf36   : > { %2371 = vadd.xlane.f32.xlu1 %v2370_v55  ;;  %2368 = vadd.xlane.f32.xlu0 %v2367_v17 }
 0xf47   : > { %2383 = vrot.lane.b32.xlu1 %v5637_v54, %s5111_s21 }
 0xf4b   : > { %2447 = vrot.lane.b32.xlu1 %v5552_v62, %s5113_s1 }
 0xf4c   : > { %2381 = vrot.lane.b32.xlu0 %v5634_v52, %s5111_s21  ;;  %s6265_s21 = sld [smem:[#allocation17_spill]] (!%p4327_p5) }
 0xf4f   : > { %2449 = vrot.lane.b32.xlu1 %v5664_v30, %s5113_s1 }
 0xf50   : > { %2443 = vrot.lane.b32.xlu0 %v5552_v62, %s5114_s30 }
 0xf53   : > { %2445 = vrot.lane.b32.xlu1 %v5664_v30, %s5114_s30 }
 0xfbf   : > { %v2366_v53 = vpop.xlane.xlu0 %2365 }
 0xfc0   : > { %4925 = vrcp.f32 %v2366_v53 }
 0xfc3   : > { %v2369_v45 = vpop.xlane.xlu0 %2368  ;;  %v2372_v48 = vpop.xlane.xlu1 %2371 }
 0xfc4   : > { %4927 = vrcp.f32 %v2369_v45 }
 0xfc5   : > { %4929 = vrcp.f32 %v2372_v48 }
 0xfc7   : > { %v2382_v49 = vpop.permute.xlu0 %2381  ;;  %v2384_v50 = vpop.permute.xlu1 %2383 }
 0xfc8   : > { %v2393_v51 = vand.u32 %v2384_v50, %v5518_v37  ;;  %4626 = vmatprep.subr.bf16.mxu1 %v2382_v49 }
 0xfc9   : > { %4627 = vmatpush3.bf16.msra.mxu1 %v2382_v49 }
 0xfca   : > { %4628 = vmatprep.subr.bf16.mxu1 %v2393_v51  ;;  %v4926_v56 = vpop.eup %4925 }
 0xfcb   : > { %v2448_v57 = vpop.permute.xlu1 %2447  ;;  %v2376_v5 = vmul.f32 %v4926_v56, %v4920_v38  ;;  %v2444_v16 = vpop.permute.xlu0 %2443 }
 0xfcc   : > { %v2458_v18 = vsel %vm1374_vm4, %v2448_v57, 0 }
 0xfcd   : > { %4629 = vmatpush3.bf16.msra.mxu1 %v2393_v51 }
 0xfce   : > { %v4928_v1 = vpop.eup %4927  ;;  %4722 = vmatprep.subr.msk.bf16.mxu1 %vm1374_vm4, %v2448_v57 }
 0xfcf   : > { %v4930_v3 = vpop.eup %4929  ;;  %v2377_v8 = vmul.f32 %v4928_v1, %v4922_v27  ;;  %v2450_v19 = vpop.permute.xlu1 %2449 }
 0xfd0   : > { %v2378_v10 = vmul.f32 %v4930_v3, %v4924_v41  ;;  %v2461_v20 = vsel %vm1374_vm4, %v2450_v19, 0 }
 0xfd1   : > { %v2379_v13 = vpack.c.bf16 %v2377_v8, %v2376_v5 }
 0xfd2   : > { %v2380_v15 = vpack.c.bf16 %v2378_v10, %v2378_v10 }
 0xfd3   : > { %4630 = vmatprep.mubr.msk.bf16.mxu1 %vm1438_vm7, %v2379_v13  ;;  %v2446_v21 = vpop.permute.xlu1 %2445 }
 0xfd4   : > { %4631 = vmatmul.mubr.msk.bf16.vlgmr.msra.gmra.mrb[20].mxu1 %vm1438_vm7, %v2380_v15 }
 0xfd5   : > { %4638 = vmatprep.mubr.msk.bf16.mxu1 %vm1374_vm4, %v2444_v16 }
 0xfd6   : > { %4635 = vmatpush3.bf16.xpose.msra.mxu1 %v2458_v18 }
 0xfd7   : > { %4723 = vmatprep.subr.msk.bf16.mxu1 %vm1374_vm4, %v2450_v19 }
 0xfde   : > { %4637 = vmatpush3.bf16.xpose.msra.mxu1 %v2461_v20 }
 0xfe5   : > { %4639 = vmatmul.mubr.msk.bf16.vlgmr.msra.gmra.mrb[24].mxu1 %vm1374_vm4, %v2446_v21 }
0x10a7   : > { %v5742_v22 = vpop.f32.mrb[20].mxu1 }
0x10a8   : > { %v5744_v23 = vpop.f32.mrb[21].mxu1 }
0x10a9   : > { %v4633_v25 = vpop.f32.mrb[22].mxu1 }
0x10aa   : > { %v5746_v36 = vpop.f32.mrb[23].mxu1 }
0x10ab   : > { %v4790_v24 = vpack.i.bf16 %v5746_v36, %v5744_v23 }
0x10b8   : > { %v4640_v28 = vpop.f32.mrb[24].mxu1 }
0x10b9   : > { %v2497_v29 = vpop.f32.mrb[25].mxu1  ;;  %v2513_v34 = vmul.f32 0.25, %v4640_v28 }
0x10ba   : > { %v2511_v31 = vmul.f32 0.25, %v2497_v29  ;;  %v4641_v32 = vpop.f32.mrb[26].mxu1 }
0x10bb   : > { %v2500_v33 = vpop.f32.mrb[27].mxu1  ;;  %v2520_v41 = vsel %vm1445_vm8, %v2513_v34, -inf }
0x10bc   : > { %v2512_v38 = vmul.f32 0.25, %v2500_v33  ;;  %v2514_v35 = vsel %vm1438_vm7, %v2511_v31, -inf }
0x10bd   : > { %2515 = vmax.xlane.f32.xlu0 %v2514_v35 }
0x10be   : > { %v2517_v27 = vsel %vm1438_vm7, %v2512_v38, -inf }
0x10bf   : > { %2518 = vmax.xlane.f32.xlu1 %v2517_v27 }
0x10c1   : > { %2521 = vmax.xlane.f32.xlu0 %v2520_v41 }
0x114a   : > { %v2516_v55 = vpop.xlane.xlu0 %2515 }
0x114b   : > { %v2523_v17 = vsub.f32 %v2511_v31, %v2516_v55 }
0x114c   : > { %v2519_v53 = vpop.xlane.xlu1 %2518 }
0x114d   : > { %v2526_v45 = vmul.f32 1.442695, %v2523_v17  ;;  %v2524_v48 = vsub.f32 %v2512_v38, %v2519_v53 }
0x114e   : > { %v2522_v49 = vpop.xlane.xlu0 %2521 }
0x114f   : > { %4931 = vpow2.f32 %v2526_v45  ;;  %v2528_v50 = vmul.f32 1.442695, %v2524_v48  ;;  %v2525_v51 = vsub.f32 %v2513_v34, %v2522_v49 }
0x1151   : > { %4933 = vpow2.f32 %v2528_v50  ;;  %v2530_v56 = vmul.f32 1.442695, %v2525_v51 }
0x1153   : > { %4935 = vpow2.f32 %v2530_v56 }
0x1159   : > { %v4932_v57 = vpop.eup %4931 }
0x115a   : > { %v2532_v1 = vsel %vm1438_vm7, %v4932_v57, 0.0 }
0x115b   : > { %v4934_v3 = vpop.eup %4933  ;;  %2533 = vadd.xlane.f32.xlu0 %v2532_v1 }
0x115c   : > { %v2535_v10 = vsel %vm1438_vm7, %v4934_v3, 0.0 }
0x115d   : > { %v4936_v5 = vpop.eup %4935 }
0x115e   : > { %v2538_v8 = vsel %vm1445_vm8, %v4936_v5, 0.0 }
0x115f   : > { %2539 = vadd.xlane.f32.xlu1 %v2538_v8  ;;  %2536 = vadd.xlane.f32.xlu0 %v2535_v10 }
0x1170   : > { %2551 = vrot.lane.b32.xlu1 %v5637_v54, %s5114_s30 }
0x1174   : > { %2615 = vrot.lane.b32.xlu1 %v5552_v62, %s5115_s8 }
0x1175   : > { %2549 = vrot.lane.b32.xlu0 %v5634_v52, %s5114_s30  ;;  %s6266_s30 = sld [smem:[#allocation18_spill]] (!%p4327_p5) }
0x1178   : > { %2617 = vrot.lane.b32.xlu1 %v5664_v30, %s5115_s8 }
0x1179   : > { %2611 = vrot.lane.b32.xlu0 %v5552_v62, %s5116_s25 }
0x117c   : > { %2613 = vrot.lane.b32.xlu1 %v5664_v30, %s5116_s25 }
0x11e8   : > { %v2534_v13 = vpop.xlane.xlu0 %2533 }
0x11e9   : > { %4937 = vrcp.f32 %v2534_v13 }
0x11ec   : > { %v2537_v15 = vpop.xlane.xlu0 %2536  ;;  %v2540_v16 = vpop.xlane.xlu1 %2539 }
0x11ed   : > { %4939 = vrcp.f32 %v2537_v15 }
0x11ee   : > { %4941 = vrcp.f32 %v2540_v16 }
0x11f0   : > { %v2550_v18 = vpop.permute.xlu0 %2549  ;;  %v2552_v19 = vpop.permute.xlu1 %2551 }
0x11f1   : > { %v2561_v20 = vand.u32 %v2552_v19, %v5518_v37  ;;  %4642 = vmatprep.subr.bf16.mxu0 %v2550_v18 }
0x11f2   : > { %4643 = vmatpush3.bf16.msra.mxu0 %v2550_v18 }
0x11f3   : > { %4644 = vmatprep.subr.bf16.mxu0 %v2561_v20  ;;  %v4938_v21 = vpop.eup %4937 }
0x11f4   : > { %v2616_v25 = vpop.permute.xlu1 %2615  ;;  %v2544_v28 = vmul.f32 %v4938_v21, %v4932_v57  ;;  %v2612_v34 = vpop.permute.xlu0 %2611 }
0x11f5   : > { %v2626_v38 = vsel %vm1374_vm4, %v2616_v25, 0 }
0x11f6   : > { %4645 = vmatpush3.bf16.msra.mxu0 %v2561_v20 }
0x11f7   : > { %v4940_v62 = vpop.eup %4939  ;;  %4724 = vmatprep.subr.msk.bf16.mxu0 %vm1374_vm4, %v2616_v25 }
0x11f8   : > { %v4942_v30 = vpop.eup %4941  ;;  %v2545_v29 = vmul.f32 %v4940_v62, %v4934_v3  ;;  %v2618_v35 = vpop.permute.xlu1 %2617 }
0x11f9   : > { %v2546_v31 = vmul.f32 %v4942_v30, %v4936_v5  ;;  %v2629_v27 = vsel %vm1374_vm4, %v2618_v35, 0 }
0x11fa   : > { %v2547_v32 = vpack.c.bf16 %v2545_v29, %v2544_v28 }
0x11fb   : > { %v2548_v33 = vpack.c.bf16 %v2546_v31, %v2546_v31 }
0x11fc   : > { %4646 = vmatprep.mubr.msk.bf16.mxu0 %vm1438_vm7, %v2547_v32  ;;  %v2614_v41 = vpop.permute.xlu1 %2613 }
0x11fd   : > { %4647 = vmatmul.mubr.msk.bf16.vlgmr.msra.gmra.mrb[36].mxu0 %vm1438_vm7, %v2548_v33 }
0x11fe   : > { %4654 = vmatprep.mubr.msk.bf16.mxu0 %vm1374_vm4, %v2612_v34 }
0x11ff   : > { %4651 = vmatpush3.bf16.xpose.msra.mxu0 %v2626_v38 }
0x1200   : > { %4725 = vmatprep.subr.msk.bf16.mxu0 %vm1374_vm4, %v2618_v35 }
0x1207   : > { %4653 = vmatpush3.bf16.xpose.msra.mxu0 %v2629_v27 }
0x120e   : > { %4655 = vmatmul.mubr.msk.bf16.vlgmr.msra.gmra.mrb[40].mxu0 %vm1374_vm4, %v2614_v41 }
0x120f   : > { %3141 = vmatprep.mubr.bf16.mxu0 %v5109_v26 }
0x12d0   : > { %v5778_v55 = vpop.f32.mrb[36].mxu0 }
0x12d1   : > { %v2597_v17 = vpop.f32.mrb[37].mxu0 }
0x12d2   : > { %v4649_v53 = vpop.f32.mrb[38].mxu0 }
0x12d3   : > { %v2600_v45 = vpop.f32.mrb[39].mxu0 }
0x12d4   : > { %v4795_v48 = vpack.i.bf16 %v2600_v45, %v2597_v17  ;;  %v4817_v17 = vld [vmem:[%s5278_s5] sm:$0xff]  }
0x12e1   : > { %v4656_v49 = vpop.f32.mrb[40].mxu0 }
0x12e2   : > { %v2665_v50 = vpop.f32.mrb[41].mxu0  ;;  %v2681_v1 = vmul.f32 0.25, %v4656_v49 }
0x12e3   : > { %v2679_v51 = vmul.f32 0.25, %v2665_v50  ;;  %v4657_v56 = vpop.f32.mrb[42].mxu0 }
0x12e4   : > { %v2668_v57 = vpop.f32.mrb[43].mxu0  ;;  %v2688_v10 = vsel %vm1445_vm8, %v2681_v1, -inf }
0x12e5   : > { %v2680_v3 = vmul.f32 0.25, %v2668_v57  ;;  %v2682_v5 = vsel %vm1438_vm7, %v2679_v51, -inf  ;;  %v4818_v57 = vld [vmem:[%s5278_s5 + $0x8] sm:$0xff]  }
0x12e6   : > { %2683 = vmax.xlane.f32.xlu0 %v2682_v5 }
0x12e7   : > { %v2685_v8 = vsel %vm1438_vm7, %v2680_v3, -inf }
0x12e8   : > { %2686 = vmax.xlane.f32.xlu1 %v2685_v8 }
0x12ea   : > { %2689 = vmax.xlane.f32.xlu0 %v2688_v10 }
0x1373   : > { %v2684_v13 = vpop.xlane.xlu0 %2683 }
0x1374   : > { %v2691_v15 = vsub.f32 %v2679_v51, %v2684_v13 }
0x1375   : > { %v2687_v16 = vpop.xlane.xlu1 %2686 }
0x1376   : > { %v2694_v18 = vmul.f32 1.442695, %v2691_v15  ;;  %v2692_v19 = vsub.f32 %v2680_v3, %v2687_v16 }
0x1377   : > { %v2690_v20 = vpop.xlane.xlu0 %2689 }
0x1378   : > { %4943 = vpow2.f32 %v2694_v18  ;;  %v2696_v21 = vmul.f32 1.442695, %v2692_v19  ;;  %v2693_v25 = vsub.f32 %v2681_v1, %v2690_v20  ;;  %v4820_v1 = vld [vmem:[%s5278_s5 + $0x18] sm:$0xff]   ;;  %v5848_v20 = vld [vmem:[%s6261_s4] ss:$0 sm:$0xff] }
0x137a   : > { %4945 = vpow2.f32 %v2696_v21  ;;  %v2698_v62 = vmul.f32 1.442695, %v2693_v25  ;;  %v5005_v25 = vld [vmem:[#allocation2 + $0x8] sm:$0xff] }
0x137c   : > { %4947 = vpow2.f32 %v2698_v62 }
0x1382   : > { %v4944_v30 = vpop.eup %4943 }
0x1383   : > { %v2700_v28 = vsel %vm1438_vm7, %v4944_v30, 0.0 }
0x1384   : > { %v4946_v29 = vpop.eup %4945  ;;  %2701 = vadd.xlane.f32.xlu0 %v2700_v28 }
0x1385   : > { %v2703_v33 = vsel %vm1438_vm7, %v4946_v29, 0.0 }
0x1386   : > { %v4948_v31 = vpop.eup %4947 }
0x1387   : > { %v2706_v32 = vsel %vm1445_vm8, %v4948_v31, 0.0 }
0x1388   : > { %2707 = vadd.xlane.f32.xlu1 %v2706_v32  ;;  %2704 = vadd.xlane.f32.xlu0 %v2703_v33 }
0x1399   : > { %2719 = vrot.lane.b32.xlu1 %v5637_v54, %s5116_s25 }
0x139d   : > { %4776 = vrot.lane.b32.xlu1 %v4775_v47, %s5115_s8 }
0x139e   : > { %2717 = vrot.lane.b32.xlu0 %v5634_v52, %s5116_s25 }
0x13a1   : > { %4781 = vrot.lane.b32.xlu1 %v4780_v63, %s5113_s1 }
0x13a2   : > { %4786 = vrot.lane.b32.xlu0 %v4785_v4, %s5112_s23  ;;  %v5117_v4 = vmov 0.0  }
0x13a5   : > { %4791 = vrot.lane.b32.xlu1 %v4790_v24, %s5115_s8 }
0x13a6   : > { %4796 = vrot.lane.b32.xlu0 %v4795_v48, %s5113_s1 }
0x13a9   : > { %2048 = vrot.lane.b32.xlu1 %v5595_v43, %s5115_s8 }
0x13ad   : > { %2060 = vrot.lane.b32.xlu1 %v5643_v58, %s5113_s1 }
0x13b1   : > { %2786 = vrot.lane.b32.xlu1 %v5742_v22, %s5115_s8 }
0x1411   : > { %v2702_v44 = vpop.xlane.xlu0 %2701 }
0x1412   : > { %4949 = vrcp.f32 %v2702_v44 }
0x1415   : > { %v2705_v46 = vpop.xlane.xlu0 %2704  ;;  %v2708_v47 = vpop.xlane.xlu1 %2707 }
0x1416   : > { %4951 = vrcp.f32 %v2705_v46 }
0x1417   : > { %4953 = vrcp.f32 %v2708_v47 }
0x1419   : > { %v2718_v52 = vpop.permute.xlu0 %2717  ;;  %v2720_v54 = vpop.permute.xlu1 %2719 }
0x141a   : > { %v2729_v59 = vand.u32 %v2720_v54, %v5518_v37  ;;  %4658 = vmatprep.subr.bf16.mxu1 %v2718_v52 }
0x141b   : > { %4659 = vmatpush3.bf16.msra.mxu1 %v2718_v52 }
0x141c   : > { %4660 = vmatprep.subr.bf16.mxu1 %v2729_v59  ;;  %v4950_v61 = vpop.eup %4949 }
0x141d   : > { %v4777_v43 = vpop.permute.xlu1 %4776  ;;  %v4787_v0 = vpop.permute.xlu0 %4786  ;;  %v2712_v36 = vmul.f32 %v4950_v61, %v4944_v30  ;;  %v5006_v30 = vld [vmem:[#allocation2] sm:$0xff] }
0x141e   : > { %v4779_v63 = vunpack.i.h.bf16 %v4777_v43  ;;  %v4778_v2 = vunpack.i.l.bf16 %v4777_v43  ;;  %v4789_v38 = vunpack.i.h.bf16 %v4787_v0  ;;  %v4788_v53 = vunpack.i.l.bf16 %v4787_v0 }
0x141f   : > { %4661 = vmatpush3.bf16.msra.mxu1 %v2729_v59 }
0x1420   : > { %v4952_v58 = vpop.eup %4951  ;;  %4666 = vmatprep.subr.bf16.mxu1 %v5117_v4  ;;  %v2078_v35 = vsel %vm1374_vm4, %v5593_v42, %v4779_v63  ;;  %v2077_v45 = vsel %vm1374_vm4, %v5591_v40, %v4778_v2  ;;  %v4819_v40 = vld [vmem:[%s5278_s5 + $0x10] sm:$0xff]  }
0x1421   : > { %v4954_v22 = vpop.eup %4953  ;;  %v4782_v23 = vpop.permute.xlu1 %4781  ;;  %v2713_v24 = vmul.f32 %v4952_v58, %v4946_v29 }
0x1422   : > { %v2714_v37 = vmul.f32 %v4954_v22, %v4948_v31  ;;  %v4784_v34 = vunpack.i.h.bf16 %v4782_v23  ;;  %v4783_v27 = vunpack.i.l.bf16 %v4782_v23  ;;  %v4797_v46 = vpop.permute.xlu0 %4796 }
0x1423   : > { %v2715_v41 = vpack.c.bf16 %v2713_v24, %v2712_v36  ;;  %v4799_v59 = vunpack.i.h.bf16 %v4797_v46  ;;  %v4798_v43 = vunpack.i.l.bf16 %v4797_v46 }
0x1424   : > { %v2082_v48 = vsel %vm2080_vm9, %v2078_v35, %v4784_v34  ;;  %v2716_v49 = vpack.c.bf16 %v2714_v37, %v2714_v37  ;;  %v2081_v50 = vsel %vm2080_vm9, %v2077_v45, %v4783_v27 }
0x1425   : > { %v2086_v51 = vsel %vm2084_vm10, %v2082_v48, %v4789_v38  ;;  %4662 = vmatprep.mubr.msk.bf16.mxu1 %vm1438_vm7, %v2715_v41  ;;  %v2085_v42 = vsel %vm2084_vm10, %v2081_v50, %v4788_v53  ;;  %v4792_v31 = vpop.permute.xlu1 %4791 }
0x1426   : > { %4663 = vmatmul.mubr.msk.bf16.vlgmr.msra.gmra.mrb[28].mxu1 %vm1438_vm7, %v2716_v49  ;;  %v2844_v56 = vpack.c.bf16 %v2086_v51, %v2085_v42  ;;  %v4794_v33 = vunpack.i.h.bf16 %v4792_v31  ;;  %v4793_v44 = vunpack.i.l.bf16 %v4792_v31 }
0x1427   : > { %4667 = vmatpush3.bf16.msra.mxu1 %v4817_v17  ;;  %4674 = vmatprep.mubr.msk.bf16.mxu1 %vm5118_vm11, %v5117_v4 }
0x1428   : > { %4668 = vmatprep.subr.bf16.mxu1 %v5117_v4  ;;  %v2816_v47 = vsel %vm1374_vm4, %v5713_v9, %v4794_v33  ;;  %v2815_v52 = vsel %vm1374_vm4, %v5711_v7, %v4793_v44  ;;  %v5009_v33 = vld [vmem:[#allocation2 + $0x20] sm:$0x3] }
0x1429   : > { %v2049_v32 = vpop.permute.xlu1 %2048  ;;  %v2818_v0 = vsel %vm2080_vm9, %v2815_v52, %v4798_v43  ;;  %v2819_v2 = vsel %vm2080_vm9, %v2816_v47, %v4799_v59  ;;  %v4821_v59 = vld [vmem:[%s5291_s17] ss:$8 sps:$4 sm:$0xff]   ;;  %v4826_v43 = vld [vmem:[%s5291_s17 + $0x14] ss:$8 sps:$4 sm:$0xff]  }
0x142a   : > { %v2079_v22 = vsel %vm1374_vm4, %v5589_v39, %v2049_v32 }
0x142b   : > { %4669 = vmatpush3.bf16.msra.mxu1 %v4818_v57 }
0x142c   : > { %4670 = vmatprep.subr.bf16.mxu1 %v5117_v4 }
0x142d   : > { %v2061_v54 = vpop.permute.xlu1 %2060 }
0x142e   : > { %v2083_v36 = vsel %vm2080_vm9, %v2079_v22, %v2061_v54  ;;  %v4823_v54 = vld [vmem:[%s5291_s17 + $0x4] ss:$8 sps:$4 sm:$0xff]  }
0x142f   : > { %4671 = vmatpush3.bf16.msra.mxu1 %v4819_v40  ;;  %3109 = vmatprep.subr.bf16.mxu0 %v4823_v54  ;;  %v4846_v54 = vld [vmem:[%s5302_s6 + $0x30] sm:$0xff]  }
0x1430   : > { %4672 = vmatprep.subr.bf16.mxu1 %v5117_v4  ;;  %3110 = vmatpush1.bf16.msra.mxu0 %v4821_v59 }
0x1431   : > { %v2787_v34 = vpop.permute.xlu1 %2786  ;;  %3111 = vmatprep.subr.bf16.mxu0 %v4826_v43 }
0x1432   : > { %v2817_v39 = vsel %vm1374_vm4, %v5709_v6, %v2787_v34 }
0x1433   : > { %4673 = vmatpush3.bf16.msra.mxu1 %v4820_v1 }
0x1436   : > { %4675 = vmatmul.mubr.msk.bf16.vlgmr.msra.gmra.mrb[32].mxu1 %vm1139_vm2, %v2844_v56 }
0x1437   : > { %4678 = vmatprep.mubr.msk.bf16.mxu1 %vm5118_vm11, %v5117_v4 }
0x14f9   : > { %v4664_v3 = vpop.f32.mrb[28].mxu1 }
0x14fa   : > { %2810 = vrot.lane.b32.xlu1 %v4664_v3, %s5112_s23  ;;  %v2765_v5 = vpop.f32.mrb[29].mxu1 }
0x14fb   : > { %v4665_v8 = vpop.f32.mrb[30].mxu1 }
0x14fc   : > { %v2768_v10 = vpop.f32.mrb[31].mxu1 }
0x14fd   : > { %v4800_v13 = vpack.i.bf16 %v2768_v10, %v2765_v5  ;;  %v5007_v10 = vld [vmem:[#allocation2 + $0x10] sm:$0xff] }
0x14ff   : > { %4801 = vrot.lane.b32.xlu0 %v4800_v13, %s5112_s23 }
0x1503   : > { %2072 = vrot.lane.b32.xlu0 %v5679_v60, %s5112_s23 }
0x1507   : > { %2798 = vrot.lane.b32.xlu0 %v5778_v55, %s5113_s1 }
0x1509   : > { %v2921_v15 = vpop.f32.mrb[32].mxu1 }
0x150a   : > { %v4676_v16 = vpop.f32.mrb[33].mxu1  ;;  %v2922_v60 = vadd.f32 %v5848_v20, %v2921_v15 }
0x150b   : > { %v2924_v18 = vpop.f32.mrb[34].mxu1 }
0x150c   : > { %v4677_v19 = vpop.f32.mrb[35].mxu1  ;;  %v2925_v21 = vadd.f32 %v5848_v20, %v2924_v18  ;;  %v5856_v28 = vadd.f32 %v5006_v30, %v2922_v60 }
0x150d   : > { %v5008_v19 = vld [vmem:[#allocation2 + $0x18] sm:$0xff] }
0x150e   : > { %v5851_v62 = vadd.f32 %v5005_v25, %v2925_v21  ;;  %v2950_v29 = vsel %vm1139_vm2, %v5856_v28, 0.0 }
0x1510   : > { %v2953_v55 = vsel %vm1139_vm2, %v5851_v62, 0.0 }
0x151e   : > { %2954 = vadd.xlane.f32.xlu1 %v2953_v55 }
0x1526   : > { %2951 = vadd.xlane.f32.xlu0 %v2950_v29 }
0x156c   : > { %v2811_v53 = vpop.permute.xlu1 %2810 }
0x1571   : > { %v4802_v61 = vpop.permute.xlu0 %4801 }
0x1572   : > { %v4804_v63 = vunpack.i.h.bf16 %v4802_v61  ;;  %v4803_v58 = vunpack.i.l.bf16 %v4802_v61  ;;  %v4824_v61 = vld [vmem:[%s5291_s17 + $0x10] ss:$8 sps:$4 sm:$0xff]  }
0x1573   : > { %3112 = vmatpush1.bf16.msra.mxu0 %v4824_v61  ;;  %v4847_v61 = vld [vmem:[%s5302_s6 + $0x78] sm:$0xff]  }
0x1574   : > { %v2821_v23 = vsel %vm2084_vm10, %v2818_v0, %v4803_v58  ;;  %v2822_v9 = vsel %vm2084_vm10, %v2819_v2, %v4804_v63  ;;  %v4829_v63 = vld [vmem:[%s5291_s17 + $0x24] ss:$8 sps:$4 sm:$0xff]   ;;  %v4827_v58 = vld [vmem:[%s5291_s17 + $0x20] ss:$8 sps:$4 sm:$0xff]   ;;  %v4830_v0 = vld [vmem:[%s5291_s17 + $0x30] ss:$8 sps:$4 sm:$0xff]  }
0x1575   : > { %v2827_v7 = vrot.slane %v2821_v23, 7  ;;  %v2828_v24 = vrot.slane %v2822_v9, 7  ;;  %v2073_v37 = vpop.permute.xlu0 %2072  ;;  %3113 = vmatprep.subr.bf16.mxu0 %v4829_v63  ;;  %v4832_v2 = vld [vmem:[%s5291_s17 + $0x34] ss:$8 sps:$4 sm:$0xff]  }
0x1576   : > { %v2087_v38 = vsel %vm2084_vm10, %v2083_v36, %v2073_v37 }
0x1577   : > { %v2829_v35 = vsel %vm1481_vm5, %v2827_v7, %v2828_v24  ;;  %v2835_v27 = vsel %vm1481_vm5, %v2087_v38, %v2827_v7  ;;  %3114 = vmatpush1.bf16.msra.mxu0 %v4827_v58  ;;  %v4848_v58 = vld [vmem:[%s5302_s6 + $0x38] sm:$0xff]  }
0x1578   : > { %v2845_v41 = vpack.c.bf16 %v2829_v35, %v2835_v27  ;;  %3115 = vmatprep.subr.bf16.mxu0 %v4832_v2 }
0x1579   : > { %v2799_v17 = vpop.permute.xlu0 %2798 }
0x157a   : > { %v2820_v45 = vsel %vm2080_vm9, %v2817_v39, %v2799_v17  ;;  %4679 = vmatmul.mubr.msk.bf16.gmra.mrb[36].mxu1 %vm1139_vm2, %v2845_v41 }
0x157b   : > { %v2823_v48 = vsel %vm2084_vm10, %v2820_v45, %v2811_v53  ;;  %4682 = vmatprep.mubr.msk.bf16.mxu1 %vm5118_vm11, %v5117_v4  ;;  %3116 = vmatpush1.bf16.msra.mxu0 %v4830_v0 }
0x157c   : > { %v2830_v49 = vrot.slane %v2823_v48, 7 }
0x157e   : > { %v2831_v50 = vsel %vm1481_vm5, %v2828_v24, %v2830_v49 }
0x157f   : > { %v2846_v51 = vpack.c.bf16 %v2831_v50, %v2831_v50 }
0x1582   : > { %4683 = vmatmul.mubr.msk.bf16.gmra.mrb[40].mxu1 %vm1139_vm2, %v2846_v51 }
0x15ab   : > { %v2955_v5 = vpop.xlane.xlu1 %2954 }
0x15ac   : > { %v2966_v18 = vmul.f32 0.015625, %v2955_v5  ;;  %v5946_v5 = vld [vmem:[%s830_s3] ss:$0 sm:$0xff]  ;;  %s6264_s3 = sld [smem:[#allocation16_spill]] (!%p4327_p5) }
0x15ae   : > { %v2971_v55 = vsub.f32 %v5851_v62, %v2966_v18  ;;  %v4834_v18 = vld [vmem:[%s5302_s6] sm:$0xff]  }
0x15b0   : > { %v2976_v52 = vmul.f32 %v2971_v55, %v2971_v55 }
0x15b3   : > { %v2952_v42 = vpop.xlane.xlu0 %2951 }
0x15b4   : > { %v2965_v56 = vmul.f32 0.015625, %v2952_v42 }
0x15b6   : > { %v5884_v6 = vsub.f32 %v5856_v28, %v2965_v56 }
0x15b8   : > { %v2975_v57 = vmul.f32 %v5884_v6, %v5884_v6 }
0x15ba   : > { %v2980_v40 = vsel %vm1139_vm2, %v2975_v57, 0.0 }
0x15bb   : > { %2981 = vadd.xlane.f32.xlu1 %v2980_v40  ;;  %v5938_v40 = vld [vmem:[%s6262_s2] ss:$0 sm:$0xff] }
0x1648   : > { %v2982_v22 = vpop.xlane.xlu1 %2981 }
0x1649   : > { %v2995_v36 = vmul.f32 0.015625, %v2982_v22 }
0x164b   : > { %v3000_v38 = vadd.f32 1e-05, %v2995_v36 }
0x164d   : > { %v2929_v1 = vpop.f32.mrb[36].mxu1  ;;  %4955 = vrsqrt.f32 %v3000_v38 }
0x164e   : > { %v2930_v4 = vadd.f32 %v5848_v20, %v2929_v1  ;;  %v4680_v3 = vpop.f32.mrb[37].mxu1 }
0x164f   : > { %v2932_v8 = vpop.f32.mrb[38].mxu1 }
0x1650   : > { %v5890_v13 = vadd.f32 %v5007_v10, %v2930_v4  ;;  %v2933_v15 = vadd.f32 %v5848_v20, %v2932_v8  ;;  %v4681_v16 = vpop.f32.mrb[39].mxu1 }
0x1651   : > { %v4833_v16 = vld [vmem:[%s5302_s6 + $0x40] sm:$0xff]  }
0x1652   : > { %v5893_v21 = vadd.f32 %v5008_v19, %v2933_v15  ;;  %v2956_v25 = vsel %vm1139_vm2, %v5890_v13, 0.0  ;;  %4460 = vmatprep.subr.bf16.mxu1 %v4833_v16  ;;  %v4835_v19 = vld [vmem:[%s5302_s6 + $0x48] sm:$0xff]  }
0x1653   : > { %2957 = vadd.xlane.f32.xlu0 %v2956_v25  ;;  %4461 = vmatpush3.bf16.msra.mxu1 %v4834_v18  ;;  %v4836_v25 = vld [vmem:[%s5302_s6 + $0x8] sm:$0xff]  }
0x1654   : > { %v2959_v31 = vsel %vm1139_vm2, %v5893_v21, 0.0  ;;  %4462 = vmatprep.subr.bf16.mxu1 %v4835_v19 }
0x1655   : > { %v2937_v60 = vpop.f32.mrb[40].mxu1 }
0x1656   : > { %v2938_v30 = vadd.f32 %v5848_v20, %v2937_v60  ;;  %v4684_v29 = vpop.f32.mrb[41].mxu1  ;;  %v2983_v20 = vsel %vm1139_vm2, %v2976_v52, 0.0  ;;  %v4837_v60 = vld [vmem:[%s5302_s6 + $0x50] sm:$0xff]  }
0x1657   : > { %2960 = vadd.xlane.f32.xlu0 %v2959_v31  ;;  %v2940_v32 = vpop.f32.mrb[42].mxu1  ;;  %v4956_v56 = vpop.eup %4955  ;;  %4463 = vmatpush3.bf16.msra.mxu1 %v4836_v25  ;;  %v4840_v29 = vld [vmem:[%s5302_s6 + $0x18] sm:$0xff]   ;;  %v4841_v31 = vld [vmem:[%s5302_s6 + $0x60] sm:$0xff]   ;;  %v4845_v52 = vld [vmem:[%s5302_s6 + $0x70] sm:$0xff]  }
0x1658   : > { %v5901_v44 = vadd.f32 %v5009_v33, %v2938_v30  ;;  %v4685_v46 = vpop.f32.mrb[43].mxu1  ;;  %v3010_v57 = vmul.f32 %v4956_v56, %v5884_v6  ;;  %4464 = vmatprep.subr.bf16.mxu1 %v4837_v60  ;;  %v4839_v30 = vld [vmem:[%s5302_s6 + $0x58] sm:$0xff]   ;;  %v4842_v32 = vld [vmem:[%s5302_s6 + $0x20] sm:$0xff]   ;;  %v4843_v33 = vld [vmem:[%s5302_s6 + $0x68] sm:$0xff]  }
0x1659   : > { %v4844_v46 = vld [vmem:[%s5302_s6 + $0x28] sm:$0xff]  }
0x165a   : > { %v2962_v47 = vsel %vm1152_vm3, %v5901_v44, 0.0  ;;  %v3021_v4 = vmul.f32 %v5938_v40, %v3010_v57 }
0x165b   : > { %2963 = vadd.xlane.f32.xlu0 %v2962_v47 }
0x165c   : > { %v3032_v8 = vadd.f32 %v5946_v5, %v3021_v4 }
0x165f   : > { %2984 = vadd.xlane.f32.xlu0 %v2983_v20 }
0x16e0   : > { %v2958_v23 = vpop.xlane.xlu0 %2957 }
0x16e1   : > { %v2967_v9 = vmul.f32 0.015625, %v2958_v23 }
0x16e3   : > { %v5915_v7 = vsub.f32 %v5890_v13, %v2967_v9 }
0x16e4   : > { %v2961_v24 = vpop.xlane.xlu0 %2960 }
0x16e5   : > { %v2968_v37 = vmul.f32 0.015625, %v2961_v24  ;;  %v2977_v34 = vmul.f32 %v5915_v7, %v5915_v7 }
0x16e7   : > { %v5920_v35 = vsub.f32 %v5893_v21, %v2968_v37  ;;  %v2986_v27 = vsel %vm1139_vm2, %v2977_v34, 0.0 }
0x16e8   : > { %2987 = vadd.xlane.f32.xlu1 %v2986_v27  ;;  %v2964_v41 = vpop.xlane.xlu0 %2963 }
0x16e9   : > { %v2969_v39 = vmul.f32 0.015625, %v2964_v41  ;;  %v2978_v17 = vmul.f32 %v5920_v35, %v5920_v35 }
0x16eb   : > { %v5926_v53 = vsub.f32 %v5901_v44, %v2969_v39  ;;  %v2989_v45 = vsel %vm1139_vm2, %v2978_v17, 0.0 }
0x16ec   : > { %2990 = vadd.xlane.f32.xlu0 %v2989_v45  ;;  %v2985_v48 = vpop.xlane.xlu0 %2984 }
0x16ed   : > { %v2996_v49 = vmul.f32 0.015625, %v2985_v48  ;;  %v2979_v50 = vmul.f32 %v5926_v53, %v5926_v53 }
0x16ef   : > { %v3001_v51 = vadd.f32 1e-05, %v2996_v49  ;;  %v2992_v42 = vsel %vm1152_vm3, %v2979_v50, 0.0  ;;  %v3048_v49 = vld [vmem:[%s5296_s0] sm:$0x3] }
0x16f0   : > { %2993 = vadd.xlane.f32.xlu1 %v2992_v42  ;;  %v5988_v50 = vrot.slane %v3048_v49, %v1248_v14 }
0x16f1   : > { %4957 = vrsqrt.f32 %v3001_v51 }
0x16fb   : > { %v4958_v1 = vpop.eup %4957 }
0x16fc   : > { %v3011_v3 = vmul.f32 %v4958_v1, %v2971_v55  ;;  %v4838_v55 = vld [vmem:[%s5302_s6 + $0x10] sm:$0xff]   ;;  %s6263_s6 = scalar_lea.vmem %s6220_s16, %s5248_s29  ;;  %s6267_s29 = sld [smem:[#allocation19_spill]] (!%p4327_p5) }
0x16fd   : > { %4465 = vmatpush3.bf16.msra.mxu1 %v4838_v55 }
0x16fe   : > { %v3022_v6 = vmul.f32 %v5938_v40, %v3011_v3  ;;  %4466 = vmatprep.subr.bf16.mxu1 %v4839_v30 }
0x1700   : > { %v3033_v10 = vadd.f32 %v5946_v5, %v3022_v6 }
0x1701   : > { %4467 = vmatpush3.bf16.msra.mxu1 %v4840_v29 }
0x1702   : > { %v3045_v15 = vpack.c.bf16 %v3033_v10, %v3032_v8  ;;  %4468 = vmatprep.subr.bf16.mxu1 %v4841_v31 }
0x1704   : > { %4297 = vmatmul.mubr.msk.bf16.vlgmr.msra.gmra.mrb[44].mxu0 %vm1139_vm2, %v3045_v15 }
0x1705   : > { %3151 = vmatprep.mubr.bf16.mxu0 %v5109_v26  ;;  %4469 = vmatpush3.bf16.msra.mxu1 %v4842_v32 }
0x1706   : > { %4470 = vmatprep.subr.bf16.mxu1 %v4843_v33 }
0x1709   : > { %4471 = vmatpush3.bf16.msra.mxu1 %v4844_v46 }
0x170a   : > { %4472 = vmatprep.subr.bf16.mxu1 %v4845_v52 }
0x170d   : > { %4473 = vmatpush3.bf16.msra.mxu1 %v4846_v54 }
0x170e   : > { %4474 = vmatprep.subr.bf16.mxu1 %v4847_v61 }
0x1711   : > { %4475 = vmatpush3.bf16.msra.mxu1 %v4848_v58 }
0x1775   : > { %v2988_v47 = vpop.xlane.xlu1 %2987 }
0x1776   : > { %v2997_v20 = vmul.f32 0.015625, %v2988_v47 }
0x1778   : > { %v3002_v59 = vadd.f32 1e-05, %v2997_v20 }
0x1779   : > { %v2991_v43 = vpop.xlane.xlu0 %2990 }
0x177a   : > { %4959 = vrsqrt.f32 %v3002_v59  ;;  %v2998_v63 = vmul.f32 0.015625, %v2991_v43 }
0x177c   : > { %v3003_v0 = vadd.f32 1e-05, %v2998_v63 }
0x177d   : > { %v2994_v2 = vpop.xlane.xlu1 %2993 }
0x177e   : > { %4961 = vrsqrt.f32 %v3003_v0  ;;  %v2999_v22 = vmul.f32 0.015625, %v2994_v2 }
0x1780   : > { %v3004_v23 = vadd.f32 1e-05, %v2999_v22 }
0x1782   : > { %4963 = vrsqrt.f32 %v3004_v23 }
0x1784   : > { %v4960_v9 = vpop.eup %4959 }
0x1785   : > { %v3012_v36 = vmul.f32 %v4960_v9, %v5915_v7 }
0x1787   : > { %v3023_v34 = vmul.f32 %v5938_v40, %v3012_v36 }
0x1788   : > { %v4962_v24 = vpop.eup %4961 }
0x1789   : > { %v3013_v37 = vmul.f32 %v4962_v24, %v5920_v35  ;;  %v3034_v39 = vadd.f32 %v5946_v5, %v3023_v34 }
0x178b   : > { %v3024_v38 = vmul.f32 %v5938_v40, %v3013_v37 }
0x178c   : > { %v4964_v27 = vpop.eup %4963 }
0x178d   : > { %v3014_v41 = vmul.f32 %v4964_v27, %v5926_v53  ;;  %v3035_v17 = vadd.f32 %v5946_v5, %v3024_v38  ;;  %v5984_v53 = vrot.slane %v3048_v49, %v1244_v12 }
0x178f   : > { %v3046_v45 = vpack.c.bf16 %v3035_v17, %v3034_v39  ;;  %v3025_v48 = vmul.f32 %v5938_v40, %v3014_v41 }
0x1791   : > { %4298 = vmatmul.mubr.msk.bf16.gmra.mrb[48].mxu0 %vm1139_vm2, %v3046_v45  ;;  %v3036_v7 = vadd.f32 %v5946_v5, %v3025_v48 }
0x1792   : > { %3161 = vmatprep.mubr.bf16.mxu0 %v5109_v26 }
0x1793   : > { %v3047_v35 = vpack.c.bf16 %v3036_v7, %v3036_v7 }
0x1799   : > { %4299 = vmatmul.mubr.msk.bf16.gmra.mrb[52].mxu0 %vm1139_vm2, %v3047_v35 }
0x17d7   : > { %v3143_v51 = vpop.f32.mrb[44].mxu0 }
0x17d8   : > { %v3144_v42 = vadd.f32 %v3143_v51, %v5984_v53  ;;  %v3145_v56 = vpop.f32.mrb[45].mxu0 }
0x17d9   : > { %v3146_v26 = vadd.f32 %v3145_v56, %v5988_v50  ;;  %v3147_v57 = vpop.f32.mrb[46].mxu0 }
0x17da   : > { %v4300_v40 = vmul.f32 -1.702, %v3144_v42  ;;  %v3148_v1 = vadd.f32 %v3147_v57, %v5984_v53  ;;  %v3149_v4 = vpop.f32.mrb[47].mxu0 }
0x17db   : > { %v4301_v3 = vmul.f32 -1.702, %v3146_v26  ;;  %v3150_v5 = vadd.f32 %v3149_v4, %v5988_v50 }
0x17dc   : > { %v3190_v12 = vmul.f32 1.442695, %v4300_v40  ;;  %v4302_v6 = vmul.f32 -1.702, %v3148_v1 }
0x17dd   : > { %v3192_v8 = vmul.f32 1.442695, %v4301_v3  ;;  %v4303_v11 = vmul.f32 -1.702, %v3150_v5 }
0x17de   : > { %4965 = vpow2.f32 %v3190_v12  ;;  %v3194_v14 = vmul.f32 1.442695, %v4302_v6 }
0x17df   : > { %4967 = vpow2.f32 %v3192_v8  ;;  %v3196_v10 = vmul.f32 1.442695, %v4303_v11 }
0x17e0   : > { %4969 = vpow2.f32 %v3194_v14 }
0x17e1   : > { %4971 = vpow2.f32 %v3196_v10 }
0x17e8   : > { %v4966_v15 = vpop.eup %4965 }
0x17e9   : > { %v4968_v16 = vpop.eup %4967  ;;  %v3210_v18 = vadd.f32 1.0, %v4966_v15 }
0x17ea   : > { %v4970_v19 = vpop.eup %4969  ;;  %v3211_v25 = vadd.f32 1.0, %v4968_v16 }
0x17eb   : > { %v4972_v60 = vpop.eup %4971  ;;  %4973 = vrcp.f32 %v3210_v18  ;;  %v3212_v55 = vadd.f32 1.0, %v4970_v19 }
0x17ec   : > { %4975 = vrcp.f32 %v3211_v25  ;;  %v3213_v30 = vadd.f32 1.0, %v4972_v60 }
0x17ed   : > { %4977 = vrcp.f32 %v3212_v55 }
0x17ee   : > { %4979 = vrcp.f32 %v3213_v30 }
0x17f5   : > { %v4974_v29 = vpop.eup %4973 }
0x17f6   : > { %v4976_v31 = vpop.eup %4975  ;;  %v3240_v46 = vmul.f32 %v4974_v29, %v3144_v42 }
0x17f7   : > { %v4978_v32 = vpop.eup %4977  ;;  %v3241_v52 = vmul.f32 %v4976_v31, %v3146_v26 }
0x17f8   : > { %v4980_v33 = vpop.eup %4979  ;;  %v3242_v47 = vmul.f32 %v4978_v32, %v3148_v1 }
0x17f9   : > { %v3243_v20 = vmul.f32 %v4980_v33, %v3150_v5 }
0x17fa   : > { %v3282_v54 = vpack.c.bf16 %v3242_v47, %v3240_v46 }
0x17fb   : > { %v3283_v59 = vpack.c.bf16 %v3243_v20, %v3241_v52  ;;  %v4310_v52 = vld [vmem:[%s6263_s6] ss:$0 sm:$0xff] }
0x17fd   : > { %3423 = vmatprep.mubr.bf16.mxu1 %v3283_v59 }
0x17fe   : > { %3424 = vmatmul.mubr.bf16.vlgmr.msra.gmra.mrb[44].mxu1 %v3282_v54 }
0x1864   : > { %v3153_v43 = vpop.f32.mrb[48].mxu0 }
0x1865   : > { %v3154_v61 = vadd.f32 %v3153_v43, %v5984_v53  ;;  %v3155_v63 = vpop.f32.mrb[49].mxu0 }
0x1866   : > { %v3156_v58 = vadd.f32 %v3155_v63, %v5988_v50  ;;  %v3157_v0 = vpop.f32.mrb[50].mxu0 }
0x1867   : > { %v4304_v2 = vmul.f32 -1.702, %v3154_v61  ;;  %v3158_v22 = vadd.f32 %v3157_v0, %v5984_v53  ;;  %v3159_v23 = vpop.f32.mrb[51].mxu0 }
0x1868   : > { %v4305_v9 = vmul.f32 -1.702, %v3156_v58  ;;  %v3160_v36 = vadd.f32 %v3159_v23, %v5988_v50 }
0x1869   : > { %v3198_v24 = vmul.f32 1.442695, %v4304_v2  ;;  %v4306_v37 = vmul.f32 -1.702, %v3158_v22 }
0x186a   : > { %v3200_v34 = vmul.f32 1.442695, %v4305_v9  ;;  %v4307_v38 = vmul.f32 -1.702, %v3160_v36 }
0x186b   : > { %4981 = vpow2.f32 %v3198_v24  ;;  %v3202_v27 = vmul.f32 1.442695, %v4306_v37 }
0x186c   : > { %4983 = vpow2.f32 %v3200_v34  ;;  %v3204_v41 = vmul.f32 1.442695, %v4307_v38  ;;  %v3163_v39 = vpop.f32.mrb[52].mxu0 }
0x186d   : > { %4985 = vpow2.f32 %v3202_v27  ;;  %v3164_v17 = vadd.f32 %v3163_v39, %v5984_v53  ;;  %v3165_v45 = vpop.f32.mrb[53].mxu0 }
0x186e   : > { %4987 = vpow2.f32 %v3204_v41  ;;  %v3166_v48 = vadd.f32 %v3165_v45, %v5988_v50  ;;  %v3167_v7 = vpop.f32.mrb[54].mxu0 }
0x186f   : > { %v4308_v35 = vmul.f32 -1.702, %v3164_v17  ;;  %v3168_v49 = vpop.f32.mrb[55].mxu0 }
0x1870   : > { %v4309_v51 = vmul.f32 -1.702, %v3166_v48 }
0x1871   : > { %v3206_v42 = vmul.f32 1.442695, %v4308_v35 }
0x1872   : > { %v3208_v56 = vmul.f32 1.442695, %v4309_v51 }
0x1873   : > { %4989 = vpow2.f32 %v3206_v42 }
0x1874   : > { %4991 = vpow2.f32 %v3208_v56 }
0x1875   : > { %v4982_v26 = vpop.eup %4981 }
0x1876   : > { %v4984_v57 = vpop.eup %4983  ;;  %v3214_v40 = vadd.f32 1.0, %v4982_v26 }
0x1877   : > { %v4986_v1 = vpop.eup %4985  ;;  %v3215_v4 = vadd.f32 1.0, %v4984_v57 }
0x1878   : > { %v4988_v3 = vpop.eup %4987  ;;  %4993 = vrcp.f32 %v3214_v40  ;;  %v3216_v53 = vadd.f32 1.0, %v4986_v1  ;;  %v5012_v40 = vld [vmem:[%s6223_s19 + $0xc] ss:$16 sps:$4 sm:$0xff] (!%p4327_p5)   ;;  %v5014_v1 = vld [vmem:[%s6223_s19] ss:$16 sps:$4 sm:$0xff] (!%p4327_p5)  }
0x1879   : > { %4995 = vrcp.f32 %v3215_v4  ;;  %v3217_v5 = vadd.f32 1.0, %v4988_v3  ;;  %v5015_v4 = vld [vmem:[%s6223_s19 + $0x8] ss:$16 sps:$4 sm:$0xff] (!%p4327_p5)   ;;  %v5016_v3 = vld [vmem:[%s6223_s19 + $0x24] ss:$16 sps:$4 sm:$0xff] (!%p4327_p5)   ;;  %3634 = vmatprep.subr.bf16.mxu1 (!%p4327_p5), %v5012_v40 }
0x187a   : > { %4997 = vrcp.f32 %v3216_v53  ;;  %v5018_v53 = vld [vmem:[%s6223_s19 + $0x2c] ss:$16 sps:$4 sm:$0xff] (!%p4327_p5)   ;;  %3635 = vmatpush1.bf16.msra.mxu1 (!%p4327_p5), %v5015_v4  ;;  %v5053_v40 = vld [vmem:[%s6266_s30 + $0xa0] sm:$0xff] (!%p4327_p5)  }
0x187b   : > { %4999 = vrcp.f32 %v3217_v5  ;;  %v5020_v5 = vld [vmem:[%s6223_s19 + $0x20] ss:$16 sps:$4 sm:$0xff] (!%p4327_p5)   ;;  %3636 = vmatprep.subr.bf16.mxu1 (!%p4327_p5), %v5018_v53  ;;  %v5055_v4 = vld [vmem:[%s6266_s30 + $0xe8] sm:$0xff] (!%p4327_p5)  }
0x187c   : > { %v5057_v53 = vld [vmem:[%s6266_s30 + $0xa8] sm:$0xff] (!%p4327_p5)  }
0x187d   : > { %v4990_v50 = vpop.eup %4989 }
0x187e   : > { %v4992_v12 = vpop.eup %4991  ;;  %v3218_v6 = vadd.f32 1.0, %v4990_v50  ;;  %v5021_v50 = vld [vmem:[%s6223_s19 + $0x28] ss:$16 sps:$4 sm:$0xff] (!%p4327_p5)  }
0x187f   : > { %v3219_v8 = vadd.f32 1.0, %v4992_v12  ;;  %v5022_v12 = vld [vmem:[%s6223_s19 + $0x44] ss:$16 sps:$4 sm:$0xff] (!%p4327_p5)   ;;  %3637 = vmatpush1.bf16.msra.mxu1 (!%p4327_p5), %v5021_v50 }
0x1880   : > { %5001 = vrcp.f32 %v3218_v6  ;;  %v5024_v6 = vld [vmem:[%s6223_s19 + $0x4c] ss:$16 sps:$4 sm:$0xff] (!%p4327_p5)   ;;  %v5059_v50 = vld [vmem:[%s6266_s30 + $0xf0] sm:$0xff] (!%p4327_p5)  }
0x1881   : > { %5003 = vrcp.f32 %v3219_v8  ;;  %v5119_v8 = vmov (!%p4327_p5), 0   ;;  %3638 = vmatprep.subr.bf16.mxu1 (!%p4327_p5), %v5024_v6  ;;  %v5061_v6 = vld [vmem:[%s6266_s30 + $0xb0] sm:$0xff] (!%p4327_p5)  }
0x1882   : > { %v4994_v11 = vpop.eup %4993  ;;  %3625 = vmatprep.mubr.bf16.mxu0 (!%p4327_p5), %v5119_v8 }
0x1883   : > { %v4996_v14 = vpop.eup %4995  ;;  %v3244_v16 = vmul.f32 %v4994_v11, %v3154_v61  ;;  %v5026_v11 = vld [vmem:[%s6223_s19 + $0x40] ss:$16 sps:$4 sm:$0xff] (!%p4327_p5)  }
0x1884   : > { %v4998_v10 = vpop.eup %4997  ;;  %v3245_v19 = vmul.f32 %v4996_v14, %v3156_v58  ;;  %v5027_v14 = vld [vmem:[%s6223_s19 + $0x48] ss:$16 sps:$4 sm:$0xff] (!%p4327_p5)  }
0x1885   : > { %v5000_v15 = vpop.eup %4999  ;;  %v3246_v18 = vmul.f32 %v4998_v10, %v3158_v22  ;;  %v5028_v10 = vld [vmem:[%s6223_s19 + $0x64] ss:$16 sps:$4 sm:$0xff] (!%p4327_p5)   ;;  %3639 = vmatpush1.bf16.msra.mxu1 (!%p4327_p5), %v5027_v14  ;;  %v5064_v14 = vld [vmem:[%s6266_s30 + $0x38] sm:$0xff] (!%p4327_p5)  }
0x1886   : > { %v3247_v25 = vmul.f32 %v5000_v15, %v3160_v36  ;;  %v5030_v15 = vld [vmem:[%s6223_s19 + $0x6c] ss:$16 sps:$4 sm:$0xff] (!%p4327_p5)  }
0x1887   : > { %v3284_v60 = vpack.c.bf16 %v3246_v18, %v3244_v16  ;;  %v5032_v16 = vld [vmem:[%s6223_s19 + $0x60] ss:$16 sps:$4 sm:$0xff] (!%p4327_p5)   ;;  %v5033_v18 = vld [vmem:[%s6223_s19 + $0x68] ss:$16 sps:$4 sm:$0xff] (!%p4327_p5)   ;;  %3640 = vmatprep.subr.bf16.mxu1 (!%p4327_p5), %v5030_v15 }
0x1888   : > { %v3285_v55 = vpack.c.bf16 %v3247_v25, %v3245_v19 }
0x1889   : > { %3641 = vmatpush1.bf16.msra.mxu1 (!%p4327_p5), %v5033_v18 }
0x188a   : > { %v5002_v30 = vpop.eup %5001  ;;  %3431 = vmatprep.mubr.bf16.mxu1 %v3285_v55 }
0x188b   : > { %v5004_v29 = vpop.eup %5003  ;;  %3432 = vmatmul.mubr.bf16.gmra.mrb[48].mxu1 %v3284_v60  ;;  %v3248_v32 = vmul.f32 %v5002_v30, %v3164_v17  ;;  %v4328_v30 = vld [vmem:[%s6264_s3] ss:$0 sm:$0xff] (!%p4327_p5) }
0x188c   : > { %v3249_v31 = vmul.f32 %v5004_v29, %v3166_v48 }
0x188d   : > { %v3286_v46 = vpack.c.bf16 %v3248_v32, %v3248_v32 }
0x188e   : > { %v3287_v33 = vpack.c.bf16 %v3249_v31, %v3249_v31  ;;  %v4329_v31 = vld [vmem:[%s6265_s21] ss:$0 sm:$0xff] (!%p4327_p5) }
0x1890   : > { %3439 = vmatprep.mubr.bf16.mxu1 %v3287_v33 }
0x1893   : > { %3440 = vmatmul.mubr.bf16.gmra.mrb[52].mxu1 %v3286_v46 }
0x1894   : > { %3666 = vmatprep.mubr.bf16.mxu1 (!%p4327_p5), %v5119_v8  ;;  %v5062_v8 = vld [vmem:[%s6266_s30 + $0x78] sm:$0xff] (!%p4327_p5)  }
0x18d1   : > { %v4476_v47 = vpop.f32.mrb[44].mxu1 }
0x18d2   : > { %v4477_v20 = vpop.f32.mrb[45].mxu1 }
0x18d3   : > { %v4478_v54 = vadd.f32 %v4477_v20, %v4476_v47  ;;  %v4479_v59 = vpop.f32.mrb[46].mxu1  ;;  %v5034_v47 = vld [vmem:[%s6266_s30 + $0x40] sm:$0xff] (!%p4327_p5)  }
0x18d4   : > { %v4480_v43 = vpop.f32.mrb[47].mxu1  ;;  %v5036_v20 = vld [vmem:[%s6266_s30] sm:$0xff] (!%p4327_p5)  }
0x18d5   : > { %v3426_v61 = vadd.f32 %v4478_v54, %v4310_v52  ;;  %v4481_v63 = vadd.f32 %v4480_v43, %v4479_v59  ;;  %v5037_v54 = vld [vmem:[%s6266_s30 + $0x80] sm:$0xff] (!%p4327_p5)   ;;  %v5038_v59 = vld [vmem:[%s6266_s30 + $0x48] sm:$0xff] (!%p4327_p5)  }
0x18d6   : > { %v5039_v43 = vld [vmem:[%s6266_s30 + $0xc8] sm:$0xff] (!%p4327_p5)  }
0x18d7   : > { %v3447_v58 = vadd.f32 %v3426_v61, %v5856_v28  ;;  %v3429_v0 = vadd.f32 %v4481_v63, %v4310_v52  ;;  %v5040_v61 = vld [vmem:[%s6266_s30 + $0x8] sm:$0xff] (!%p4327_p5)  }
0x18d8   : > { %v5041_v63 = vld [vmem:[%s6266_s30 + $0x88] sm:$0xff] (!%p4327_p5)  }
0x18d9   : > { %3452 = vst.msk [vmem:[#allocation2] sm:$0xff] %vm1139_vm2, %v3447_v58  ;;  %v3448_v2 = vadd.f32 %v3429_v0, %v5851_v62  ;;  %v5042_v58 = vld [vmem:[%s6266_s30 + $0x50] sm:$0xff] (!%p4327_p5)  }
0x18da   : > { %v5043_v0 = vld [vmem:[%s6266_s30 + $0xd0] sm:$0xff] (!%p4327_p5)  }
0x18db   : > { %3453 = vst.msk [vmem:[#allocation2 + $0x8] sm:$0xff] %vm1139_vm2, %v3448_v2  ;;  %v5044_v2 = vld [vmem:[%s6266_s30 + $0x10] sm:$0xff] (!%p4327_p5)  }
0x195e   : > { %v4482_v22 = vpop.f32.mrb[48].mxu1 }
0x195f   : > { %v4483_v23 = vpop.f32.mrb[49].mxu1 }
0x1960   : > { %v4484_v9 = vadd.f32 %v4483_v23, %v4482_v22  ;;  %v4485_v36 = vpop.f32.mrb[50].mxu1  ;;  %v5045_v22 = vld [vmem:[%s6266_s30 + $0x90] sm:$0xff] (!%p4327_p5)   ;;  %v5046_v23 = vld [vmem:[%s6266_s30 + $0x58] sm:$0xff] (!%p4327_p5)  }
0x1961   : > { %v4486_v24 = vpop.f32.mrb[51].mxu1 }
0x1962   : > { %v3434_v37 = vadd.f32 %v4484_v9, %v4310_v52  ;;  %v4487_v34 = vadd.f32 %v4486_v24, %v4485_v36  ;;  %v5047_v9 = vld [vmem:[%s6266_s30 + $0xd8] sm:$0xff] (!%p4327_p5)  }
0x1963   : > { %v5048_v36 = vld [vmem:[%s6266_s30 + $0x18] sm:$0xff] (!%p4327_p5)  }
0x1964   : > { %v3449_v38 = vadd.f32 %v3434_v37, %v5890_v13  ;;  %v3437_v27 = vadd.f32 %v4487_v34, %v4310_v52  ;;  %v3461_v13 = vld [vmem:[#allocation2] sm:$0xff] (!%p4327_p5)  ;;  %v5049_v24 = vld [vmem:[%s6266_s30 + $0x98] sm:$0xff] (!%p4327_p5)  }
0x1966   : > { %3454 = vst.msk [vmem:[#allocation2 + $0x10] sm:$0xff] %vm1139_vm2, %v3449_v38  ;;  %v3450_v28 = vadd.f32 %v3437_v27, %v5893_v21  ;;  %v4488_v41 = vpop.f32.mrb[52].mxu1 }
0x1967   : > { %v4489_v39 = vpop.f32.mrb[53].mxu1 }
0x1968   : > { %3455 = vst.msk [vmem:[#allocation2 + $0x18] sm:$0xff] %vm1139_vm2, %v3450_v28  ;;  %v4490_v62 = vadd.f32 %v4489_v39, %v4488_v41  ;;  %v4491_v17 = vpop.f32.mrb[54].mxu1  ;;  %3460 = sbr.rel (%p4327_p5) target bundleno = 7426 (0x1d02), region = 116 }
0x1969   : > { %v4492_v45 = vpop.f32.mrb[55].mxu1 }
0x196a   : > { %v3442_v48 = vadd.f32 %v4490_v62, %v4310_v52  ;;  %v5035_v52 = vld [vmem:[%s6266_s30 + $0xc0] sm:$0xff] (!%p4327_p5)  }
0x196b   : > { %4516 = vmatprep.subr.bf16.mxu1 (!%p4327_p5), %v5035_v52 }
0x196c   : > { %v3451_v7 = vadd.f32 %v3442_v48, %v5901_v44  ;;  %v5010_v44 = vld [vmem:[%s6223_s19 + $0x4] ss:$16 sps:$4 sm:$0xff] (!%p4327_p5)  }
0x196d   : > { %v3462_v35 = vld [vmem:[#allocation2 + $0x10] sm:$0xff] (!%p4327_p5)  ;;  %3593 = vmatprep.subr.bf16.mxu0 (!%p4327_p5), %v5010_v44  ;;  %v5052_v44 = vld [vmem:[%s6266_s30 + $0x20] sm:$0xff] (!%p4327_p5)  }
0x196e   : > { %3456 = vst.msk [vmem:[#allocation2 + $0x20] sm:$0x3] %vm1152_vm3, %v3451_v7  ;;  %v3463_v49 = vsel (!%p4327_p5), %vm1481_vm5, %v3461_v13, %v3462_v35  ;;  %3594 = vmatpush1.bf16.msra.mxu0 (!%p4327_p5), %v5014_v1  ;;  %v5054_v1 = vld [vmem:[%s6266_s30 + $0x68] sm:$0xff] (!%p4327_p5)  }
0x196f   : > { %v3466_v21 = vsel %vm1152_vm3, %v3463_v49, 0.0  ;;  %3595 = vmatprep.subr.bf16.mxu0 %v5016_v3  ;;  %v5056_v3 = vld [vmem:[%s6266_s30 + $0x28] sm:$0xff]  }
0x1970   : > { %3467 = vadd.xlane.f32.xlu0 %v3466_v21 }
0x1972   : > { %3596 = vmatpush1.bf16.msra.mxu0 %v5020_v5  ;;  %v5058_v5 = vld [vmem:[%s6266_s30 + $0x70] sm:$0xff]  }
0x1973   : > { %3597 = vmatprep.subr.bf16.mxu0 %v5022_v12  ;;  %v5060_v12 = vld [vmem:[%s6266_s30 + $0x30] sm:$0xff]  }
0x1976   : > { %3598 = vmatpush1.bf16.msra.mxu0 %v5026_v11  ;;  %v5063_v11 = vld [vmem:[%s6266_s30 + $0xf8] sm:$0xff]  }
0x1977   : > { %3599 = vmatprep.subr.bf16.mxu0 %v5028_v10  ;;  %v5065_v10 = vld [vmem:[%s6266_s30 + $0xb8] sm:$0xff]  }
0x197a   : > { %3600 = vmatpush1.bf16.msra.mxu0 %v5032_v16 }
0x197b   : > { %4494 = vmatprep.subr.bf16.mxu0 %v5034_v47 }
0x19fd   : > { %v3468_v51 = vpop.xlane.xlu0 %3467 }
0x19fe   : > { %v3469_v42 = vmul.f32 0.015625, %v3468_v51 }
0x1a00   : > { %v3470_v56 = vsub.f32 %v3463_v49, %v3469_v42 }
0x1a02   : > { %v3471_v26 = vmul.f32 %v3470_v56, %v3470_v56 }
0x1a04   : > { %v3472_v57 = vsel %vm1152_vm3, %v3471_v26, 0.0  ;;  %v5050_v26 = vld [vmem:[%s6266_s30 + $0x60] sm:$0xff]  }
0x1a05   : > { %3473 = vadd.xlane.f32.xlu0 %v3472_v57  ;;  %v5051_v57 = vld [vmem:[%s6266_s30 + $0xe0] sm:$0xff]  }
0x1a92   : > { %v3474_v19 = vpop.xlane.xlu0 %3473 }
0x1a93   : > { %v3475_v25 = vmul.f32 0.015625, %v3474_v19 }
0x1a95   : > { %v3476_v60 = vadd.f32 1e-05, %v3475_v25 }
0x1a97   : > { %5066 = vrsqrt.f32 %v3476_v60 }
0x1aa1   : > { %v5067_v55 = vpop.eup %5066 }
0x1aa2   : > { %v3478_v29 = vmul.f32 %v5067_v55, %v3470_v56 }
0x1aa4   : > { %v3485_v32 = vmul.f32 %v4328_v30, %v3478_v29 }
0x1aa6   : > { %v3492_v33 = vadd.f32 %v4329_v31, %v3485_v32 }
0x1aa8   : > { %v3509_v46 = vpack.c.bf16 %v3492_v33, %v3492_v33 }
0x1aaa   : > { %4346 = vmatmul.mubr.msk.bf16.vlgmr.msra.gmra.mrb[0].mxu0 %vm1139_vm2, %v3509_v46  ;;  %4347 = vmatmul.mubr.msk.bf16.vlgmr.msra.gmra.mrb[0].mxu1 %vm1139_vm2, %v3509_v46  ;;  %v4348_v46 = vld [vmem:[%s6267_s29] ss:$0 sm:$0xff] }
0x1aab   : > { %4495 = vmatpush3.bf16.msra.mxu0 %v5036_v20  ;;  %4517 = vmatpush3.bf16.msra.mxu1 %v5037_v54 }
0x1aac   : > { %4496 = vmatprep.subr.bf16.mxu0 %v5038_v59  ;;  %4518 = vmatprep.subr.bf16.mxu1 %v5039_v43 }
0x1aaf   : > { %4497 = vmatpush3.bf16.msra.mxu0 %v5040_v61  ;;  %4519 = vmatpush3.bf16.msra.mxu1 %v5041_v63 }
0x1ab0   : > { %4498 = vmatprep.subr.bf16.mxu0 %v5042_v58  ;;  %4520 = vmatprep.subr.bf16.mxu1 %v5043_v0 }
0x1ab3   : > { %4499 = vmatpush3.bf16.msra.mxu0 %v5044_v2  ;;  %4521 = vmatpush3.bf16.msra.mxu1 %v5045_v22 }
0x1ab4   : > { %4500 = vmatprep.subr.bf16.mxu0 %v5046_v23  ;;  %4522 = vmatprep.subr.bf16.mxu1 %v5047_v9 }
0x1ab7   : > { %4501 = vmatpush3.bf16.msra.mxu0 %v5048_v36  ;;  %4523 = vmatpush3.bf16.msra.mxu1 %v5049_v24 }
0x1ab8   : > { %4502 = vmatprep.subr.bf16.mxu0 %v5050_v26  ;;  %4524 = vmatprep.subr.bf16.mxu1 %v5051_v57 }
0x1abb   : > { %4503 = vmatpush3.bf16.msra.mxu0 %v5052_v44  ;;  %4525 = vmatpush3.bf16.msra.mxu1 %v5053_v40 }
0x1abc   : > { %4504 = vmatprep.subr.bf16.mxu0 %v5054_v1  ;;  %4526 = vmatprep.subr.bf16.mxu1 %v5055_v4 }
0x1abf   : > { %4505 = vmatpush3.bf16.msra.mxu0 %v5056_v3  ;;  %4527 = vmatpush3.bf16.msra.mxu1 %v5057_v53 }
0x1ac0   : > { %4506 = vmatprep.subr.bf16.mxu0 %v5058_v5  ;;  %4528 = vmatprep.subr.bf16.mxu1 %v5059_v50 }
0x1ac3   : > { %4507 = vmatpush3.bf16.msra.mxu0 %v5060_v12  ;;  %4529 = vmatpush3.bf16.msra.mxu1 %v5061_v6 }
0x1ac4   : > { %4508 = vmatprep.subr.bf16.mxu0 %v5062_v8  ;;  %4530 = vmatprep.subr.bf16.mxu1 %v5063_v11 }
0x1ac7   : > { %4509 = vmatpush3.bf16.msra.mxu0 %v5064_v14  ;;  %4531 = vmatpush3.bf16.msra.mxu1 %v5065_v10 }
0x1b7d   : > { %v3627_v37 = vpop.f32.mrb[0].mxu0  ;;  %v3668_v34 = vpop.f32.mrb[0].mxu1 }
0x1b7e   : > { %v3675_v38 = vmul.f32 %v3627_v37, %v3627_v37  ;;  %v3629_v27 = vpop.f32.mrb[1].mxu0  ;;  %v3670_v28 = vpop.f32.mrb[1].mxu1  ;;  %v3677_v41 = vmul.f32 %v3668_v34, %v3668_v34 }
0x1b7f   : > { %v3676_v39 = vmul.f32 %v3629_v27, %v3629_v27  ;;  %v3631_v62 = vpop.f32.mrb[2].mxu0  ;;  %v3672_v17 = vpop.f32.mrb[2].mxu1  ;;  %v3678_v35 = vmul.f32 %v3670_v28, %v3670_v28 }
0x1b80   : > { %v3680_v45 = vsel %vm3679_vm12, %v3675_v38, 0.0  ;;  %v3632_v48 = vpop.f32.mrb[3].mxu0  ;;  %v3673_v7 = vpop.f32.mrb[3].mxu1  ;;  %v3683_v21 = vsel %vm3679_vm12, %v3677_v41, 0.0 }
0x1b81   : > { %v3681_v13 = vsel %vm3679_vm12, %v3676_v39, 0.0  ;;  %v3685_v42 = vsel %vm3679_vm12, %v3678_v35, 0.0 }
0x1b82   : > { %v3682_v49 = vadd.f32 %v3681_v13, %v3680_v45 }
0x1b84   : > { %v3684_v51 = vadd.f32 %v3683_v21, %v3682_v49 }
0x1b86   : > { %v3686_v56 = vadd.f32 %v3685_v42, %v3684_v51 }
0x1b88   : > { %3687 = vadd.xlane.f32.xlu1 %v3686_v56 }
0x1c15   : > { %v3688_v15 = vpop.xlane.xlu1 %3687 }
0x1c16   : > { %5068 = vrsqrt.f32 %v3688_v15 }
0x1c20   : > { %v5069_v16 = vpop.eup %5068 }
0x1c21   : > { %v3691_v18 = vmul.f32 %v5069_v16, %v3629_v27  ;;  %v3693_v19 = vmul.f32 %v5069_v16, %v3670_v28  ;;  %v3690_v25 = vmul.f32 %v5069_v16, %v3627_v37  ;;  %v3692_v60 = vmul.f32 %v5069_v16, %v3668_v34 }
0x1c23   : > { %v3759_v55 = vpack.c.bf16 %v3691_v18, %v3691_v18  ;;  %v3761_v30 = vpack.c.bf16 %v3693_v19, %v3693_v19  ;;  %v3758_v29 = vpack.c.bf16 %v3690_v25, %v3690_v25  ;;  %v3760_v31 = vpack.c.bf16 %v3692_v60, %v3692_v60 }
0x1c25   : > { %3993 = vmatprep.mubr.bf16.mxu0 %v3759_v55  ;;  %4033 = vmatprep.mubr.bf16.mxu1 %v3761_v30 }
0x1c26   : > { %3994 = vmatmul.mubr.bf16.vlgmr.msra.gmra.mrb[4].mxu0 %v3758_v29  ;;  %4034 = vmatmul.mubr.bf16.vlgmr.msra.gmra.mrb[4].mxu1 %v3760_v31 }
0x1cf9   : > { %v4510_v32 = vpop.f32.mrb[4].mxu0  ;;  %v4532_v33 = vpop.f32.mrb[4].mxu1 }
0x1cfa   : > { %v4511_v47 = vpop.f32.mrb[5].mxu0  ;;  %v4533_v52 = vpop.f32.mrb[5].mxu1 }
0x1cfb   : > { %v4512_v20 = vadd.f32 %v4511_v47, %v4510_v32  ;;  %v4534_v54 = vadd.f32 %v4533_v52, %v4532_v33  ;;  %v4513_v59 = vpop.f32.mrb[6].mxu0  ;;  %v4535_v43 = vpop.f32.mrb[6].mxu1 }
0x1cfc   : > { %v4514_v61 = vpop.f32.mrb[7].mxu0  ;;  %v4536_v63 = vpop.f32.mrb[7].mxu1 }
0x1cfd   : > { %v3996_v58 = vadd.f32 %v4512_v20, %v4348_v46 }
0x1cff   : > { %v4036_v0 = vadd.f32 %v4534_v54, %v3996_v58 }
0x1d01   : > { %4041 = vst [vmem:[#allocation3] sm:$0x3] %v4036_v0 }
0x1d02 PF: > { %p4730_p6 = scmp.eq.s32.totalorder %s5242_s28, 1  ;;  %s5120_s21 = smov [#allocation3]  }
0x1d03   : > { %s4049_s23 = sshll.u32 %s5120_s21, 4  ;;  %s4050_s23 = int_to_ptr.vmem [resolvable:$true] %s4049_s23 }
0x1d04   : > { %s5070_s1 = scalar_lea.vmem %s4050_s23, 32  ;;  %p5077_p10 = scmp.lt.s32.totalorder %s4050_s23, %s4050_s23 }
0x1d05   : > { %p5071_p7 = scmp.ne.s32.totalorder %s4050_s23, %s5070_s1  ;;  %p5078_p11 = scmp.lt.s32.totalorder %s5070_s1, %s5070_s1 }
0x1d07   : > { %p5072_p8 = pnand %p5071_p7, %p4730_p6  ;;  %p5079_p12 = por %p5078_p11, %p5077_p10 }
0x1d09   : > { %p5073_p9 = pneg %p5072_p8 }
0x1d0b   : > { %p5080_p13 = pnand %p5079_p12, %p5073_p9 }
0x1d0d   : > { %5083 = shalt.err (!%p5080_p13)
}
0x1d0e   : > { %s6268_s5 = sld [smem:[#allocation20_spill]] }
0x1d14   : > { %s5084_s26 = scalar_lea.hbm %s6268_s5, 32 }
0x1d15   : > { %p5085_p0 = scmp.ne.s32.totalorder %s6268_s5, %s5084_s26  ;;  %p5090_p3 = scmp.lt.u32.totalorder %s5084_s26, %s6268_s5 }
0x1d17   : > { %p5086_p1 = pnand %p5085_p0, %p4730_p6 }
0x1d19   : > { %p5087_p2 = pneg %p5086_p1 }
0x1d1b   : > { %p5092_p4 = pnand %p5090_p3, %p5087_p2 }
0x1d1d   : > { %5095 = shalt.err (!%p5092_p4)
}
0x1d1e   : > { %4727 = dma.vmem_to_hbm [thread:$0]  (%p4730_p6), %s4050_s23, 32, %s6268_s5, [#allocation4]  }
0x1d1f   : > { %5101 = dma.done.wait (%p4730_p6), [#allocation4], 32  }
0x1d20   : > { %5103 = vsyncadd (%p4730_p6), [#allocation4], 4294967264 }
0x1d21 PF: > { %s6269_s0 = sld [smem:[#allocation6_spill]] }
0x1d27   : > { %s33_s3 = sadd.s32 1, %s6269_s0  }
0x1d28   : > { %p30_p5 = scmp.ge.s32.totalorder %s33_s3, 4  }
0x1d2a   :  { %32 = sbr.rel (!%p30_p5) target bundleno = 16 (0x10), region = 176 }
0x1d31   :  { %4062 = vsyncpa [#allocation4], 1 }
0x1d32   :  { %4064 = vsyncpa [#allocation4 + $0x1], 1 }

</bundles_post_ra>
